<compile_context>
chip_gen: v6e
topology: v6e:2x2x1
jax: 0.10.0
libtpu: 0.0.40
codegen_flags: <defaults>
</compile_context>

<pallas_src>
import math
import jax
import jax.numpy as jnp
from jax.experimental import pallas as pl
from jax.experimental.pallas import tpu as pltpu


def _round_up(n, m):
    return ((n + m - 1) // m) * m


def gating_kernel(x_ref, w1_ref, b1_ref, w2_ref, b2_ref, w3_ref, b3_ref,
                  w4_ref, b4_ref, mu_ref, sparse_ref, gates_ref):
    x = x_ref[...]                                   # (tile_b, D) f32

    # Layer 1: D -> 512.  bf16 operands into the MXU, f32 accumulation,
    # bias-add/ReLU in f32, result stored bf16 for the next layer.
    h = jnp.dot(x.astype(jnp.bfloat16), w1_ref[...],
                preferred_element_type=jnp.float32) + b1_ref[...]
    h = jnp.maximum(h, 0.0).astype(jnp.bfloat16)

    # Layer 2: 512 -> 2048.
    h = jnp.dot(h, w2_ref[...], preferred_element_type=jnp.float32) + b2_ref[...]
    h = jnp.maximum(h, 0.0).astype(jnp.bfloat16)

    # Layer 3: 2048 -> 512.
    h = jnp.dot(h, w3_ref[...], preferred_element_type=jnp.float32) + b3_ref[...]
    h = jnp.maximum(h, 0.0).astype(jnp.bfloat16)

    # Layer 4: 512 -> D, Tanh (f32 epilogue).
    mu = jnp.tanh(jnp.dot(h, w4_ref[...],
                          preferred_element_type=jnp.float32) + b4_ref[...])

    # hard_sigmoid(mu) = clamp(mu + 0.5, 0, 1); sparse_x = x * gates.
    gates = jnp.clip(mu + 0.5, 0.0, 1.0)

    # Three direct lane-offset-0 stores (no concatenate, no packed slab).
    mu_ref[...] = mu
    sparse_ref[...] = x * gates
    gates_ref[...] = gates


def _choose_tile_b(batch, input_dim):
    """Largest batch tile with small padding waste; VMEM-aware cap; keep the
    grid >= 2 steps so v7x's second TensorCore has work."""
    padded8 = _round_up(batch, 8)
    # Wider feature dims -> bigger x/out tiles; cap tile_b for v7x's 64 MiB VMEM.
    if input_dim <= 1024:
        max_tile = 512
    elif input_dim <= 4096:
        max_tile = 256
    else:
        max_tile = 128
    tile = min(padded8, 8)
    for t in (512, 256, 128, 64, 32, 16, 8):
        if t > max_tile or t > padded8:
            continue
        padded = _round_up(batch, t)
        if (padded - batch) <= max(0.125 * batch, 8):
            tile = t
            break
    # Avoid a 1-step grid when we could split across two TensorCores.
    while tile > 8 and _round_up(batch, tile) // tile < 2:
        tile //= 2
    return tile


def prepare_params(params):
    """Cast weights to bf16 once at setup time (keep biases f32)."""
    w1, b1, w2, b2, w3, b3, w4, b4 = params
    cast = lambda w: w.astype(jnp.bfloat16)
    return (cast(w1), b1, cast(w2), b2, cast(w3), b3, cast(w4), b4)


def gating_net_forward(x, params, tile_b=None):
    """x: (batch, input_dim) f32; params: (W1,b1,...,W4,b4), weights bf16
    (use prepare_params) or f32 (cast here as a fallback)."""
    batch, input_dim = x.shape
    w1, b1, w2, b2, w3, b3, w4, b4 = params
    w1, w2, w3, w4 = (w if w.dtype == jnp.bfloat16 else w.astype(jnp.bfloat16)
                      for w in (w1, w2, w3, w4))

    if tile_b is None:
        tile_b = _choose_tile_b(batch, input_dim)
    padded = _round_up(batch, tile_b)
    x_in = x if padded == batch else jnp.pad(x, ((0, padded - batch), (0, 0)))
    grid = (padded // tile_b,)

    # Weights/biases: constant index_map + single buffer -> DMA'd once,
    # resident in VMEM, no wasted second pipeline buffer.
    def resident(arr):
        nd = arr.ndim
        return pl.BlockSpec(arr.shape, lambda i, _nd=nd: (0,) * _nd,
                            pipeline_mode=pl.Buffered(1))

    in_specs = [
        pl.BlockSpec((tile_b, input_dim), lambda i: (i, 0)),   # x tile
        resident(w1), resident(b1), resident(w2), resident(b2),
        resident(w3), resident(b3), resident(w4), resident(b4),
    ]
    out_block = pl.BlockSpec((tile_b, input_dim), lambda i: (i, 0))
    out_specs = [out_block, out_block, out_block]
    out_shape = tuple(jax.ShapeDtypeStruct((padded, input_dim), jnp.float32)
                      for _ in range(3))

    flops = 2 * padded * (input_dim * 512 + 512 * 2048 + 2048 * 512
                          + 512 * input_dim)
    bytes_accessed = (
        x_in.size * 4
        + sum(w.size * 2 for w in (w1, w2, w3, w4))
        + sum(b.size * 4 for b in (b1, b2, b3, b4))
        + 3 * padded * input_dim * 4
    )
    cost = pl.CostEstimate(flops=flops,
                           transcendentals=padded * input_dim,
                           bytes_accessed=bytes_accessed)

    mu, sparse_x, gates = pl.pallas_call(
        gating_kernel,
        out_shape=out_shape,
        grid=grid,
        in_specs=in_specs,
        out_specs=out_specs,
        compiler_params=pltpu.CompilerParams(
            dimension_semantics=("parallel",),
            vmem_limit_bytes=48 << 20,   # fits v7x's 64 MiB physical VMEM
        ),
        cost_estimate=cost,
    )(x_in, w1, b1, w2, b2, w3, b3, w4, b4)

    return mu[:batch], sparse_x[:batch], gates[:batch]


def init_params(key, input_dim):
    """Deterministic init matching GatingNet.init_weights:
    xavier_normal_ weights, bias=0.0 except last layer bias=0.5."""
    dims = [input_dim, 512, 2048, 512, input_dim]
    params = []
    keys = jax.random.split(key, 4)
    for i, (fan_in, fan_out) in enumerate(zip(dims[:-1], dims[1:])):
        std = math.sqrt(2.0 / (fan_in + fan_out))
        w = std * jax.random.normal(keys[i], (fan_in, fan_out), dtype=jnp.float32)
        bias_val = 0.5 if fan_out == input_dim else 0.0
        b = jnp.full((1, fan_out), bias_val, dtype=jnp.float32)
        params.extend([w, b])
    return tuple(params)


def reference_forward(x, params):
    w1, b1, w2, b2, w3, b3, w4, b4 = params
    h = jnp.maximum(x @ w1 + b1, 0.0)
    h = jnp.maximum(h @ w2 + b2, 0.0)
    h = jnp.maximum(h @ w3 + b3, 0.0)
    mu = jnp.tanh(h @ w4 + b4)
    gates = jnp.clip(mu + 0.5, 0.0, 1.0)
    return mu, x * gates, gates


if __name__ == "__main__":
    key = jax.random.PRNGKey(0)
    kx, kp = jax.random.split(key)

    batch, input_dim = 8, 16
    x = jax.random.normal(kx, (batch, input_dim), dtype=jnp.float32)
    params_f32 = init_params(kp, input_dim)
    params = prepare_params(params_f32)          # bf16 weights, cast once

    mu, sparse_x, gates = gating_net_forward(x, params)
    jax.block_until_ready((mu, sparse_x, gates))

    mu_ref, sparse_ref, gates_ref = reference_forward(x, params_f32)
    # bf16 MXU operands (f32 accumulation) -> loosened tolerance vs f32 ref.
    assert jnp.allclose(mu, mu_ref, atol=3e-2, rtol=3e-2), "mu mismatch"
    assert jnp.allclose(sparse_x, sparse_ref, atol=3e-2, rtol=3e-2), "sparse_x mismatch"
    assert jnp.allclose(gates, gates_ref, atol=3e-2, rtol=3e-2), "gates mismatch"

    print("KERNEL_OK")
</pallas_src>

<mosaic_0001>
module attributes {stable_mosaic.version = 11 : i64} {
  func.func @gating_kernel(%arg0: i32, %arg1: memref<8x16xf32, #tpu.memory_space<vmem>>, %arg2: memref<16x512xbf16, #tpu.memory_space<vmem>>, %arg3: memref<1x512xf32, #tpu.memory_space<vmem>>, %arg4: memref<512x2048xbf16, #tpu.memory_space<vmem>>, %arg5: memref<1x2048xf32, #tpu.memory_space<vmem>>, %arg6: memref<2048x512xbf16, #tpu.memory_space<vmem>>, %arg7: memref<1x512xf32, #tpu.memory_space<vmem>>, %arg8: memref<512x16xbf16, #tpu.memory_space<vmem>>, %arg9: memref<1x16xf32, #tpu.memory_space<vmem>>, %arg10: memref<8x16xf32, #tpu.memory_space<vmem>>, %arg11: memref<8x16xf32, #tpu.memory_space<vmem>>, %arg12: memref<8x16xf32, #tpu.memory_space<vmem>>) attributes {dimension_semantics = [#tpu.dimension_semantics<parallel>], iteration_bounds = array<i64: 1>, scalar_prefetch = 0 : i64, scratch_operands = 0 : i64, tpu.core_type = #tpu.core_type<tc>, window_params = [{transform_indices = @transform_0, window_bounds = array<i64: 8, 16>}, {pipeline_mode = #tpu.pipeline_mode<synchronous>, transform_indices = @transform_1, window_bounds = array<i64: 16, 512>}, {pipeline_mode = #tpu.pipeline_mode<synchronous>, transform_indices = @transform_2, window_bounds = array<i64: 1, 512>}, {pipeline_mode = #tpu.pipeline_mode<synchronous>, transform_indices = @transform_3, window_bounds = array<i64: 512, 2048>}, {pipeline_mode = #tpu.pipeline_mode<synchronous>, transform_indices = @transform_4, window_bounds = array<i64: 1, 2048>}, {pipeline_mode = #tpu.pipeline_mode<synchronous>, transform_indices = @transform_5, window_bounds = array<i64: 2048, 512>}, {pipeline_mode = #tpu.pipeline_mode<synchronous>, transform_indices = @transform_6, window_bounds = array<i64: 1, 512>}, {pipeline_mode = #tpu.pipeline_mode<synchronous>, transform_indices = @transform_7, window_bounds = array<i64: 512, 16>}, {pipeline_mode = #tpu.pipeline_mode<synchronous>, transform_indices = @transform_8, window_bounds = array<i64: 1, 16>}, {transform_indices = @transform_9, window_bounds = array<i64: 8, 16>}, {transform_indices = @transform_10, window_bounds = array<i64: 8, 16>}, {transform_indices = @transform_11, window_bounds = array<i64: 8, 16>}]} {
    %c0 = arith.constant 0 : index
    %c0_0 = arith.constant 0 : index
    %0 = vector.load %arg1[%c0, %c0_0] : memref<8x16xf32, #tpu.memory_space<vmem>>, vector<8x16xf32>
    %1 = arith.truncf %0 : vector<8x16xf32> to vector<8x16xbf16>
    %c0_1 = arith.constant 0 : index
    %c0_2 = arith.constant 0 : index
    %2 = vector.load %arg2[%c0_1, %c0_2] : memref<16x512xbf16, #tpu.memory_space<vmem>>, vector<16x512xbf16>
    %cst = arith.constant dense<0.000000e+00> : vector<8x512xf32>
    %3 = tpu.matmul %1, %2, %cst {dimension_numbers = #tpu.dot_dimension_numbers<[1], [0], [0], [1], [0, 0, 1, 1], [], []>} : vector<8x16xbf16>, vector<16x512xbf16>, vector<8x512xf32> -> vector<8x512xf32>
    %c0_3 = arith.constant 0 : index
    %c0_4 = arith.constant 0 : index
    %4 = vector.load %arg3[%c0_3, %c0_4] : memref<1x512xf32, #tpu.memory_space<vmem>>, vector<1x512xf32>
    %5 = vector.broadcast %4 : vector<1x512xf32> to vector<8x512xf32>
    %6 = arith.addf %3, %5 : vector<8x512xf32>
    %cst_5 = arith.constant 0.000000e+00 : f32
    %7 = vector.broadcast %cst_5 : f32 to vector<8x512xf32>
    %8 = arith.maximumf %6, %7 : vector<8x512xf32>
    %9 = arith.truncf %8 : vector<8x512xf32> to vector<8x512xbf16>
    %c0_6 = arith.constant 0 : index
    %c0_7 = arith.constant 0 : index
    %10 = vector.load %arg4[%c0_6, %c0_7] : memref<512x2048xbf16, #tpu.memory_space<vmem>>, vector<512x2048xbf16>
    %cst_8 = arith.constant dense<0.000000e+00> : vector<8x2048xf32>
    %11 = tpu.matmul %9, %10, %cst_8 {dimension_numbers = #tpu.dot_dimension_numbers<[1], [0], [0], [1], [0, 0, 1, 1], [], []>} : vector<8x512xbf16>, vector<512x2048xbf16>, vector<8x2048xf32> -> vector<8x2048xf32>
    %c0_9 = arith.constant 0 : index
    %c0_10 = arith.constant 0 : index
    %12 = vector.load %arg5[%c0_9, %c0_10] : memref<1x2048xf32, #tpu.memory_space<vmem>>, vector<1x2048xf32>
    %13 = vector.broadcast %12 : vector<1x2048xf32> to vector<8x2048xf32>
    %14 = arith.addf %11, %13 : vector<8x2048xf32>
    %cst_11 = arith.constant 0.000000e+00 : f32
    %15 = vector.broadcast %cst_11 : f32 to vector<8x2048xf32>
    %16 = arith.maximumf %14, %15 : vector<8x2048xf32>
    %17 = arith.truncf %16 : vector<8x2048xf32> to vector<8x2048xbf16>
    %c0_12 = arith.constant 0 : index
    %c0_13 = arith.constant 0 : index
    %18 = vector.load %arg6[%c0_12, %c0_13] : memref<2048x512xbf16, #tpu.memory_space<vmem>>, vector<2048x512xbf16>
    %cst_14 = arith.constant dense<0.000000e+00> : vector<8x512xf32>
    %19 = tpu.matmul %17, %18, %cst_14 {dimension_numbers = #tpu.dot_dimension_numbers<[1], [0], [0], [1], [0, 0, 1, 1], [], []>} : vector<8x2048xbf16>, vector<2048x512xbf16>, vector<8x512xf32> -> vector<8x512xf32>
    %c0_15 = arith.constant 0 : index
    %c0_16 = arith.constant 0 : index
    %20 = vector.load %arg7[%c0_15, %c0_16] : memref<1x512xf32, #tpu.memory_space<vmem>>, vector<1x512xf32>
    %21 = vector.broadcast %20 : vector<1x512xf32> to vector<8x512xf32>
    %22 = arith.addf %19, %21 : vector<8x512xf32>
    %cst_17 = arith.constant 0.000000e+00 : f32
    %23 = vector.broadcast %cst_17 : f32 to vector<8x512xf32>
    %24 = arith.maximumf %22, %23 : vector<8x512xf32>
    %25 = arith.truncf %24 : vector<8x512xf32> to vector<8x512xbf16>
    %c0_18 = arith.constant 0 : index
    %c0_19 = arith.constant 0 : index
    %26 = vector.load %arg8[%c0_18, %c0_19] : memref<512x16xbf16, #tpu.memory_space<vmem>>, vector<512x16xbf16>
    %cst_20 = arith.constant dense<0.000000e+00> : vector<8x16xf32>
    %27 = tpu.matmul %25, %26, %cst_20 {dimension_numbers = #tpu.dot_dimension_numbers<[1], [0], [0], [1], [0, 0, 1, 1], [], []>} : vector<8x512xbf16>, vector<512x16xbf16>, vector<8x16xf32> -> vector<8x16xf32>
    %c0_21 = arith.constant 0 : index
    %c0_22 = arith.constant 0 : index
    %28 = vector.load %arg9[%c0_21, %c0_22] : memref<1x16xf32, #tpu.memory_space<vmem>>, vector<1x16xf32>
    %29 = vector.broadcast %28 : vector<1x16xf32> to vector<8x16xf32>
    %30 = arith.addf %27, %29 : vector<8x16xf32>
    %31 = math.tanh %30 : vector<8x16xf32>
    %cst_23 = arith.constant 5.000000e-01 : f32
    %32 = vector.broadcast %cst_23 : f32 to vector<8x16xf32>
    %33 = arith.addf %31, %32 : vector<8x16xf32>
    %cst_24 = arith.constant 0.000000e+00 : f32
    %cst_25 = arith.constant 1.000000e+00 : f32
    %34 = vector.broadcast %cst_24 : f32 to vector<8x16xf32>
    %35 = arith.maximumf %34, %33 : vector<8x16xf32>
    %36 = vector.broadcast %cst_25 : f32 to vector<8x16xf32>
    %37 = arith.minimumf %36, %35 : vector<8x16xf32>
    %c0_26 = arith.constant 0 : index
    %c0_27 = arith.constant 0 : index
    %38 = vector.load %arg10[%c0_26, %c0_27] : memref<8x16xf32, #tpu.memory_space<vmem>>, vector<8x16xf32>
    tpu.vector_store %arg10[%c0_26, %c0_27], %31 {strides = array<i32>} : memref<8x16xf32, #tpu.memory_space<vmem>>, vector<8x16xf32>,
    %39 = arith.mulf %0, %37 : vector<8x16xf32>
    %c0_28 = arith.constant 0 : index
    %c0_29 = arith.constant 0 : index
    %40 = vector.load %arg11[%c0_28, %c0_29] : memref<8x16xf32, #tpu.memory_space<vmem>>, vector<8x16xf32>
    tpu.vector_store %arg11[%c0_28, %c0_29], %39 {strides = array<i32>} : memref<8x16xf32, #tpu.memory_space<vmem>>, vector<8x16xf32>,
    %c0_30 = arith.constant 0 : index
    %c0_31 = arith.constant 0 : index
    %41 = vector.load %arg12[%c0_30, %c0_31] : memref<8x16xf32, #tpu.memory_space<vmem>>, vector<8x16xf32>
    tpu.vector_store %arg12[%c0_30, %c0_31], %37 {strides = array<i32>} : memref<8x16xf32, #tpu.memory_space<vmem>>, vector<8x16xf32>,
    return
  }
  func.func @transform_0(%arg0: i32) -> (i32, i32) {
    %c0_i32 = arith.constant 0 : i32
    %c0_i32_0 = arith.constant 0 : i32
    return %arg0, %c0_i32 : i32, i32
  }
  func.func @transform_1(%arg0: i32) -> (i32, i32) {
    %c0_i32 = arith.constant 0 : i32
    %c0_i32_0 = arith.constant 0 : i32
    %c0_i32_1 = arith.constant 0 : i32
    return %c0_i32, %c0_i32_0 : i32, i32
  }
  func.func @transform_2(%arg0: i32) -> (i32, i32) {
    %c0_i32 = arith.constant 0 : i32
    %c0_i32_0 = arith.constant 0 : i32
    %c0_i32_1 = arith.constant 0 : i32
    return %c0_i32, %c0_i32_0 : i32, i32
  }
  func.func @transform_3(%arg0: i32) -> (i32, i32) {
    %c0_i32 = arith.constant 0 : i32
    %c0_i32_0 = arith.constant 0 : i32
    %c0_i32_1 = arith.constant 0 : i32
    return %c0_i32, %c0_i32_0 : i32, i32
  }
  func.func @transform_4(%arg0: i32) -> (i32, i32) {
    %c0_i32 = arith.constant 0 : i32
    %c0_i32_0 = arith.constant 0 : i32
    %c0_i32_1 = arith.constant 0 : i32
    return %c0_i32, %c0_i32_0 : i32, i32
  }
  func.func @transform_5(%arg0: i32) -> (i32, i32) {
    %c0_i32 = arith.constant 0 : i32
    %c0_i32_0 = arith.constant 0 : i32
    %c0_i32_1 = arith.constant 0 : i32
    return %c0_i32, %c0_i32_0 : i32, i32
  }
  func.func @transform_6(%arg0: i32) -> (i32, i32) {
    %c0_i32 = arith.constant 0 : i32
    %c0_i32_0 = arith.constant 0 : i32
    %c0_i32_1 = arith.constant 0 : i32
    return %c0_i32, %c0_i32_0 : i32, i32
  }
  func.func @transform_7(%arg0: i32) -> (i32, i32) {
    %c0_i32 = arith.constant 0 : i32
    %c0_i32_0 = arith.constant 0 : i32
    %c0_i32_1 = arith.constant 0 : i32
    return %c0_i32, %c0_i32_0 : i32, i32
  }
  func.func @transform_8(%arg0: i32) -> (i32, i32) {
    %c0_i32 = arith.constant 0 : i32
    %c0_i32_0 = arith.constant 0 : i32
    %c0_i32_1 = arith.constant 0 : i32
    return %c0_i32, %c0_i32_0 : i32, i32
  }
  func.func @transform_9(%arg0: i32) -> (i32, i32) {
    %c0_i32 = arith.constant 0 : i32
    %c0_i32_0 = arith.constant 0 : i32
    return %arg0, %c0_i32 : i32, i32
  }
  func.func @transform_10(%arg0: i32) -> (i32, i32) {
    %c0_i32 = arith.constant 0 : i32
    %c0_i32_0 = arith.constant 0 : i32
    return %arg0, %c0_i32 : i32, i32
  }
  func.func @transform_11(%arg0: i32) -> (i32, i32) {
    %c0_i32 = arith.constant 0 : i32
    %c0_i32_0 = arith.constant 0 : i32
    return %arg0, %c0_i32 : i32, i32
  }
}

</mosaic_0001>

<bundles_post_ra>
// kernel: tpu_custom_call.1
= control target key start
LH: loop header
LB: loop body
LE: loop exit
PB: predicated region body
PF: predicated region fallthrough
CT: control target
= control target key end

     0   :  { %17 = vsyncpa [#allocation3], 0  ;;  %s10915_s0 = inlined_call_operand.hbm [shape: f32[8,16], index: 0, kind: input, shape index: {}]   ;;  %s10916_s1 = inlined_call_operand.hbm [shape: bf16[16,512], index: 1, kind: input, shape index: {}]   ;;  %s10917_s2 = inlined_call_operand.hbm [shape: f32[1,512], index: 2, kind: input, shape index: {}]   ;;  %s10918_s3 = inlined_call_operand.hbm [shape: bf16[512,2048], index: 3, kind: input, shape index: {}]   ;;  %s10919_s4 = inlined_call_operand.hbm [shape: f32[1,2048], index: 4, kind: input, shape index: {}]   ;;  %s10920_s5 = inlined_call_operand.hbm [shape: bf16[2048,512], index: 5, kind: input, shape index: {}]   ;;  %s10921_s6 = inlined_call_operand.hbm [shape: f32[1,512], index: 6, kind: input, shape index: {}]   ;;  %s10922_s7 = inlined_call_operand.vmem [shape: bf16[512,16], index: 7, kind: input, shape index: {}]   ;;  %s10923_s8 = inlined_call_operand.hbm [shape: f32[1,16], index: 8, kind: input, shape index: {}]   ;;  %s10924_s9 = inlined_call_operand.hbm [shape: f32[8,16], index: 9, kind: output, shape index: {0}]   ;;  %s10925_s10 = inlined_call_operand.hbm [shape: f32[8,16], index: 10, kind: output, shape index: {1}]   ;;  %s10926_s11 = inlined_call_operand.hbm [shape: f32[8,16], index: 11, kind: output, shape index: {2}]  }
   0x1   :  { %18 = vsyncpa [#allocation6], 0 }
   0x2   :  { %19 = vsyncpa [#allocation9], 0 }
   0x3   :  { %20 = vsyncpa [#allocation12], 0 }
   0x4   :  { %21 = vsyncpa [#allocation15], 0 }
   0x5   :  { %22 = vsyncpa [#allocation4], 0 }
   0x6   :  { %23 = vsyncpa [#allocation18], 0  ;;  %s10447_s17 = smov [#allocation5]  }
   0x7   :  { %s39_s18 = sshll.u32 %s10447_s17, 4  ;;  %s40_s18 = int_to_ptr.vmem [resolvable:$true] %s39_s18 }
   0x8   :  { %s10221_s19 = scalar_lea.vmem %s40_s18, 512  ;;  %p10226_p1 = scmp.lt.s32.totalorder %s40_s18, %s40_s18 }
   0x9   :  { %p10222_p0 = scmp.ne.s32.totalorder %s40_s18, %s10221_s19  ;;  %p10227_p2 = scmp.lt.s32.totalorder %s10221_s19, %s10221_s19 }
   0xb   :  { %p10228_p3 = por %p10227_p2, %p10226_p1 }
   0xd   :  { %p10229_p4 = pnand %p10228_p3, %p10222_p0 }
   0xf   :  { %10232 = shalt.err (!%p10229_p4)
}
  0x10   :  { %s10448_s20 = smov 256   ;;  %s10449_s21 = smov 16  }
  0x11   :  { %45 = dma.hbm_to_vmem [thread:$0]  %s10916_s1, 512, %s40_s18, [#allocation6], %s10448_s20, %s10448_s20, %s10449_s21  }
  0x12   :  { %s10450_s24 = smov [#allocation8]  }
  0x13   :  { %s61_s25 = sshll.u32 %s10450_s24, 4  ;;  %s62_s25 = int_to_ptr.vmem [resolvable:$true] %s61_s25 }
  0x14   :  { %s10241_s26 = scalar_lea.vmem %s62_s25, 65536  ;;  %p10246_p6 = scmp.lt.s32.totalorder %s62_s25, %s62_s25 }
  0x15   :  { %p10242_p5 = scmp.ne.s32.totalorder %s62_s25, %s10241_s26  ;;  %p10247_p7 = scmp.lt.s32.totalorder %s10241_s26, %s10241_s26 }
  0x17   :  { %p10248_p8 = por %p10247_p7, %p10246_p6 }
  0x19   :  { %p10249_p9 = pnand %p10248_p8, %p10242_p5 }
  0x1b   :  { %10252 = shalt.err (!%p10249_p9)
}
  0x1c   :  { %s10451_s27 = smov 1024   ;;  %s10452_s28 = smov 64  }
  0x1d   :  { %67 = dma.hbm_to_vmem [thread:$0]  %s10918_s3, 65536, %s62_s25, [#allocation9], %s10451_s27, %s10451_s27, %s10452_s28  }
  0x1e   :  { %s10453_s12 = smov [#allocation11]   ;;  %s10454_s14 = smov [#allocation2]  }
  0x1f   :  { %s83_s13 = sshll.u32 %s10453_s12, 4  ;;  %s30_s1 = sshll.u32 %s10454_s14, 4  ;;  %s84_s13 = int_to_ptr.vmem [resolvable:$true] %s83_s13  ;;  %s31_s1 = int_to_ptr.vmem [resolvable:$true] %s30_s1 }
  0x20   :  { %s10261_s15 = scalar_lea.vmem %s84_s13, 65536  ;;  %p10266_p11 = scmp.lt.s32.totalorder %s84_s13, %s84_s13 }
  0x21   :  { %p10262_p10 = scmp.ne.s32.totalorder %s84_s13, %s10261_s15  ;;  %p10267_p12 = scmp.lt.s32.totalorder %s10261_s15, %s10261_s15 }
  0x23   :  { %p10268_p13 = por %p10267_p12, %p10266_p11 }
  0x25   :  { %p10269_p0 = pnand %p10268_p13, %p10262_p10 }
  0x27   :  { %10272 = shalt.err (!%p10269_p0)
}
  0x28   :  { %89 = dma.hbm_to_vmem [thread:$0]  %s10920_s5, 65536, %s84_s13, [#allocation12], %s10448_s20, %s10448_s20, %s10449_s21  }
  0x29   :  { %s10281_s3 = scalar_lea.vmem %s31_s1, 128  ;;  %p10286_p2 = scmp.lt.s32.totalorder %s31_s1, %s31_s1 }
  0x2a   :  { %p10282_p1 = scmp.ne.s32.totalorder %s31_s1, %s10281_s3  ;;  %p10287_p3 = scmp.lt.s32.totalorder %s10281_s3, %s10281_s3 }
  0x2c   :  { %p10288_p4 = por %p10287_p3, %p10286_p2 }
  0x2e   :  { %p10289_p5 = pnand %p10288_p4, %p10282_p1 }
  0x30   :  { %10292 = shalt.err (!%p10289_p5)
}
  0x31   :  { %33 = dma.hbm_to_vmem [thread:$0]  %s10915_s0, 128, %s31_s1, [#allocation3]  }
  0x32   :  { %s10455_s22 = smov [#allocation7]   ;;  %s10456_s24 = smov [#allocation10]  }
  0x33   :  { %s52_s23 = sshll.u32 %s10455_s22, 4  ;;  %s74_s25 = sshll.u32 %s10456_s24, 4  ;;  %s53_s23 = int_to_ptr.vmem [resolvable:$true] %s52_s23  ;;  %s75_s25 = int_to_ptr.vmem [resolvable:$true] %s74_s25 }
  0x34   :  { %s10301_s26 = scalar_lea.vmem %s53_s23, 64  ;;  %p10306_p7 = scmp.lt.s32.totalorder %s53_s23, %s53_s23 }
  0x35   :  { %p10302_p6 = scmp.ne.s32.totalorder %s53_s23, %s10301_s26  ;;  %p10307_p8 = scmp.lt.s32.totalorder %s10301_s26, %s10301_s26 }
  0x37   :  { %p10308_p9 = por %p10307_p8, %p10306_p7 }
  0x39   :  { %p10309_p10 = pnand %p10308_p9, %p10302_p6 }
  0x3b   :  { %10312 = shalt.err (!%p10309_p10)
}
  0x3c   :  { %55 = dma.hbm_to_vmem [thread:$0]  %s10917_s2, 64, %s53_s23, [#allocation6]  }
  0x3d   :  { %s10321_s21 = scalar_lea.vmem %s75_s25, 256  ;;  %p10326_p12 = scmp.lt.s32.totalorder %s75_s25, %s75_s25 }
  0x3e   :  { %p10322_p11 = scmp.ne.s32.totalorder %s75_s25, %s10321_s21  ;;  %p10327_p13 = scmp.lt.s32.totalorder %s10321_s21, %s10321_s21 }
  0x40   :  { %p10328_p0 = por %p10327_p13, %p10326_p12 }
  0x42   :  { %p10329_p1 = pnand %p10328_p0, %p10322_p11 }
  0x44   :  { %10332 = shalt.err (!%p10329_p1)
}
  0x45   :  { %77 = dma.hbm_to_vmem [thread:$0]  %s10919_s4, 256, %s75_s25, [#allocation9]  }
  0x46   :  { %s10457_s28 = smov [#allocation13]   ;;  %s10458_s30 = smov [#allocation14]  }
  0x47   :  { %s96_s29 = sshll.u32 %s10457_s28, 4  ;;  %s108_s12 = sshll.u32 %s10458_s30, 4  ;;  %s97_s29 = int_to_ptr.vmem [resolvable:$true] %s96_s29  ;;  %s109_s12 = int_to_ptr.vmem [resolvable:$true] %s108_s12 }
  0x48   :  { %s10341_s13 = scalar_lea.vmem %s97_s29, 64  ;;  %p10346_p3 = scmp.lt.s32.totalorder %s97_s29, %s97_s29 }
  0x49   :  { %p10342_p2 = scmp.ne.s32.totalorder %s97_s29, %s10341_s13  ;;  %p10347_p4 = scmp.lt.s32.totalorder %s10341_s13, %s10341_s13 }
  0x4b   :  { %p10348_p5 = por %p10347_p4, %p10346_p3 }
  0x4d   :  { %p10349_p6 = pnand %p10348_p5, %p10342_p2 }
  0x4f   :  { %10352 = shalt.err (!%p10349_p6)
}
  0x50   :  { %99 = dma.hbm_to_vmem [thread:$0]  %s10921_s6, 64, %s97_s29, [#allocation12]  }
  0x51   :  { %s10361_s1 = scalar_lea.vmem %s109_s12, 16  ;;  %s10365_s4 = scalar_lea.vmem %s109_s12, 32 }
  0x52   :  { %p10362_p7 = scmp.ne.s32.totalorder %s109_s12, %s10361_s1  ;;  %p10366_p8 = scmp.lt.s32.totalorder %s109_s12, %s109_s12 }
  0x53   :  { %p10367_p9 = scmp.lt.s32.totalorder %s10365_s4, %s10361_s1 }
  0x55   :  { %p10368_p10 = por %p10367_p9, %p10366_p8 }
  0x57   :  { %p10369_p11 = pnand %p10368_p10, %p10362_p7 }
  0x59   :  { %10372 = shalt.err (!%p10369_p11)
}
  0x5a   :  { %111 = dma.hbm_to_vmem [thread:$0]  %s10923_s8, 16, %s109_s12, [#allocation15]  }
  0x5b   :  { %10433 = dma.done.wait [#allocation3], 128  }
  0x5c   :  { %10434 = vsyncadd [#allocation3], 4294967168 }
  0x5d   :  { %10435 = dma.done.wait [#allocation6], 576  }
  0x5e   :  { %10436 = vsyncadd [#allocation6], 4294966720 }
  0x5f   :  { %10437 = dma.done.wait [#allocation9], 65792  }
  0x60   :  { %10438 = vsyncadd [#allocation9], 4294901504 }
  0x61   :  { %10439 = dma.done.wait [#allocation12], 65600  }
  0x62   :  { %10440 = vsyncadd [#allocation12], 4294901696 }
  0x63   :  { %10441 = dma.done.wait [#allocation15], 16  }
  0x64   :  { %10442 = vsyncadd [#allocation15], 4294967280  ;;  %v10459_v0 = vmov 0   ;;  %v9401_v1 = vld [vmem:[#allocation5 + $0x4] ss:$16 sps:$4 sm:$0xff]   ;;  %v137_v5 = vld [vmem:[#allocation2] sm:$0xff] }
  0x65   :  { %221 = vmatprep.mubr.bf16.mxu0 %v10459_v0  ;;  %262 = vmatprep.mubr.bf16.mxu1 %v10459_v0  ;;  %v9403_v2 = vld [vmem:[#allocation5 + $0xc] ss:$16 sps:$4 sm:$0xff]   ;;  %v9405_v3 = vld [vmem:[#allocation5] ss:$16 sps:$4 sm:$0xff]   ;;  %v9406_v4 = vld [vmem:[#allocation5 + $0x8] ss:$16 sps:$4 sm:$0xff]   ;;  %v138_v6 = vpack.c.bf16 %v137_v5, %v137_v5 }
  0x66   :  { %203 = vmatprep.subr.bf16.mxu0 %v9401_v1  ;;  %244 = vmatprep.subr.bf16.mxu1 %v9403_v2  ;;  %v391_v7 = vld [vmem:[#allocation8 + $0x380] sm:$0xff]  ;;  %vm185_vm0 = vcmask 130048  }
  0x67   :  { %v399_v8 = vld [vmem:[#allocation8 + $0x3c0] sm:$0xff]  ;;  %204 = vmatpush1.bf16.msra.mxu0 %v9405_v3  ;;  %245 = vmatpush1.bf16.msra.mxu1 %v9406_v4 }
  0x68   :  { %v647_v9 = vld [vmem:[#allocation8 + $0xb80] sm:$0xff]  ;;  %v8396_v10 = vcombine.low %v391_v7, %v399_v8  ;;  %v8397_v11 = vcombine.high %v391_v7, %v399_v8 }
  0x69   :  { %v655_v12 = vld [vmem:[#allocation8 + $0xbc0] sm:$0xff] }
  0x6a   :  { %v375_v13 = vld [vmem:[#allocation8 + $0x300] sm:$0xff]  ;;  %v8652_v15 = vcombine.low %v647_v9, %v655_v12  ;;  %v8653_v16 = vcombine.high %v647_v9, %v655_v12  ;;  %3435 = vmatprep.subr.bf16.mxu0 %v8397_v11  ;;  %8282 = vmatmul.mubr.msk.bf16.vlgmr.msra.gmra.mxu0 %vm185_vm0, %v138_v6 }
  0x6b   :  { %v383_v14 = vld [vmem:[#allocation8 + $0x340] sm:$0xff]  ;;  %8283 = vmatmul.mubr.msk.bf16.vlgmr.msra.gmra.mxu1 %vm185_vm0, %v138_v6  ;;  %3436 = vmatpush1.bf16.msra.mxu0 %v8396_v10 }
  0x6c   :  { %v8381_v17 = vcombine.high %v375_v13, %v383_v14  ;;  %v631_v18 = vld [vmem:[#allocation8 + $0xb00] sm:$0xff]  ;;  %3476 = vmatprep.subr.bf16.mxu1 %v8653_v16  ;;  %v8380_v25 = vcombine.low %v375_v13, %v383_v14 }
  0x6d   :  { %v639_v19 = vld [vmem:[#allocation8 + $0xb40] sm:$0xff]  ;;  %3477 = vmatpush1.bf16.msra.mxu1 %v8652_v15 }
  0x6e   :  { %v8637_v20 = vcombine.high %v631_v18, %v639_v19  ;;  %v359_v21 = vld [vmem:[#allocation8 + $0x280] sm:$0xff]  ;;  %3437 = vmatprep.subr.bf16.mxu0 %v8381_v17  ;;  %v8636_v26 = vcombine.low %v631_v18, %v639_v19 }
  0x6f   :  { %v367_v22 = vld [vmem:[#allocation8 + $0x2c0] sm:$0xff]  ;;  %3438 = vmatpush1.bf16.msra.mxu0 %v8380_v25 }
  0x70   :  { %v615_v23 = vld [vmem:[#allocation8 + $0xa80] sm:$0xff]  ;;  %v8365_v27 = vcombine.high %v359_v21, %v367_v22  ;;  %3478 = vmatprep.subr.bf16.mxu1 %v8637_v20  ;;  %v8364_v33 = vcombine.low %v359_v21, %v367_v22 }
  0x71   :  { %v623_v24 = vld [vmem:[#allocation8 + $0xac0] sm:$0xff]  ;;  %3479 = vmatpush1.bf16.msra.mxu1 %v8636_v26 }
  0x72   :  { %v8621_v28 = vcombine.high %v615_v23, %v623_v24  ;;  %v343_v29 = vld [vmem:[#allocation8 + $0x200] sm:$0xff]  ;;  %3439 = vmatprep.subr.bf16.mxu0 %v8365_v27  ;;  %v8620_v34 = vcombine.low %v615_v23, %v623_v24 }
  0x73   :  { %v351_v30 = vld [vmem:[#allocation8 + $0x240] sm:$0xff]  ;;  %3440 = vmatpush1.bf16.msra.mxu0 %v8364_v33 }
  0x74   :  { %v599_v31 = vld [vmem:[#allocation8 + $0xa00] sm:$0xff]  ;;  %v8349_v35 = vcombine.high %v343_v29, %v351_v30  ;;  %3480 = vmatprep.subr.bf16.mxu1 %v8621_v28  ;;  %v8348_v41 = vcombine.low %v343_v29, %v351_v30 }
  0x75   :  { %v607_v32 = vld [vmem:[#allocation8 + $0xa40] sm:$0xff]  ;;  %3481 = vmatpush1.bf16.msra.mxu1 %v8620_v34 }
  0x76   :  { %v8605_v36 = vcombine.high %v599_v31, %v607_v32  ;;  %v327_v37 = vld [vmem:[#allocation8 + $0x180] sm:$0xff]  ;;  %3441 = vmatprep.subr.bf16.mxu0 %v8349_v35  ;;  %v8604_v42 = vcombine.low %v599_v31, %v607_v32 }
  0x77   :  { %v335_v38 = vld [vmem:[#allocation8 + $0x1c0] sm:$0xff]  ;;  %3442 = vmatpush1.bf16.msra.mxu0 %v8348_v41 }
  0x78   :  { %v583_v39 = vld [vmem:[#allocation8 + $0x980] sm:$0xff]  ;;  %v8333_v43 = vcombine.high %v327_v37, %v335_v38  ;;  %3482 = vmatprep.subr.bf16.mxu1 %v8605_v36  ;;  %v8332_v49 = vcombine.low %v327_v37, %v335_v38 }
  0x79   :  { %v591_v40 = vld [vmem:[#allocation8 + $0x9c0] sm:$0xff]  ;;  %3483 = vmatpush1.bf16.msra.mxu1 %v8604_v42 }
  0x7a   :  { %v8589_v44 = vcombine.high %v583_v39, %v591_v40  ;;  %v311_v45 = vld [vmem:[#allocation8 + $0x100] sm:$0xff]  ;;  %3443 = vmatprep.subr.bf16.mxu0 %v8333_v43  ;;  %v8588_v51 = vcombine.low %v583_v39, %v591_v40 }
  0x7b   :  { %v319_v46 = vld [vmem:[#allocation8 + $0x140] sm:$0xff]  ;;  %3444 = vmatpush1.bf16.msra.mxu0 %v8332_v49 }
  0x7c   :  { %v567_v47 = vld [vmem:[#allocation8 + $0x900] sm:$0xff]  ;;  %v8317_v52 = vcombine.high %v311_v45, %v319_v46  ;;  %3484 = vmatprep.subr.bf16.mxu1 %v8589_v44  ;;  %v8316_v57 = vcombine.low %v311_v45, %v319_v46 }
  0x7d   :  { %v575_v48 = vld [vmem:[#allocation8 + $0x940] sm:$0xff]  ;;  %3485 = vmatpush1.bf16.msra.mxu1 %v8588_v51 }
  0x7e   :  { %v295_v50 = vld [vmem:[#allocation8 + $0x80] sm:$0xff]  ;;  %v8573_v56 = vcombine.high %v567_v47, %v575_v48  ;;  %3445 = vmatprep.subr.bf16.mxu0 %v8317_v52  ;;  %v8572_v60 = vcombine.low %v567_v47, %v575_v48 }
  0x7f   :  { %v303_v53 = vld [vmem:[#allocation8 + $0xc0] sm:$0xff]  ;;  %3446 = vmatpush1.bf16.msra.mxu0 %v8316_v57 }
  0x80   :  { %v551_v54 = vld [vmem:[#allocation8 + $0x880] sm:$0xff]  ;;  %v8301_v61 = vcombine.high %v295_v50, %v303_v53  ;;  %3486 = vmatprep.subr.bf16.mxu1 %v8573_v56  ;;  %v8300_v1 = vcombine.low %v295_v50, %v303_v53 }
  0x81   :  { %v559_v55 = vld [vmem:[#allocation8 + $0x8c0] sm:$0xff]  ;;  %3487 = vmatpush1.bf16.msra.mxu1 %v8572_v60 }
  0x82   :  { %v279_v58 = vld [vmem:[#allocation8] sm:$0xff]  ;;  %v8557_v0 = vcombine.high %v551_v54, %v559_v55  ;;  %3447 = vmatprep.subr.bf16.mxu0 %v8301_v61  ;;  %v8556_v4 = vcombine.low %v551_v54, %v559_v55 }
  0x83   :  { %v287_v59 = vld [vmem:[#allocation8 + $0x40] sm:$0xff]  ;;  %3448 = vmatpush1.bf16.msra.mxu0 %v8300_v1 }
  0x84   :  { %v535_v62 = vld [vmem:[#allocation8 + $0x800] sm:$0xff]  ;;  %v8285_v5 = vcombine.high %v279_v58, %v287_v59  ;;  %3488 = vmatprep.subr.bf16.mxu1 %v8557_v0  ;;  %v8284_v9 = vcombine.low %v279_v58, %v287_v59 }
  0x85   :  { %v543_v63 = vld [vmem:[#allocation8 + $0x840] sm:$0xff]  ;;  %3489 = vmatpush1.bf16.msra.mxu1 %v8556_v4 }
  0x86   :  { %v519_v2 = vld [vmem:[#allocation8 + $0x780] sm:$0xff]  ;;  %v8541_v8 = vcombine.high %v535_v62, %v543_v63  ;;  %3449 = vmatprep.subr.bf16.mxu0 %v8285_v5  ;;  %v8540_v12 = vcombine.low %v535_v62, %v543_v63 }
  0x87   :  { %v527_v3 = vld [vmem:[#allocation8 + $0x7c0] sm:$0xff]  ;;  %3450 = vmatpush1.bf16.msra.mxu0 %v8284_v9  ;;  %v648_v9 = vld [vmem:[#allocation8 + $0xb88] sm:$0xff] }
  0x88   :  { %v775_v6 = vld [vmem:[#allocation8 + $0xf80] sm:$0xff]  ;;  %v8525_v13 = vcombine.high %v519_v2, %v527_v3  ;;  %3490 = vmatprep.subr.bf16.mxu1 %v8541_v8  ;;  %v8524_v17 = vcombine.low %v519_v2, %v527_v3  ;;  %v400_v8 = vld [vmem:[#allocation8 + $0x3c8] sm:$0xff] }
  0x89   :  { %v783_v7 = vld [vmem:[#allocation8 + $0xfc0] sm:$0xff]  ;;  %3491 = vmatpush1.bf16.msra.mxu1 %v8540_v12 }
  0x8a   :  { %v503_v10 = vld [vmem:[#allocation8 + $0x700] sm:$0xff]  ;;  %v8781_v16 = vcombine.high %v775_v6, %v783_v7  ;;  %3451 = vmatprep.subr.bf16.mxu0 %v8525_v13  ;;  %v8780_v20 = vcombine.low %v775_v6, %v783_v7  ;;  %v392_v7 = vld [vmem:[#allocation8 + $0x388] sm:$0xff] }
  0x8b   :  { %v511_v11 = vld [vmem:[#allocation8 + $0x740] sm:$0xff]  ;;  %3452 = vmatpush2.bf16.msra.mxu0 %v8524_v17  ;;  %v8398_v12 = vcombine.low %v392_v7, %v400_v8  ;;  %v143_v17 = vld [vmem:[#allocation7] sm:$0xf] }
  0x8c   :  { %v759_v14 = vld [vmem:[#allocation8 + $0xf00] sm:$0xff]  ;;  %v8509_v21 = vcombine.high %v503_v10, %v511_v11  ;;  %3492 = vmatprep.subr.bf16.mxu1 %v8781_v16  ;;  %v8508_v25 = vcombine.low %v503_v10, %v511_v11  ;;  %v8399_v10 = vcombine.high %v392_v7, %v400_v8  ;;  %v656_v11 = vld [vmem:[#allocation8 + $0xbc8] sm:$0xff] }
  0x8d   :  { %v767_v15 = vld [vmem:[#allocation8 + $0xf40] sm:$0xff]  ;;  %3493 = vmatpush2.bf16.msra.mxu1 %v8780_v20  ;;  %v8654_v13 = vcombine.low %v648_v9, %v656_v11  ;;  %v592_v7 = vld [vmem:[#allocation8 + $0x9c8] sm:$0xff] }
  0x8e   :  { %v487_v18 = vld [vmem:[#allocation8 + $0x680] sm:$0xff]  ;;  %v8765_v24 = vcombine.high %v759_v14, %v767_v15  ;;  %3453 = vmatprep.subr.bf16.mxu0 %v8509_v21  ;;  %v8764_v28 = vcombine.low %v759_v14, %v767_v15  ;;  %v8655_v14 = vcombine.high %v648_v9, %v656_v11  ;;  %v145_v15 = vlaneseq }
  0x8f   :  { %v495_v19 = vld [vmem:[#allocation8 + $0x6c0] sm:$0xff]  ;;  %3454 = vmatpush2.bf16.msra.mxu0 %v8508_v25 }
  0x90   :  { %v743_v22 = vld [vmem:[#allocation8 + $0xe80] sm:$0xff]  ;;  %v8493_v29 = vcombine.high %v487_v18, %v495_v19  ;;  %3494 = vmatprep.subr.bf16.mxu1 %v8765_v24  ;;  %v8492_v33 = vcombine.low %v487_v18, %v495_v19  ;;  %v10555_v16 = vshrl.u32 %v145_v15, 7  ;;  %v576_v15 = vld [vmem:[#allocation8 + $0x948] sm:$0xff] }
  0x91   :  { %v751_v23 = vld [vmem:[#allocation8 + $0xec0] sm:$0xff]  ;;  %3495 = vmatpush2.bf16.msra.mxu1 %v8764_v28 }
  0x92   :  { %v471_v26 = vld [vmem:[#allocation8 + $0x600] sm:$0xff]  ;;  %v8749_v32 = vcombine.high %v743_v22, %v751_v23  ;;  %3455 = vmatprep.subr.bf16.mxu0 %v8493_v29  ;;  %v8748_v36 = vcombine.low %v743_v22, %v751_v23  ;;  %v10558_v18 = vsub.s32 0, %v10555_v16  ;;  %v10561_v19 = vsub.s32 2, %v10555_v16 }
  0x93   :  { %v479_v27 = vld [vmem:[#allocation8 + $0x640] sm:$0xff]  ;;  %3456 = vmatpush2.bf16.msra.mxu0 %v8492_v33  ;;  %v10564_v20 = vsub.s32 1, %v10555_v16  ;;  %v10567_v21 = vsub.s32 3, %v10555_v16 }
  0x94   :  { %v727_v30 = vld [vmem:[#allocation8 + $0xe00] sm:$0xff]  ;;  %v8477_v37 = vcombine.high %v471_v26, %v479_v27  ;;  %3496 = vmatprep.subr.bf16.mxu1 %v8749_v32  ;;  %v8476_v41 = vcombine.low %v471_v26, %v479_v27  ;;  %v148_v22 = vrot.slane %v143_v17, %v10558_v18  ;;  %v156_v23 = vrot.slane %v143_v17, %v10561_v19 }
  0x95   :  { %v735_v31 = vld [vmem:[#allocation8 + $0xe40] sm:$0xff]  ;;  %3497 = vmatpush2.bf16.msra.mxu1 %v8748_v36  ;;  %v152_v24 = vrot.slane %v143_v17, %v10564_v20  ;;  %v160_v25 = vrot.slane %v143_v17, %v10567_v21 }
  0x96   :  { %v455_v34 = vld [vmem:[#allocation8 + $0x580] sm:$0xff]  ;;  %v8733_v40 = vcombine.high %v727_v30, %v735_v31  ;;  %3457 = vmatprep.subr.bf16.mxu0 %v8477_v37  ;;  %v8732_v44 = vcombine.low %v727_v30, %v735_v31 }
  0x97   :  { %v463_v35 = vld [vmem:[#allocation8 + $0x5c0] sm:$0xff]  ;;  %3458 = vmatpush2.bf16.msra.mxu0 %v8476_v41 }
  0x98   :  { %v711_v38 = vld [vmem:[#allocation8 + $0xd80] sm:$0xff]  ;;  %v8461_v45 = vcombine.high %v455_v34, %v463_v35  ;;  %3498 = vmatprep.subr.bf16.mxu1 %v8733_v40  ;;  %v8460_v49 = vcombine.low %v455_v34, %v463_v35  ;;  %v632_v40 = vld [vmem:[#allocation8 + $0xb08] sm:$0xff] }
  0x99   :  { %v719_v39 = vld [vmem:[#allocation8 + $0xdc0] sm:$0xff]  ;;  %3499 = vmatpush2.bf16.msra.mxu1 %v8732_v44 }
  0x9a   :  { %v439_v42 = vld [vmem:[#allocation8 + $0x500] sm:$0xff]  ;;  %v8717_v48 = vcombine.high %v711_v38, %v719_v39  ;;  %3459 = vmatprep.subr.bf16.mxu0 %v8461_v45  ;;  %v8716_v50 = vcombine.low %v711_v38, %v719_v39  ;;  %v376_v38 = vld [vmem:[#allocation8 + $0x308] sm:$0xff] }
  0x9b   :  { %v447_v43 = vld [vmem:[#allocation8 + $0x540] sm:$0xff]  ;;  %3460 = vmatpush2.bf16.msra.mxu0 %v8460_v49  ;;  %v384_v39 = vld [vmem:[#allocation8 + $0x348] sm:$0xff] }
  0x9c   :  { %v695_v46 = vld [vmem:[#allocation8 + $0xd00] sm:$0xff]  ;;  %v8445_v51 = vcombine.high %v439_v42, %v447_v43  ;;  %3500 = vmatprep.subr.bf16.mxu1 %v8717_v48  ;;  %v8444_v53 = vcombine.low %v439_v42, %v447_v43  ;;  %v640_v43 = vld [vmem:[#allocation8 + $0xb48] sm:$0xff] }
  0x9d   :  { %v703_v47 = vld [vmem:[#allocation8 + $0xd40] sm:$0xff]  ;;  %3501 = vmatpush2.bf16.msra.mxu1 %v8716_v50  ;;  %v360_v50 = vld [vmem:[#allocation8 + $0x288] sm:$0xff] }
  0x9e   :  { %v8701_v52 = vcombine.high %v695_v46, %v703_v47  ;;  %3461 = vmatprep.subr.bf16.mxu0 %v8445_v51  ;;  %v8700_v54 = vcombine.low %v695_v46, %v703_v47  ;;  %v423_v55 = vld [vmem:[#allocation8 + $0x480] sm:$0xff]  ;;  %v368_v51 = vld [vmem:[#allocation8 + $0x2c8] sm:$0xff] }
  0x9f   :  { %3462 = vmatpush2.bf16.msra.mxu0 %v8444_v53  ;;  %v431_v56 = vld [vmem:[#allocation8 + $0x4c0] sm:$0xff]  ;;  %v8383_v53 = vcombine.high %v376_v38, %v384_v39 }
  0xa0   :  { %3502 = vmatprep.subr.bf16.mxu1 %v8701_v52  ;;  %v679_v57 = vld [vmem:[#allocation8 + $0xc80] sm:$0xff]  ;;  %v8429_v58 = vcombine.high %v423_v55, %v431_v56  ;;  %v8428_v60 = vcombine.low %v423_v55, %v431_v56  ;;  %v616_v52 = vld [vmem:[#allocation8 + $0xa88] sm:$0xff]  ;;  %v8382_v56 = vcombine.low %v376_v38, %v384_v39 }
  0xa1   :  { %3503 = vmatpush2.bf16.msra.mxu1 %v8700_v54  ;;  %v687_v59 = vld [vmem:[#allocation8 + $0xcc0] sm:$0xff]  ;;  %v8639_v54 = vcombine.high %v632_v40, %v640_v43  ;;  %v624_v55 = vld [vmem:[#allocation8 + $0xac8] sm:$0xff] }
  0xa2   :  { %v8684_v61 = vcombine.low %v679_v57, %v687_v59  ;;  %v8685_v62 = vcombine.high %v679_v57, %v687_v59  ;;  %3463 = vmatprep.subr.bf16.mxu0 %v8429_v58  ;;  %v407_v63 = vld [vmem:[#allocation8 + $0x400] sm:$0xff]  ;;  %v8638_v57 = vcombine.low %v632_v40, %v640_v43  ;;  %v344_v58 = vld [vmem:[#allocation8 + $0x208] sm:$0xff]  ;;  %v8367_v59 = vcombine.high %v360_v50, %v368_v51 }
  0xa3   :  { %3464 = vmatpush2.bf16.msra.mxu0 %v8428_v60  ;;  %v415_v0 = vld [vmem:[#allocation8 + $0x440] sm:$0xff]  ;;  %v8623_v60 = vcombine.high %v616_v52, %v624_v55  ;;  %v776_v43 = vld [vmem:[#allocation8 + $0xf88] sm:$0xff] }
  0xa4   :  { %3504 = vmatprep.subr.bf16.mxu1 %v8685_v62  ;;  %v663_v1 = vld [vmem:[#allocation8 + $0xc00] sm:$0xff]  ;;  %v8413_v2 = vcombine.high %v407_v63, %v415_v0  ;;  %v8412_v4 = vcombine.low %v407_v63, %v415_v0  ;;  %v600_v62 = vld [vmem:[#allocation8 + $0xa08] sm:$0xff]  ;;  %v8366_v0 = vcombine.low %v360_v50, %v368_v51 }
  0xa5   :  { %3505 = vmatpush2.bf16.msra.mxu1 %v8684_v61  ;;  %v671_v3 = vld [vmem:[#allocation8 + $0xc40] sm:$0xff]  ;;  %v352_v61 = vld [vmem:[#allocation8 + $0x248] sm:$0xff] }
  0xa6   :  { %v8668_v5 = vcombine.low %v663_v1, %v671_v3  ;;  %v8669_v6 = vcombine.high %v663_v1, %v671_v3  ;;  %3465 = vmatprep.subr.bf16.mxu0 %v8413_v2  ;;  %v608_v63 = vld [vmem:[#allocation8 + $0xa48] sm:$0xff]  ;;  %v8622_v1 = vcombine.low %v616_v52, %v624_v55  ;;  %v8351_v2 = vcombine.high %v344_v58, %v352_v61 }
  0xa7   :  { %3466 = vmatpush2.bf16.msra.mxu0 %v8412_v4  ;;  %v8607_v3 = vcombine.high %v600_v62, %v608_v63  ;;  %v328_v4 = vld [vmem:[#allocation8 + $0x188] sm:$0xff]  ;;  %v8350_v8 = vcombine.low %v344_v58, %v352_v61  ;;  %v8606_v9 = vcombine.low %v600_v62, %v608_v63 }
  0xa8   :  { %3506 = vmatprep.subr.bf16.mxu1 %v8669_v6  ;;  %3517 = vmatprep.subr.bf16.mxu0 %v8399_v10  ;;  %v584_v6 = vld [vmem:[#allocation8 + $0x988] sm:$0xff] }
  0xa9   :  { %3507 = vmatpush2.bf16.msra.mxu1 %v8668_v5  ;;  %v336_v5 = vld [vmem:[#allocation8 + $0x1c8] sm:$0xff]  ;;  %v8591_v11 = vcombine.high %v584_v6, %v592_v7 }
  0xaa   :  { %3558 = vmatprep.subr.bf16.mxu1 %v8655_v14  ;;  %v8335_v10 = vcombine.high %v328_v4, %v336_v5  ;;  %v568_v14 = vld [vmem:[#allocation8 + $0x908] sm:$0xff]  ;;  %v8334_v17 = vcombine.low %v328_v4, %v336_v5 }
  0xab   :  { %v760_v55 = vld [vmem:[#allocation8 + $0xf08] sm:$0xff] }
  0xac   :  { %v488_v61 = vld [vmem:[#allocation8 + $0x688] sm:$0xff] }
  0xad   :  { %v496_v62 = vld [vmem:[#allocation8 + $0x6c8] sm:$0xff] }
  0xae   :  { %v744_v63 = vld [vmem:[#allocation8 + $0xe88] sm:$0xff] }
  0xaf   :  { %v472_v5 = vld [vmem:[#allocation8 + $0x608] sm:$0xff] }
 0x12a   :  { %v223_v26 = vpop.f32.mrf.mxu0 }
 0x12b   :  { %v264_v27 = vpop.f32.mrf.mxu1  ;;  %v224_v28 = vadd.f32 %v223_v26, %v148_v22  ;;  %v8590_v22 = vcombine.low %v584_v6, %v592_v7  ;;  %v304_v26 = vld [vmem:[#allocation8 + $0xc8] sm:$0xff] }
 0x12c   :  { %v265_v29 = vadd.f32 %v264_v27, %v156_v23  ;;  %v225_v30 = vpop.f32.mrf.mxu0  ;;  %v552_v27 = vld [vmem:[#allocation8 + $0x888] sm:$0xff] }
 0x12d   :  { %v266_v31 = vpop.f32.mrf.mxu1  ;;  %v226_v33 = vadd.f32 %v225_v30, %v152_v24  ;;  %v271_v35 = vmax.f32 %v224_v28, 0.0  ;;  %v8575_v24 = vcombine.high %v568_v14, %v576_v15  ;;  %v560_v28 = vld [vmem:[#allocation8 + $0x8c8] sm:$0xff]  ;;  %v8574_v30 = vcombine.low %v568_v14, %v576_v15 }
 0x12e   :  { %v273_v32 = vmax.f32 %v265_v29, 0.0  ;;  %v267_v34 = vadd.f32 %v266_v31, %v160_v25  ;;  %v227_v36 = vpop.f32.mrf.mxu0  ;;  %v296_v25 = vld [vmem:[#allocation8 + $0x88] sm:$0xff]  ;;  %v8558_v38 = vcombine.low %v552_v27, %v560_v28 }
 0x12f   :  { %v268_v37 = vpop.f32.mrf.mxu1  ;;  %v272_v41 = vmax.f32 %v226_v33, 0.0  ;;  %v10579_v49 = vpack.c.bf16 %v271_v35, %v271_v35  ;;  %v8303_v31 = vcombine.high %v296_v25, %v304_v26  ;;  %v280_v33 = vld [vmem:[#allocation8 + $0x8] sm:$0xff] }
 0x130   :  { %v274_v42 = vmax.f32 %v267_v34, 0.0  ;;  %v10573_v44 = vpack.c.bf16 %v273_v32, %v273_v32  ;;  %v228_v45 = vpop.f32.mrf.mxu0  ;;  %v8559_v32 = vcombine.high %v552_v27, %v560_v28  ;;  %v288_v34 = vld [vmem:[#allocation8 + $0x48] sm:$0xff]  ;;  %v8302_v37 = vcombine.low %v296_v25, %v304_v26 }
 0x131   :  { %v269_v46 = vpop.f32.mrf.mxu1  ;;  %v10575_v47 = vpack.c.bf16 %v272_v41, %v272_v41  ;;  %v536_v35 = vld [vmem:[#allocation8 + $0x808] sm:$0xff]  ;;  %v8287_v39 = vcombine.high %v280_v33, %v288_v34 }
 0x132   :  { %v10577_v48 = vpack.c.bf16 %v274_v42, %v274_v42  ;;  %v544_v36 = vld [vmem:[#allocation8 + $0x848] sm:$0xff]  ;;  %v8286_v46 = vcombine.low %v280_v33, %v288_v34 }
 0x133   :  { %3467 = vmatprep.mubr.bf16.mxu0 %v10575_v47  ;;  %v8543_v40 = vcombine.high %v536_v35, %v544_v36  ;;  %v520_v41 = vld [vmem:[#allocation8 + $0x788] sm:$0xff]  ;;  %v8542_v50 = vcombine.low %v536_v35, %v544_v36 }
 0x134   :  { %3508 = vmatprep.mubr.bf16.mxu1 %v10577_v48  ;;  %3468 = vmatmul.mubr.bf16.vlgmr.msra.gmra.mxu0 %v10579_v49  ;;  %v528_v42 = vld [vmem:[#allocation8 + $0x7c8] sm:$0xff] }
 0x135   :  { %3509 = vmatmul.mubr.bf16.vlgmr.msra.gmra.mxu1 %v10573_v44  ;;  %3518 = vmatpush1.bf16.msra.mxu0 %v8398_v12  ;;  %v312_v12 = vld [vmem:[#allocation8 + $0x108] sm:$0xff]  ;;  %v8527_v51 = vcombine.high %v520_v41, %v528_v42 }
 0x136   :  { %3559 = vmatpush1.bf16.msra.mxu1 %v8654_v13  ;;  %3549 = vmatprep.mubr.bf16.mxu0 %v10575_v47  ;;  %v320_v13 = vld [vmem:[#allocation8 + $0x148] sm:$0xff] }
 0x137   :  { %3590 = vmatprep.mubr.bf16.mxu1 %v10577_v48  ;;  %3519 = vmatprep.subr.bf16.mxu0 %v8383_v53  ;;  %v8319_v23 = vcombine.high %v312_v12, %v320_v13  ;;  %v8318_v29 = vcombine.low %v312_v12, %v320_v13  ;;  %v784_v45 = vld [vmem:[#allocation8 + $0xfc8] sm:$0xff] }
 0x138   :  { %3560 = vmatprep.subr.bf16.mxu1 %v8639_v54  ;;  %v8783_v52 = vcombine.high %v776_v43, %v784_v45  ;;  %v504_v53 = vld [vmem:[#allocation8 + $0x708] sm:$0xff]  ;;  %v8782_v58 = vcombine.low %v776_v43, %v784_v45 }
 0x139   :  { %3520 = vmatpush1.bf16.msra.mxu0 %v8382_v56  ;;  %v512_v54 = vld [vmem:[#allocation8 + $0x748] sm:$0xff] }
 0x13a   :  { %3561 = vmatpush1.bf16.msra.mxu1 %v8638_v57  ;;  %3521 = vmatprep.subr.bf16.mxu0 %v8367_v59  ;;  %v768_v56 = vld [vmem:[#allocation8 + $0xf48] sm:$0xff]  ;;  %v8526_v57 = vcombine.low %v520_v41, %v528_v42  ;;  %v8511_v59 = vcombine.high %v504_v53, %v512_v54 }
 0x13b   :  { %3562 = vmatprep.subr.bf16.mxu1 %v8623_v60  ;;  %v8767_v60 = vcombine.high %v760_v55, %v768_v56  ;;  %v480_v6 = vld [vmem:[#allocation8 + $0x648] sm:$0xff] }
 0x13c   :  { %v728_v7 = vld [vmem:[#allocation8 + $0xe08] sm:$0xff] }
 0x13d   :  { %3522 = vmatpush1.bf16.msra.mxu0 %v8366_v0  ;;  %v752_v0 = vld [vmem:[#allocation8 + $0xec8] sm:$0xff] }
 0x13e   :  { %3563 = vmatpush1.bf16.msra.mxu1 %v8622_v1  ;;  %3523 = vmatprep.subr.bf16.mxu0 %v8351_v2  ;;  %v8510_v1 = vcombine.low %v504_v53, %v512_v54  ;;  %v8766_v2 = vcombine.low %v760_v55, %v768_v56  ;;  %v8751_v4 = vcombine.high %v744_v63, %v752_v0  ;;  %v456_v13 = vld [vmem:[#allocation8 + $0x588] sm:$0xff]  ;;  %v393_v54 = vld [vmem:[#allocation8 + $0x390] sm:$0xff] }
 0x13f   :  { %3564 = vmatprep.subr.bf16.mxu1 %v8607_v3  ;;  %v8495_v3 = vcombine.high %v488_v61, %v496_v62  ;;  %v464_v14 = vld [vmem:[#allocation8 + $0x5c8] sm:$0xff]  ;;  %v401_v55 = vld [vmem:[#allocation8 + $0x3d0] sm:$0xff] }
 0x140   :  { %v712_v15 = vld [vmem:[#allocation8 + $0xd88] sm:$0xff]  ;;  %v649_v56 = vld [vmem:[#allocation8 + $0xb90] sm:$0xff] }
 0x141   :  { %3524 = vmatpush1.bf16.msra.mxu0 %v8350_v8  ;;  %v736_v8 = vld [vmem:[#allocation8 + $0xe48] sm:$0xff] }
 0x142   :  { %3565 = vmatpush1.bf16.msra.mxu1 %v8606_v9  ;;  %3525 = vmatprep.subr.bf16.mxu0 %v8335_v10  ;;  %v8494_v9 = vcombine.low %v488_v61, %v496_v62  ;;  %v8750_v10 = vcombine.low %v744_v63, %v752_v0  ;;  %v8735_v12 = vcombine.high %v728_v7, %v736_v8  ;;  %v440_v26 = vld [vmem:[#allocation8 + $0x508] sm:$0xff]  ;;  %v377_v62 = vld [vmem:[#allocation8 + $0x310] sm:$0xff] }
 0x143   :  { %3566 = vmatprep.subr.bf16.mxu1 %v8591_v11  ;;  %v8479_v11 = vcombine.high %v472_v5, %v480_v6  ;;  %v448_v27 = vld [vmem:[#allocation8 + $0x548] sm:$0xff]  ;;  %v385_v63 = vld [vmem:[#allocation8 + $0x350] sm:$0xff] }
 0x144   :  { %v696_v28 = vld [vmem:[#allocation8 + $0xd08] sm:$0xff]  ;;  %v633_v0 = vld [vmem:[#allocation8 + $0xb10] sm:$0xff] }
 0x145   :  { %3526 = vmatpush1.bf16.msra.mxu0 %v8334_v17  ;;  %v720_v17 = vld [vmem:[#allocation8 + $0xdc8] sm:$0xff] }
 0x146   :  { %3567 = vmatpush1.bf16.msra.mxu1 %v8590_v22  ;;  %3527 = vmatprep.subr.bf16.mxu0 %v8319_v23  ;;  %v8478_v22 = vcombine.low %v472_v5, %v480_v6  ;;  %v8734_v23 = vcombine.low %v728_v7, %v736_v8  ;;  %v8719_v25 = vcombine.high %v712_v15, %v720_v17  ;;  %v424_v34 = vld [vmem:[#allocation8 + $0x488] sm:$0xff]  ;;  %v361_v6 = vld [vmem:[#allocation8 + $0x290] sm:$0xff] }
 0x147   :  { %3568 = vmatprep.subr.bf16.mxu1 %v8575_v24  ;;  %v8463_v24 = vcombine.high %v456_v13, %v464_v14  ;;  %v432_v35 = vld [vmem:[#allocation8 + $0x4c8] sm:$0xff]  ;;  %v369_v7 = vld [vmem:[#allocation8 + $0x2d0] sm:$0xff] }
 0x148   :  { %v680_v36 = vld [vmem:[#allocation8 + $0xc88] sm:$0xff]  ;;  %v617_v8 = vld [vmem:[#allocation8 + $0xa90] sm:$0xff] }
 0x149   :  { %3528 = vmatpush1.bf16.msra.mxu0 %v8318_v29  ;;  %v704_v29 = vld [vmem:[#allocation8 + $0xd48] sm:$0xff] }
 0x14a   :  { %3569 = vmatpush1.bf16.msra.mxu1 %v8574_v30  ;;  %3529 = vmatprep.subr.bf16.mxu0 %v8303_v31  ;;  %v8462_v30 = vcombine.low %v456_v13, %v464_v14  ;;  %v8718_v31 = vcombine.low %v712_v15, %v720_v17  ;;  %v8703_v33 = vcombine.high %v696_v28, %v704_v29  ;;  %v408_v42 = vld [vmem:[#allocation8 + $0x408] sm:$0xff]  ;;  %v345_v14 = vld [vmem:[#allocation8 + $0x210] sm:$0xff] }
 0x14b   :  { %3570 = vmatprep.subr.bf16.mxu1 %v8559_v32  ;;  %v8447_v32 = vcombine.high %v440_v26, %v448_v27  ;;  %v416_v43 = vld [vmem:[#allocation8 + $0x448] sm:$0xff]  ;;  %v353_v15 = vld [vmem:[#allocation8 + $0x250] sm:$0xff] }
 0x14c   :  { %v664_v45 = vld [vmem:[#allocation8 + $0xc08] sm:$0xff]  ;;  %v601_v17 = vld [vmem:[#allocation8 + $0xa10] sm:$0xff] }
 0x14d   :  { %3530 = vmatpush1.bf16.msra.mxu0 %v8302_v37  ;;  %v688_v37 = vld [vmem:[#allocation8 + $0xcc8] sm:$0xff] }
 0x14e   :  { %3571 = vmatpush1.bf16.msra.mxu1 %v8558_v38  ;;  %3531 = vmatprep.subr.bf16.mxu0 %v8287_v39  ;;  %v8446_v38 = vcombine.low %v440_v26, %v448_v27  ;;  %v8702_v39 = vcombine.low %v696_v28, %v704_v29  ;;  %v8687_v41 = vcombine.high %v680_v36, %v688_v37  ;;  %v329_v27 = vld [vmem:[#allocation8 + $0x190] sm:$0xff] }
 0x14f   :  { %3572 = vmatprep.subr.bf16.mxu1 %v8543_v40  ;;  %v8431_v40 = vcombine.high %v424_v34, %v432_v35  ;;  %v337_v28 = vld [vmem:[#allocation8 + $0x1d0] sm:$0xff] }
 0x150   :  { %v585_v29 = vld [vmem:[#allocation8 + $0x990] sm:$0xff] }
 0x151   :  { %3532 = vmatpush1.bf16.msra.mxu0 %v8286_v46  ;;  %v672_v46 = vld [vmem:[#allocation8 + $0xc48] sm:$0xff] }
 0x152   :  { %3573 = vmatpush1.bf16.msra.mxu1 %v8542_v50  ;;  %3533 = vmatprep.subr.bf16.mxu0 %v8527_v51  ;;  %v8430_v50 = vcombine.low %v424_v34, %v432_v35  ;;  %v8686_v51 = vcombine.low %v680_v36, %v688_v37  ;;  %v8671_v53 = vcombine.high %v664_v45, %v672_v46  ;;  %v313_v34 = vld [vmem:[#allocation8 + $0x110] sm:$0xff] }
 0x153   :  { %3574 = vmatprep.subr.bf16.mxu1 %v8783_v52  ;;  %v8415_v52 = vcombine.high %v408_v42, %v416_v43  ;;  %v321_v35 = vld [vmem:[#allocation8 + $0x150] sm:$0xff] }
 0x154   :  { %v569_v36 = vld [vmem:[#allocation8 + $0x910] sm:$0xff] }
 0x155   :  { %3534 = vmatpush2.bf16.msra.mxu0 %v8526_v57  ;;  %v657_v57 = vld [vmem:[#allocation8 + $0xbd0] sm:$0xff] }
 0x156   :  { %3575 = vmatpush2.bf16.msra.mxu1 %v8782_v58  ;;  %3535 = vmatprep.subr.bf16.mxu0 %v8511_v59  ;;  %v8414_v58 = vcombine.low %v408_v42, %v416_v43  ;;  %v8670_v59 = vcombine.low %v664_v45, %v672_v46  ;;  %v8657_v61 = vcombine.high %v649_v56, %v657_v57  ;;  %v297_v43 = vld [vmem:[#allocation8 + $0x90] sm:$0xff] }
 0x157   :  { %3576 = vmatprep.subr.bf16.mxu1 %v8767_v60  ;;  %v8401_v60 = vcombine.high %v393_v54, %v401_v55  ;;  %v305_v45 = vld [vmem:[#allocation8 + $0xd0] sm:$0xff] }
 0x158   :  { %v553_v46 = vld [vmem:[#allocation8 + $0x890] sm:$0xff] }
 0x159   :  { %3536 = vmatpush2.bf16.msra.mxu0 %v8510_v1  ;;  %v641_v1 = vld [vmem:[#allocation8 + $0xb50] sm:$0xff] }
 0x15a   :  { %3577 = vmatpush2.bf16.msra.mxu1 %v8766_v2  ;;  %3537 = vmatprep.subr.bf16.mxu0 %v8495_v3  ;;  %v8400_v2 = vcombine.low %v393_v54, %v401_v55  ;;  %v8656_v3 = vcombine.low %v649_v56, %v657_v57  ;;  %v8641_v5 = vcombine.high %v633_v0, %v641_v1  ;;  %v281_v55 = vld [vmem:[#allocation8 + $0x10] sm:$0xff] }
 0x15b   :  { %3578 = vmatprep.subr.bf16.mxu1 %v8751_v4  ;;  %v8385_v4 = vcombine.high %v377_v62, %v385_v63  ;;  %v289_v56 = vld [vmem:[#allocation8 + $0x50] sm:$0xff] }
 0x15c   :  { %v537_v57 = vld [vmem:[#allocation8 + $0x810] sm:$0xff] }
 0x15d   :  { %3538 = vmatpush2.bf16.msra.mxu0 %v8494_v9  ;;  %v625_v9 = vld [vmem:[#allocation8 + $0xad0] sm:$0xff] }
 0x15e   :  { %3579 = vmatpush2.bf16.msra.mxu1 %v8750_v10  ;;  %3539 = vmatprep.subr.bf16.mxu0 %v8479_v11  ;;  %v8384_v10 = vcombine.low %v377_v62, %v385_v63  ;;  %v8640_v11 = vcombine.low %v633_v0, %v641_v1  ;;  %v8625_v13 = vcombine.high %v617_v8, %v625_v9  ;;  %v521_v63 = vld [vmem:[#allocation8 + $0x790] sm:$0xff] }
 0x15f   :  { %3580 = vmatprep.subr.bf16.mxu1 %v8735_v12  ;;  %v8369_v12 = vcombine.high %v361_v6, %v369_v7  ;;  %v529_v0 = vld [vmem:[#allocation8 + $0x7d0] sm:$0xff] }
 0x160   :  { %v777_v1 = vld [vmem:[#allocation8 + $0xf90] sm:$0xff] }
 0x161   :  { %3540 = vmatpush2.bf16.msra.mxu0 %v8478_v22  ;;  %v609_v22 = vld [vmem:[#allocation8 + $0xa50] sm:$0xff] }
 0x162   :  { %3581 = vmatpush2.bf16.msra.mxu1 %v8734_v23  ;;  %3541 = vmatprep.subr.bf16.mxu0 %v8463_v24  ;;  %v8368_v23 = vcombine.low %v361_v6, %v369_v7  ;;  %v8624_v24 = vcombine.low %v617_v8, %v625_v9  ;;  %v8609_v26 = vcombine.high %v601_v17, %v609_v22  ;;  %v505_v7 = vld [vmem:[#allocation8 + $0x710] sm:$0xff] }
 0x163   :  { %3582 = vmatprep.subr.bf16.mxu1 %v8719_v25  ;;  %v8353_v25 = vcombine.high %v345_v14, %v353_v15  ;;  %v513_v8 = vld [vmem:[#allocation8 + $0x750] sm:$0xff] }
 0x164   :  { %v761_v9 = vld [vmem:[#allocation8 + $0xf10] sm:$0xff] }
 0x165   :  { %3542 = vmatpush2.bf16.msra.mxu0 %v8462_v30  ;;  %v593_v30 = vld [vmem:[#allocation8 + $0x9d0] sm:$0xff] }
 0x166   :  { %3583 = vmatpush2.bf16.msra.mxu1 %v8718_v31  ;;  %3543 = vmatprep.subr.bf16.mxu0 %v8447_v32  ;;  %v8352_v31 = vcombine.low %v345_v14, %v353_v15  ;;  %v8608_v32 = vcombine.low %v601_v17, %v609_v22  ;;  %v8593_v37 = vcombine.high %v585_v29, %v593_v30  ;;  %v489_v15 = vld [vmem:[#allocation8 + $0x690] sm:$0xff] }
 0x167   :  { %3584 = vmatprep.subr.bf16.mxu1 %v8703_v33  ;;  %v8337_v33 = vcombine.high %v329_v27, %v337_v28  ;;  %v497_v17 = vld [vmem:[#allocation8 + $0x6d0] sm:$0xff] }
 0x168   :  { %v745_v22 = vld [vmem:[#allocation8 + $0xe90] sm:$0xff] }
 0x169   :  { %3544 = vmatpush2.bf16.msra.mxu0 %v8446_v38  ;;  %v577_v38 = vld [vmem:[#allocation8 + $0x950] sm:$0xff] }
 0x16a   :  { %3585 = vmatpush2.bf16.msra.mxu1 %v8702_v39  ;;  %3545 = vmatprep.subr.bf16.mxu0 %v8431_v40  ;;  %v8336_v39 = vcombine.low %v329_v27, %v337_v28  ;;  %v8592_v40 = vcombine.low %v585_v29, %v593_v30  ;;  %v8577_v42 = vcombine.high %v569_v36, %v577_v38  ;;  %v473_v28 = vld [vmem:[#allocation8 + $0x610] sm:$0xff] }
 0x16b   :  { %3586 = vmatprep.subr.bf16.mxu1 %v8687_v41  ;;  %v8321_v41 = vcombine.high %v313_v34, %v321_v35  ;;  %v481_v29 = vld [vmem:[#allocation8 + $0x650] sm:$0xff] }
 0x16c   :  { %v729_v30 = vld [vmem:[#allocation8 + $0xe10] sm:$0xff] }
 0x16d   :  { %3546 = vmatpush2.bf16.msra.mxu0 %v8430_v50  ;;  %v561_v50 = vld [vmem:[#allocation8 + $0x8d0] sm:$0xff] }
 0x16e   :  { %3587 = vmatpush2.bf16.msra.mxu1 %v8686_v51  ;;  %3547 = vmatprep.subr.bf16.mxu0 %v8415_v52  ;;  %v8320_v51 = vcombine.low %v313_v34, %v321_v35  ;;  %v8576_v52 = vcombine.low %v569_v36, %v577_v38  ;;  %v8561_v54 = vcombine.high %v553_v46, %v561_v50  ;;  %v457_v36 = vld [vmem:[#allocation8 + $0x590] sm:$0xff] }
 0x16f   :  { %3588 = vmatprep.subr.bf16.mxu1 %v8671_v53  ;;  %v8305_v53 = vcombine.high %v297_v43, %v305_v45  ;;  %v8481_v34 = vcombine.high %v473_v28, %v481_v29  ;;  %v713_v38 = vld [vmem:[#allocation8 + $0xd90] sm:$0xff] }
 0x171   :  { %3548 = vmatpush2.bf16.msra.mxu0 %v8414_v58  ;;  %v545_v58 = vld [vmem:[#allocation8 + $0x850] sm:$0xff] }
 0x172   :  { %3589 = vmatpush2.bf16.msra.mxu1 %v8670_v59  ;;  %3599 = vmatprep.subr.bf16.mxu0 %v8401_v60  ;;  %v8304_v59 = vcombine.low %v297_v43, %v305_v45  ;;  %v8560_v60 = vcombine.low %v553_v46, %v561_v50  ;;  %v8545_v62 = vcombine.high %v537_v57, %v545_v58  ;;  %v441_v45 = vld [vmem:[#allocation8 + $0x510] sm:$0xff] }
 0x173   :  { %3640 = vmatprep.subr.bf16.mxu1 %v8657_v61  ;;  %v8289_v61 = vcombine.high %v281_v55, %v289_v56  ;;  %v449_v46 = vld [vmem:[#allocation8 + $0x550] sm:$0xff] }
 0x174   :  { %3550 = vmatmul.mubr.bf16.vlgmr.msra.gmra.mxu0 %v10579_v49  ;;  %v697_v50 = vld [vmem:[#allocation8 + $0xd10] sm:$0xff] }
 0x175   :  { %3591 = vmatmul.mubr.bf16.vlgmr.msra.gmra.mxu1 %v10573_v44  ;;  %3600 = vmatpush1.bf16.msra.mxu0 %v8400_v2  ;;  %v785_v2 = vld [vmem:[#allocation8 + $0xfd0] sm:$0xff] }
 0x176   :  { %3631 = vmatprep.mubr.bf16.mxu0 %v10575_v47  ;;  %3641 = vmatpush1.bf16.msra.mxu1 %v8656_v3  ;;  %v8288_v3 = vcombine.low %v281_v55, %v289_v56  ;;  %v8785_v6 = vcombine.high %v777_v1, %v785_v2  ;;  %v425_v56 = vld [vmem:[#allocation8 + $0x490] sm:$0xff] }
 0x177   :  { %3672 = vmatprep.mubr.bf16.mxu1 %v10577_v48  ;;  %3601 = vmatprep.subr.bf16.mxu0 %v8385_v4  ;;  %v8544_v4 = vcombine.low %v537_v57, %v545_v58  ;;  %v433_v57 = vld [vmem:[#allocation8 + $0x4d0] sm:$0xff] }
 0x178   :  { %3642 = vmatprep.subr.bf16.mxu1 %v8641_v5  ;;  %v8529_v5 = vcombine.high %v521_v63, %v529_v0  ;;  %v681_v58 = vld [vmem:[#allocation8 + $0xc90] sm:$0xff] }
 0x179   :  { %3602 = vmatpush1.bf16.msra.mxu0 %v8384_v10  ;;  %v769_v10 = vld [vmem:[#allocation8 + $0xf50] sm:$0xff] }
 0x17a   :  { %3643 = vmatpush1.bf16.msra.mxu1 %v8640_v11  ;;  %3603 = vmatprep.subr.bf16.mxu0 %v8369_v12  ;;  %v8528_v11 = vcombine.low %v521_v63, %v529_v0  ;;  %v8784_v12 = vcombine.low %v777_v1, %v785_v2  ;;  %v8769_v14 = vcombine.high %v761_v9, %v769_v10  ;;  %v409_v0 = vld [vmem:[#allocation8 + $0x410] sm:$0xff] }
 0x17b   :  { %3644 = vmatprep.subr.bf16.mxu1 %v8625_v13  ;;  %v8513_v13 = vcombine.high %v505_v7, %v513_v8  ;;  %v417_v1 = vld [vmem:[#allocation8 + $0x450] sm:$0xff] }
 0x17c   :  { %v665_v2 = vld [vmem:[#allocation8 + $0xc10] sm:$0xff] }
 0x17d   :  { %3604 = vmatpush1.bf16.msra.mxu0 %v8368_v23  ;;  %v753_v23 = vld [vmem:[#allocation8 + $0xed0] sm:$0xff] }
 0x17e   :  { %3645 = vmatpush1.bf16.msra.mxu1 %v8624_v24  ;;  %3605 = vmatprep.subr.bf16.mxu0 %v8353_v25  ;;  %v8512_v24 = vcombine.low %v505_v7, %v513_v8  ;;  %v8768_v25 = vcombine.low %v761_v9, %v769_v10  ;;  %v8753_v27 = vcombine.high %v745_v22, %v753_v23  ;;  %v394_v8 = vld [vmem:[#allocation8 + $0x398] sm:$0xff] }
 0x17f   :  { %3646 = vmatprep.subr.bf16.mxu1 %v8609_v26  ;;  %v8497_v26 = vcombine.high %v489_v15, %v497_v17  ;;  %v402_v9 = vld [vmem:[#allocation8 + $0x3d8] sm:$0xff] }
 0x180   :  { %v650_v10 = vld [vmem:[#allocation8 + $0xb98] sm:$0xff] }
 0x181   :  { %3606 = vmatpush1.bf16.msra.mxu0 %v8352_v31  ;;  %v737_v31 = vld [vmem:[#allocation8 + $0xe50] sm:$0xff] }
 0x182   :  { %3647 = vmatpush1.bf16.msra.mxu1 %v8608_v32  ;;  %3607 = vmatprep.subr.bf16.mxu0 %v8337_v33  ;;  %v8496_v32 = vcombine.low %v489_v15, %v497_v17  ;;  %v8752_v33 = vcombine.low %v745_v22, %v753_v23  ;;  %v8737_v35 = vcombine.high %v729_v30, %v737_v31  ;;  %v378_v17 = vld [vmem:[#allocation8 + $0x318] sm:$0xff] }
 0x183   :  { %3648 = vmatprep.subr.bf16.mxu1 %v8593_v37  ;;  %v465_v37 = vld [vmem:[#allocation8 + $0x5d0] sm:$0xff]  ;;  %v386_v22 = vld [vmem:[#allocation8 + $0x358] sm:$0xff]  ;;  %v8402_v23 = vcombine.low %v394_v8, %v402_v9 }
 0x185   :  { %3608 = vmatpush1.bf16.msra.mxu0 %v8336_v39  ;;  %v721_v39 = vld [vmem:[#allocation8 + $0xdd0] sm:$0xff] }
 0x186   :  { %3649 = vmatpush1.bf16.msra.mxu1 %v8592_v40  ;;  %3609 = vmatprep.subr.bf16.mxu0 %v8321_v41  ;;  %v8480_v40 = vcombine.low %v473_v28, %v481_v29  ;;  %v8736_v41 = vcombine.low %v729_v30, %v737_v31  ;;  %v8721_v43 = vcombine.high %v713_v38, %v721_v39  ;;  %v362_v28 = vld [vmem:[#allocation8 + $0x298] sm:$0xff] }
 0x187   :  { %3650 = vmatprep.subr.bf16.mxu1 %v8577_v42  ;;  %v8465_v42 = vcombine.high %v457_v36, %v465_v37  ;;  %v370_v29 = vld [vmem:[#allocation8 + $0x2d8] sm:$0xff] }
 0x188   :  { %v618_v31 = vld [vmem:[#allocation8 + $0xa98] sm:$0xff] }
 0x189   :  { %3610 = vmatpush1.bf16.msra.mxu0 %v8320_v51  ;;  %v705_v51 = vld [vmem:[#allocation8 + $0xd50] sm:$0xff] }
 0x18a   :  { %3651 = vmatpush1.bf16.msra.mxu1 %v8576_v52  ;;  %3611 = vmatprep.subr.bf16.mxu0 %v8305_v53  ;;  %v8464_v52 = vcombine.low %v457_v36, %v465_v37  ;;  %v8720_v53 = vcombine.low %v713_v38, %v721_v39  ;;  %v8705_v55 = vcombine.high %v697_v50, %v705_v51  ;;  %v346_v37 = vld [vmem:[#allocation8 + $0x218] sm:$0xff] }
 0x18b   :  { %3652 = vmatprep.subr.bf16.mxu1 %v8561_v54  ;;  %v8449_v54 = vcombine.high %v441_v45, %v449_v46  ;;  %v354_v38 = vld [vmem:[#allocation8 + $0x258] sm:$0xff] }
 0x18c   :  { %v602_v39 = vld [vmem:[#allocation8 + $0xa18] sm:$0xff] }
 0x18d   :  { %3612 = vmatpush1.bf16.msra.mxu0 %v8304_v59  ;;  %v689_v59 = vld [vmem:[#allocation8 + $0xcd0] sm:$0xff] }
 0x18e   :  { %3653 = vmatpush1.bf16.msra.mxu1 %v8560_v60  ;;  %3613 = vmatprep.subr.bf16.mxu0 %v8289_v61  ;;  %v8448_v60 = vcombine.low %v441_v45, %v449_v46  ;;  %v8704_v61 = vcombine.low %v697_v50, %v705_v51  ;;  %v8689_v63 = vcombine.high %v681_v58, %v689_v59  ;;  %v330_v46 = vld [vmem:[#allocation8 + $0x198] sm:$0xff] }
 0x18f   :  { %3654 = vmatprep.subr.bf16.mxu1 %v8545_v62  ;;  %v8433_v62 = vcombine.high %v425_v56, %v433_v57  ;;  %v338_v50 = vld [vmem:[#allocation8 + $0x1d8] sm:$0xff] }
 0x190   :  { %v586_v51 = vld [vmem:[#allocation8 + $0x998] sm:$0xff] }
 0x191   :  { %3614 = vmatpush1.bf16.msra.mxu0 %v8288_v3  ;;  %v673_v3 = vld [vmem:[#allocation8 + $0xc50] sm:$0xff] }
 0x192   :  { %3655 = vmatpush1.bf16.msra.mxu1 %v8544_v4  ;;  %3615 = vmatprep.subr.bf16.mxu0 %v8529_v5  ;;  %v8432_v4 = vcombine.low %v425_v56, %v433_v57  ;;  %v8688_v5 = vcombine.low %v681_v58, %v689_v59  ;;  %v8673_v7 = vcombine.high %v665_v2, %v673_v3  ;;  %v314_v57 = vld [vmem:[#allocation8 + $0x118] sm:$0xff] }
 0x193   :  { %3656 = vmatprep.subr.bf16.mxu1 %v8785_v6  ;;  %v8417_v6 = vcombine.high %v409_v0, %v417_v1  ;;  %v322_v58 = vld [vmem:[#allocation8 + $0x158] sm:$0xff] }
 0x194   :  { %v570_v59 = vld [vmem:[#allocation8 + $0x918] sm:$0xff] }
 0x195   :  { %3616 = vmatpush2.bf16.msra.mxu0 %v8528_v11  ;;  %v658_v11 = vld [vmem:[#allocation8 + $0xbd8] sm:$0xff] }
 0x196   :  { %3657 = vmatpush2.bf16.msra.mxu1 %v8784_v12  ;;  %3617 = vmatprep.subr.bf16.mxu0 %v8513_v13  ;;  %v8416_v12 = vcombine.low %v409_v0, %v417_v1  ;;  %v8672_v13 = vcombine.low %v665_v2, %v673_v3  ;;  %v8659_v15 = vcombine.high %v650_v10, %v658_v11  ;;  %v298_v1 = vld [vmem:[#allocation8 + $0x98] sm:$0xff] }
 0x197   :  { %3658 = vmatprep.subr.bf16.mxu1 %v8769_v14  ;;  %v8403_v14 = vcombine.high %v394_v8, %v402_v9  ;;  %v306_v2 = vld [vmem:[#allocation8 + $0xd8] sm:$0xff] }
 0x198   :  { %v554_v3 = vld [vmem:[#allocation8 + $0x898] sm:$0xff] }
 0x199   :  { %3618 = vmatpush2.bf16.msra.mxu0 %v8512_v24  ;;  %v634_v24 = vld [vmem:[#allocation8 + $0xb18] sm:$0xff] }
 0x19a   :  { %3659 = vmatpush2.bf16.msra.mxu1 %v8768_v25  ;;  %3619 = vmatprep.subr.bf16.mxu0 %v8497_v26  ;;  %v642_v25 = vld [vmem:[#allocation8 + $0xb58] sm:$0xff]  ;;  %v8658_v26 = vcombine.low %v650_v10, %v658_v11 }
 0x19b   :  { %3660 = vmatprep.subr.bf16.mxu1 %v8753_v27  ;;  %v8387_v27 = vcombine.high %v378_v17, %v386_v22  ;;  %v8643_v30 = vcombine.high %v634_v24, %v642_v25  ;;  %v282_v9 = vld [vmem:[#allocation8 + $0x18] sm:$0xff] }
 0x19c   :  { %v290_v10 = vld [vmem:[#allocation8 + $0x58] sm:$0xff] }
 0x19d   :  { %3620 = vmatpush2.bf16.msra.mxu0 %v8496_v32  ;;  %v626_v32 = vld [vmem:[#allocation8 + $0xad8] sm:$0xff] }
 0x19e   :  { %3661 = vmatpush2.bf16.msra.mxu1 %v8752_v33  ;;  %3621 = vmatprep.subr.bf16.mxu0 %v8481_v34  ;;  %v8386_v33 = vcombine.low %v378_v17, %v386_v22  ;;  %v8642_v34 = vcombine.low %v634_v24, %v642_v25  ;;  %v8627_v36 = vcombine.high %v618_v31, %v626_v32  ;;  %v538_v11 = vld [vmem:[#allocation8 + $0x818] sm:$0xff] }
 0x19f   :  { %3662 = vmatprep.subr.bf16.mxu1 %v8737_v35  ;;  %v8371_v35 = vcombine.high %v362_v28, %v370_v29  ;;  %v522_v22 = vld [vmem:[#allocation8 + $0x798] sm:$0xff] }
 0x1a0   :  { %v778_v24 = vld [vmem:[#allocation8 + $0xf98] sm:$0xff] }
 0x1a1   :  { %3622 = vmatpush2.bf16.msra.mxu0 %v8480_v40  ;;  %v610_v40 = vld [vmem:[#allocation8 + $0xa58] sm:$0xff] }
 0x1a2   :  { %3663 = vmatpush2.bf16.msra.mxu1 %v8736_v41  ;;  %3623 = vmatprep.subr.bf16.mxu0 %v8465_v42  ;;  %v8370_v41 = vcombine.low %v362_v28, %v370_v29  ;;  %v8626_v42 = vcombine.low %v618_v31, %v626_v32  ;;  %v8611_v45 = vcombine.high %v602_v39, %v610_v40  ;;  %v786_v25 = vld [vmem:[#allocation8 + $0xfd8] sm:$0xff] }
 0x1a3   :  { %3664 = vmatprep.subr.bf16.mxu1 %v8721_v43  ;;  %v8355_v43 = vcombine.high %v346_v37, %v354_v38  ;;  %v8787_v29 = vcombine.high %v778_v24, %v786_v25  ;;  %v514_v31 = vld [vmem:[#allocation8 + $0x758] sm:$0xff] }
 0x1a4   :  { %v762_v32 = vld [vmem:[#allocation8 + $0xf18] sm:$0xff] }
 0x1a5   :  { %3624 = vmatpush2.bf16.msra.mxu0 %v8464_v52  ;;  %v594_v52 = vld [vmem:[#allocation8 + $0x9d8] sm:$0xff] }
 0x1a6   :  { %3665 = vmatpush2.bf16.msra.mxu1 %v8720_v53  ;;  %3625 = vmatprep.subr.bf16.mxu0 %v8449_v54  ;;  %v8354_v53 = vcombine.low %v346_v37, %v354_v38  ;;  %v8610_v54 = vcombine.low %v602_v39, %v610_v40  ;;  %v8595_v56 = vcombine.high %v586_v51, %v594_v52  ;;  %v490_v38 = vld [vmem:[#allocation8 + $0x698] sm:$0xff] }
 0x1a7   :  { %3666 = vmatprep.subr.bf16.mxu1 %v8705_v55  ;;  %v8339_v55 = vcombine.high %v330_v46, %v338_v50  ;;  %v498_v39 = vld [vmem:[#allocation8 + $0x6d8] sm:$0xff] }
 0x1a8   :  { %v746_v40 = vld [vmem:[#allocation8 + $0xe98] sm:$0xff] }
 0x1a9   :  { %3626 = vmatpush2.bf16.msra.mxu0 %v8448_v60  ;;  %v578_v60 = vld [vmem:[#allocation8 + $0x958] sm:$0xff] }
 0x1aa   :  { %3667 = vmatpush2.bf16.msra.mxu1 %v8704_v61  ;;  %3627 = vmatprep.subr.bf16.mxu0 %v8433_v62  ;;  %v8338_v61 = vcombine.low %v330_v46, %v338_v50  ;;  %v8594_v62 = vcombine.low %v586_v51, %v594_v52  ;;  %v8579_v0 = vcombine.high %v570_v59, %v578_v60  ;;  %v474_v50 = vld [vmem:[#allocation8 + $0x618] sm:$0xff] }
 0x1ab   :  { %3668 = vmatprep.subr.bf16.mxu1 %v8689_v63  ;;  %v8323_v63 = vcombine.high %v314_v57, %v322_v58  ;;  %v482_v51 = vld [vmem:[#allocation8 + $0x658] sm:$0xff] }
 0x1ac   :  { %v730_v52 = vld [vmem:[#allocation8 + $0xe18] sm:$0xff] }
 0x1ad   :  { %3628 = vmatpush2.bf16.msra.mxu0 %v8432_v4  ;;  %v562_v4 = vld [vmem:[#allocation8 + $0x8d8] sm:$0xff] }
 0x1ae   :  { %3669 = vmatpush2.bf16.msra.mxu1 %v8688_v5  ;;  %3629 = vmatprep.subr.bf16.mxu0 %v8417_v6  ;;  %v8322_v5 = vcombine.low %v314_v57, %v322_v58  ;;  %v8578_v6 = vcombine.low %v570_v59, %v578_v60  ;;  %v8563_v8 = vcombine.high %v554_v3, %v562_v4  ;;  %v458_v58 = vld [vmem:[#allocation8 + $0x598] sm:$0xff] }
 0x1af   :  { %3670 = vmatprep.subr.bf16.mxu1 %v8673_v7  ;;  %v8307_v7 = vcombine.high %v298_v1, %v306_v2  ;;  %v466_v59 = vld [vmem:[#allocation8 + $0x5d8] sm:$0xff] }
 0x1b0   :  { %v714_v60 = vld [vmem:[#allocation8 + $0xd98] sm:$0xff] }
 0x1b1   :  { %3630 = vmatpush2.bf16.msra.mxu0 %v8416_v12  ;;  %v546_v12 = vld [vmem:[#allocation8 + $0x858] sm:$0xff] }
 0x1b2   :  { %3671 = vmatpush2.bf16.msra.mxu1 %v8672_v13  ;;  %3681 = vmatprep.subr.bf16.mxu0 %v8403_v14  ;;  %v8306_v13 = vcombine.low %v298_v1, %v306_v2  ;;  %v8562_v14 = vcombine.low %v554_v3, %v562_v4  ;;  %v8547_v17 = vcombine.high %v538_v11, %v546_v12  ;;  %v442_v2 = vld [vmem:[#allocation8 + $0x518] sm:$0xff] }
 0x1b3   :  { %3722 = vmatprep.subr.bf16.mxu1 %v8659_v15  ;;  %v8291_v15 = vcombine.high %v282_v9, %v290_v10  ;;  %v450_v3 = vld [vmem:[#allocation8 + $0x558] sm:$0xff] }
 0x1b4   :  { %3632 = vmatmul.mubr.bf16.vlgmr.msra.gmra.mxu0 %v10579_v49  ;;  %v698_v4 = vld [vmem:[#allocation8 + $0xd18] sm:$0xff] }
 0x1b5   :  { %3673 = vmatmul.mubr.bf16.vlgmr.msra.gmra.mxu1 %v10573_v44  ;;  %3682 = vmatpush1.bf16.msra.mxu0 %v8402_v23  ;;  %v530_v23 = vld [vmem:[#allocation8 + $0x7d8] sm:$0xff] }
 0x1b6   :  { %3713 = vmatprep.mubr.bf16.mxu0 %v10575_v47  ;;  %3723 = vmatpush1.bf16.msra.mxu1 %v8658_v26  ;;  %v8290_v26 = vcombine.low %v282_v9, %v290_v10  ;;  %v8531_v28 = vcombine.high %v522_v22, %v530_v23  ;;  %v426_v10 = vld [vmem:[#allocation8 + $0x498] sm:$0xff] }
 0x1b7   :  { %3754 = vmatprep.mubr.bf16.mxu1 %v10577_v48  ;;  %3683 = vmatprep.subr.bf16.mxu0 %v8387_v27  ;;  %v8546_v27 = vcombine.low %v538_v11, %v546_v12  ;;  %v434_v11 = vld [vmem:[#allocation8 + $0x4d8] sm:$0xff] }
 0x1b8   :  { %3724 = vmatprep.subr.bf16.mxu1 %v8643_v30  ;;  %v506_v30 = vld [vmem:[#allocation8 + $0x718] sm:$0xff] }
 0x1b9   :  { %3684 = vmatpush1.bf16.msra.mxu0 %v8386_v33  ;;  %v770_v33 = vld [vmem:[#allocation8 + $0xf58] sm:$0xff] }
 0x1ba   :  { %3725 = vmatpush1.bf16.msra.mxu1 %v8642_v34  ;;  %3685 = vmatprep.subr.bf16.mxu0 %v8371_v35  ;;  %v8530_v34 = vcombine.low %v522_v22, %v530_v23  ;;  %v8786_v35 = vcombine.low %v778_v24, %v786_v25  ;;  %v8771_v37 = vcombine.high %v762_v32, %v770_v33  ;;  %v682_v12 = vld [vmem:[#allocation8 + $0xc98] sm:$0xff] }
 0x1bb   :  { %3726 = vmatprep.subr.bf16.mxu1 %v8627_v36  ;;  %v8515_v36 = vcombine.high %v506_v30, %v514_v31  ;;  %v410_v23 = vld [vmem:[#allocation8 + $0x418] sm:$0xff] }
 0x1bc   :  { %v418_v24 = vld [vmem:[#allocation8 + $0x458] sm:$0xff] }
 0x1bd   :  { %3686 = vmatpush1.bf16.msra.mxu0 %v8370_v41  ;;  %v754_v41 = vld [vmem:[#allocation8 + $0xed8] sm:$0xff] }
 0x1be   :  { %3727 = vmatpush1.bf16.msra.mxu1 %v8626_v42  ;;  %3687 = vmatprep.subr.bf16.mxu0 %v8355_v43  ;;  %v8514_v42 = vcombine.low %v506_v30, %v514_v31  ;;  %v8770_v43 = vcombine.low %v762_v32, %v770_v33  ;;  %v8755_v46 = vcombine.high %v746_v40, %v754_v41  ;;  %v666_v25 = vld [vmem:[#allocation8 + $0xc18] sm:$0xff]  ;;  %v395_v31 = vld [vmem:[#allocation8 + $0x3a0] sm:$0xff] }
 0x1bf   :  { %3728 = vmatprep.subr.bf16.mxu1 %v8611_v45  ;;  %v8499_v45 = vcombine.high %v490_v38, %v498_v39  ;;  %v403_v32 = vld [vmem:[#allocation8 + $0x3e0] sm:$0xff] }
 0x1c0   :  { %v651_v33 = vld [vmem:[#allocation8 + $0xba0] sm:$0xff] }
 0x1c1   :  { %3688 = vmatpush1.bf16.msra.mxu0 %v8354_v53  ;;  %v738_v53 = vld [vmem:[#allocation8 + $0xe58] sm:$0xff] }
 0x1c2   :  { %3729 = vmatpush1.bf16.msra.mxu1 %v8610_v54  ;;  %3689 = vmatprep.subr.bf16.mxu0 %v8339_v55  ;;  %v8498_v54 = vcombine.low %v490_v38, %v498_v39  ;;  %v8754_v55 = vcombine.low %v746_v40, %v754_v41  ;;  %v8739_v57 = vcombine.high %v730_v52, %v738_v53  ;;  %v10595_v38 = vld [vmem:[#allocation10] sm:$0xff] }
 0x1c3   :  { %3730 = vmatprep.subr.bf16.mxu1 %v8595_v56  ;;  %v8483_v56 = vcombine.high %v474_v50, %v482_v51  ;;  %v379_v40 = vld [vmem:[#allocation8 + $0x320] sm:$0xff] }
 0x1c4   :  { %v387_v41 = vld [vmem:[#allocation8 + $0x360] sm:$0xff] }
 0x1c5   :  { %3690 = vmatpush1.bf16.msra.mxu0 %v8338_v61  ;;  %v722_v61 = vld [vmem:[#allocation8 + $0xdd8] sm:$0xff] }
 0x1c6   :  { %3731 = vmatpush1.bf16.msra.mxu1 %v8594_v62  ;;  %3691 = vmatprep.subr.bf16.mxu0 %v8323_v63  ;;  %v8482_v62 = vcombine.low %v474_v50, %v482_v51  ;;  %v8738_v63 = vcombine.low %v730_v52, %v738_v53  ;;  %v8723_v1 = vcombine.high %v714_v60, %v722_v61  ;;  %v363_v53 = vld [vmem:[#allocation8 + $0x2a0] sm:$0xff] }
 0x1c7   :  { %3732 = vmatprep.subr.bf16.mxu1 %v8579_v0  ;;  %v8467_v0 = vcombine.high %v458_v58, %v466_v59  ;;  %v802_v51 = vrot.slane %v10595_v38, %v10564_v20  ;;  %v8389_v52 = vcombine.high %v379_v40, %v387_v41 }
 0x1c9   :  { %3692 = vmatpush1.bf16.msra.mxu0 %v8322_v5  ;;  %v706_v5 = vld [vmem:[#allocation8 + $0xd58] sm:$0xff] }
 0x1ca   :  { %3733 = vmatpush1.bf16.msra.mxu1 %v8578_v6  ;;  %3693 = vmatprep.subr.bf16.mxu0 %v8307_v7  ;;  %v8466_v6 = vcombine.low %v458_v58, %v466_v59  ;;  %v8722_v7 = vcombine.low %v714_v60, %v722_v61  ;;  %v8707_v9 = vcombine.high %v698_v4, %v706_v5  ;;  %v619_v58 = vld [vmem:[#allocation8 + $0xaa0] sm:$0xff] }
 0x1cb   :  { %3734 = vmatprep.subr.bf16.mxu1 %v8563_v8  ;;  %v8451_v8 = vcombine.high %v442_v2, %v450_v3  ;;  %v627_v59 = vld [vmem:[#allocation8 + $0xae0] sm:$0xff]  ;;  %v8388_v61 = vcombine.low %v379_v40, %v387_v41 }
 0x1cc   :  { %v299_v40 = vld [vmem:[#allocation8 + $0xa0] sm:$0xff] }
 0x1cd   :  { %3694 = vmatpush1.bf16.msra.mxu0 %v8306_v13  ;;  %v690_v13 = vld [vmem:[#allocation8 + $0xcd8] sm:$0xff]  ;;  %v307_v41 = vld [vmem:[#allocation8 + $0xe0] sm:$0xff] }
 0x1ce   :  { %3735 = vmatpush1.bf16.msra.mxu1 %v8562_v14  ;;  %3695 = vmatprep.subr.bf16.mxu0 %v8291_v15  ;;  %v8450_v14 = vcombine.low %v442_v2, %v450_v3  ;;  %v8706_v15 = vcombine.low %v698_v4, %v706_v5  ;;  %v8691_v22 = vcombine.high %v682_v12, %v690_v13  ;;  %v347_v5 = vld [vmem:[#allocation8 + $0x220] sm:$0xff] }
 0x1cf   :  { %3736 = vmatprep.subr.bf16.mxu1 %v8547_v17  ;;  %v8435_v17 = vcombine.high %v426_v10, %v434_v11  ;;  %v8629_v4 = vcombine.high %v619_v58, %v627_v59 }
 0x1d1   :  { %3696 = vmatpush1.bf16.msra.mxu0 %v8290_v26  ;;  %v674_v26 = vld [vmem:[#allocation8 + $0xc58] sm:$0xff] }
 0x1d2   :  { %3737 = vmatpush1.bf16.msra.mxu1 %v8546_v27  ;;  %3697 = vmatprep.subr.bf16.mxu0 %v8531_v28  ;;  %v8434_v27 = vcombine.low %v426_v10, %v434_v11  ;;  %v8690_v28 = vcombine.low %v682_v12, %v690_v13  ;;  %v8675_v30 = vcombine.high %v666_v25, %v674_v26  ;;  %v611_v10 = vld [vmem:[#allocation8 + $0xa60] sm:$0xff] }
 0x1d3   :  { %3738 = vmatprep.subr.bf16.mxu1 %v8787_v29  ;;  %v8419_v29 = vcombine.high %v410_v23, %v418_v24 }
 0x1d5   :  { %3698 = vmatpush2.bf16.msra.mxu0 %v8530_v34  ;;  %v659_v34 = vld [vmem:[#allocation8 + $0xbe0] sm:$0xff] }
 0x1d6   :  { %3739 = vmatpush2.bf16.msra.mxu1 %v8786_v35  ;;  %3699 = vmatprep.subr.bf16.mxu0 %v8515_v36  ;;  %v8418_v35 = vcombine.low %v410_v23, %v418_v24  ;;  %v8674_v36 = vcombine.low %v666_v25, %v674_v26  ;;  %v8661_v39 = vcombine.high %v651_v33, %v659_v34  ;;  %v331_v23 = vld [vmem:[#allocation8 + $0x1a0] sm:$0xff] }
 0x1d7   :  { %3740 = vmatprep.subr.bf16.mxu1 %v8771_v37  ;;  %v8405_v37 = vcombine.high %v395_v31, %v403_v32  ;;  %v8660_v50 = vcombine.low %v651_v33, %v659_v34  ;;  %v339_v24 = vld [vmem:[#allocation8 + $0x1e0] sm:$0xff] }
 0x1d8   :  { %v587_v25 = vld [vmem:[#allocation8 + $0x9a0] sm:$0xff] }
 0x1d9   :  { %3700 = vmatpush2.bf16.msra.mxu0 %v8514_v42  ;;  %v8404_v42 = vcombine.low %v395_v31, %v403_v32  ;;  %v595_v26 = vld [vmem:[#allocation8 + $0x9e0] sm:$0xff] }
 0x1da   :  { %3741 = vmatpush2.bf16.msra.mxu1 %v8770_v43  ;;  %3701 = vmatprep.subr.bf16.mxu0 %v8499_v45  ;;  %v798_v43 = vrot.slane %v10595_v38, %v10558_v18  ;;  %v635_v45 = vld [vmem:[#allocation8 + $0xb20] sm:$0xff] }
 0x1db   :  { %3742 = vmatprep.subr.bf16.mxu1 %v8755_v46  ;;  %v643_v46 = vld [vmem:[#allocation8 + $0xb60] sm:$0xff] }
 0x1dc   :  { %v315_v31 = vld [vmem:[#allocation8 + $0x120] sm:$0xff] }
 0x1dd   :  { %3702 = vmatpush2.bf16.msra.mxu0 %v8498_v54  ;;  %v371_v54 = vld [vmem:[#allocation8 + $0x2e0] sm:$0xff] }
 0x1de   :  { %3743 = vmatpush2.bf16.msra.mxu1 %v8754_v55  ;;  %3703 = vmatprep.subr.bf16.mxu0 %v8483_v56  ;;  %v8372_v12 = vcombine.low %v363_v53, %v371_v54  ;;  %v323_v32 = vld [vmem:[#allocation8 + $0x160] sm:$0xff] }
 0x1df   :  { %3744 = vmatprep.subr.bf16.mxu1 %v8739_v57  ;;  %v8645_v57 = vcombine.high %v635_v45, %v643_v46  ;;  %v571_v33 = vld [vmem:[#allocation8 + $0x920] sm:$0xff] }
 0x1e0   :  { %v579_v34 = vld [vmem:[#allocation8 + $0x960] sm:$0xff] }
 0x1e1   :  { %3704 = vmatpush2.bf16.msra.mxu0 %v8482_v62 }
 0x1e2   :  { %3745 = vmatpush2.bf16.msra.mxu1 %v8738_v63  ;;  %3705 = vmatprep.subr.bf16.mxu0 %v8467_v0  ;;  %v8644_v0 = vcombine.low %v635_v45, %v643_v46  ;;  %v8324_v45 = vcombine.low %v315_v31, %v323_v32  ;;  %v8580_v46 = vcombine.low %v571_v33, %v579_v34 }
 0x1e3   :  { %3746 = vmatprep.subr.bf16.mxu1 %v8723_v1  ;;  %v8373_v1 = vcombine.high %v363_v53, %v371_v54  ;;  %v291_v53 = vld [vmem:[#allocation8 + $0x60] sm:$0xff] }
 0x1e4   :  { %v539_v54 = vld [vmem:[#allocation8 + $0x820] sm:$0xff] }
 0x1e5   :  { %3706 = vmatpush2.bf16.msra.mxu0 %v8466_v6  ;;  %v355_v6 = vld [vmem:[#allocation8 + $0x260] sm:$0xff] }
 0x1e6   :  { %3747 = vmatpush2.bf16.msra.mxu1 %v8722_v7  ;;  %3707 = vmatprep.subr.bf16.mxu0 %v8451_v8 }
 0x1e7   :  { %3748 = vmatprep.subr.bf16.mxu1 %v8707_v9  ;;  %v603_v9 = vld [vmem:[#allocation8 + $0xa20] sm:$0xff] }
 0x1e9   :  { %3708 = vmatpush2.bf16.msra.mxu0 %v8450_v14 }
 0x1ea   :  { %3749 = vmatpush2.bf16.msra.mxu1 %v8706_v15  ;;  %3709 = vmatprep.subr.bf16.mxu0 %v8435_v17  ;;  %v8628_v15 = vcombine.low %v619_v58, %v627_v59  ;;  %v8357_v17 = vcombine.high %v347_v5, %v355_v6 }
 0x1eb   :  { %3750 = vmatprep.subr.bf16.mxu1 %v8691_v22  ;;  %v8613_v22 = vcombine.high %v603_v9, %v611_v10 }
 0x1ed   :  { %3710 = vmatpush2.bf16.msra.mxu0 %v8434_v27  ;;  %v8356_v27 = vcombine.low %v347_v5, %v355_v6  ;;  %v507_v5 = vld [vmem:[#allocation8 + $0x720] sm:$0xff] }
 0x1ee   :  { %3751 = vmatpush2.bf16.msra.mxu1 %v8690_v28  ;;  %3711 = vmatprep.subr.bf16.mxu0 %v8419_v29  ;;  %v8612_v28 = vcombine.low %v603_v9, %v611_v10  ;;  %v8341_v29 = vcombine.high %v331_v23, %v339_v24  ;;  %v515_v6 = vld [vmem:[#allocation8 + $0x760] sm:$0xff] }
 0x1ef   :  { %3752 = vmatprep.subr.bf16.mxu1 %v8675_v30  ;;  %v8597_v30 = vcombine.high %v587_v25, %v595_v26 }
 0x1f1   :  { %3712 = vmatpush2.bf16.msra.mxu0 %v8418_v35  ;;  %v8340_v35 = vcombine.low %v331_v23, %v339_v24  ;;  %v8516_v23 = vcombine.low %v507_v5, %v515_v6 }
 0x1f2   :  { %3753 = vmatpush2.bf16.msra.mxu1 %v8674_v36  ;;  %3763 = vmatprep.subr.bf16.mxu0 %v8405_v37  ;;  %v8596_v36 = vcombine.low %v587_v25, %v595_v26  ;;  %v8325_v37 = vcombine.high %v315_v31, %v323_v32 }
 0x1f3   :  { %3804 = vmatprep.subr.bf16.mxu1 %v8661_v39  ;;  %v8581_v39 = vcombine.high %v571_v33, %v579_v34 }
 0x1f4   :  { %3714 = vmatmul.mubr.bf16.vlgmr.msra.gmra.mxu0 %v10579_v49  ;;  %v3469_v55 = vpop.f32.mrf.mxu0 }
 0x1f5   :  { %v3510_v56 = vpop.f32.mrf.mxu1  ;;  %3755 = vmatmul.mubr.bf16.vlgmr.msra.gmra.mxu1 %v10573_v44  ;;  %v3470_v60 = vadd.f32 %v3469_v55, %v798_v43  ;;  %3764 = vmatpush1.bf16.msra.mxu0 %v8404_v42  ;;  %v555_v42 = vld [vmem:[#allocation8 + $0x8a0] sm:$0xff] }
 0x1f6   :  { %3795 = vmatprep.mubr.bf16.mxu0 %v10575_v47  ;;  %3805 = vmatpush1.bf16.msra.mxu1 %v8660_v50  ;;  %v3471_v62 = vpop.f32.mrf.mxu0  ;;  %v563_v43 = vld [vmem:[#allocation8 + $0x8e0] sm:$0xff]  ;;  %v8309_v50 = vcombine.high %v299_v40, %v307_v41 }
 0x1f7   :  { %v3512_v63 = vpop.f32.mrf.mxu1  ;;  %v10604_v2 = vadd.f32 %v3510_v56, %v3470_v60  ;;  %3836 = vmatprep.mubr.bf16.mxu1 %v10577_v48  ;;  %v3472_v3 = vadd.f32 %v3471_v62, %v802_v51  ;;  %3765 = vmatprep.subr.bf16.mxu0 %v8389_v52  ;;  %v8565_v51 = vcombine.high %v555_v42, %v563_v43  ;;  %v283_v52 = vld [vmem:[#allocation8 + $0x20] sm:$0xff] }
 0x1f8   :  { %3806 = vmatprep.subr.bf16.mxu1 %v8645_v57  ;;  %v3473_v7 = vpop.f32.mrf.mxu0  ;;  %v547_v55 = vld [vmem:[#allocation8 + $0x860] sm:$0xff]  ;;  %v8308_v56 = vcombine.low %v299_v40, %v307_v41  ;;  %v8564_v57 = vcombine.low %v555_v42, %v563_v43  ;;  %v8293_v58 = vcombine.high %v283_v52, %v291_v53 }
 0x1f9   :  { %v3514_v8 = vpop.f32.mrf.mxu1  ;;  %v10607_v11 = vadd.f32 %v3512_v63, %v3472_v3  ;;  %3766 = vmatpush1.bf16.msra.mxu0 %v8388_v61  ;;  %v8549_v59 = vcombine.high %v539_v54, %v547_v55  ;;  %v523_v60 = vld [vmem:[#allocation8 + $0x7a0] sm:$0xff] }
 0x1fa   :  { %3807 = vmatpush1.bf16.msra.mxu1 %v8644_v0  ;;  %v3474_v13 = vpop.f32.mrf.mxu0  ;;  %3767 = vmatprep.subr.bf16.mxu0 %v8373_v1  ;;  %v531_v61 = vld [vmem:[#allocation8 + $0x7e0] sm:$0xff]  ;;  %v8292_v0 = vcombine.low %v283_v52, %v291_v53  ;;  %v8548_v1 = vcombine.low %v539_v54, %v547_v55 }
 0x1fb   :  { %v3515_v14 = vpop.f32.mrf.mxu1  ;;  %3808 = vmatprep.subr.bf16.mxu1 %v8629_v4  ;;  %v779_v62 = vld [vmem:[#allocation8 + $0xfa0] sm:$0xff]  ;;  %v8533_v3 = vcombine.high %v523_v60, %v531_v61  ;;  %v8532_v9 = vcombine.low %v523_v60, %v531_v61 }
 0x1fc   :  { %v787_v63 = vld [vmem:[#allocation8 + $0xfe0] sm:$0xff] }
 0x1fd   :  { %3768 = vmatpush1.bf16.msra.mxu0 %v8372_v12  ;;  %v8789_v4 = vcombine.high %v779_v62, %v787_v63  ;;  %v763_v7 = vld [vmem:[#allocation8 + $0xf20] sm:$0xff]  ;;  %v8788_v10 = vcombine.low %v779_v62, %v787_v63  ;;  %v8517_v12 = vcombine.high %v507_v5, %v515_v6 }
 0x1fe   :  { %3809 = vmatpush1.bf16.msra.mxu1 %v8628_v15  ;;  %3769 = vmatprep.subr.bf16.mxu0 %v8357_v17  ;;  %v771_v8 = vld [vmem:[#allocation8 + $0xf60] sm:$0xff] }
 0x1ff   :  { %3810 = vmatprep.subr.bf16.mxu1 %v8613_v22  ;;  %v8773_v13 = vcombine.high %v763_v7, %v771_v8  ;;  %v491_v14 = vld [vmem:[#allocation8 + $0x6a0] sm:$0xff]  ;;  %v8772_v24 = vcombine.low %v763_v7, %v771_v8 }
 0x200   :  { %v499_v15 = vld [vmem:[#allocation8 + $0x6e0] sm:$0xff] }
 0x201   :  { %3770 = vmatpush1.bf16.msra.mxu0 %v8356_v27  ;;  %v747_v17 = vld [vmem:[#allocation8 + $0xea0] sm:$0xff]  ;;  %v8501_v25 = vcombine.high %v491_v14, %v499_v15  ;;  %v8500_v31 = vcombine.low %v491_v14, %v499_v15 }
 0x202   :  { %3811 = vmatpush1.bf16.msra.mxu1 %v8612_v28  ;;  %3771 = vmatprep.subr.bf16.mxu0 %v8341_v29  ;;  %v755_v22 = vld [vmem:[#allocation8 + $0xee0] sm:$0xff] }
 0x203   :  { %3812 = vmatprep.subr.bf16.mxu1 %v8597_v30  ;;  %v8757_v26 = vcombine.high %v747_v17, %v755_v22  ;;  %v475_v27 = vld [vmem:[#allocation8 + $0x620] sm:$0xff]  ;;  %v8756_v32 = vcombine.low %v747_v17, %v755_v22 }
 0x204   :  { %v483_v28 = vld [vmem:[#allocation8 + $0x660] sm:$0xff] }
 0x205   :  { %3772 = vmatpush1.bf16.msra.mxu0 %v8340_v35  ;;  %v731_v29 = vld [vmem:[#allocation8 + $0xe20] sm:$0xff]  ;;  %v8485_v33 = vcombine.high %v475_v27, %v483_v28  ;;  %v8484_v40 = vcombine.low %v475_v27, %v483_v28  ;;  %v636_v27 = vld [vmem:[#allocation8 + $0xb28] sm:$0xff] }
 0x206   :  { %3813 = vmatpush1.bf16.msra.mxu1 %v8596_v36  ;;  %3773 = vmatprep.subr.bf16.mxu0 %v8325_v37  ;;  %v739_v30 = vld [vmem:[#allocation8 + $0xe60] sm:$0xff]  ;;  %v644_v28 = vld [vmem:[#allocation8 + $0xb68] sm:$0xff] }
 0x207   :  { %3814 = vmatprep.subr.bf16.mxu1 %v8581_v39  ;;  %v8741_v34 = vcombine.high %v731_v29, %v739_v30  ;;  %v459_v35 = vld [vmem:[#allocation8 + $0x5a0] sm:$0xff]  ;;  %v8740_v41 = vcombine.low %v731_v29, %v739_v30  ;;  %v810_v30 = vrot.slane %v10595_v38, %v10567_v21 }
 0x208   :  { %v467_v36 = vld [vmem:[#allocation8 + $0x5e0] sm:$0xff] }
 0x209   :  { %3774 = vmatpush1.bf16.msra.mxu0 %v8324_v45  ;;  %v715_v37 = vld [vmem:[#allocation8 + $0xda0] sm:$0xff]  ;;  %v8469_v42 = vcombine.high %v459_v35, %v467_v36  ;;  %v8468_v52 = vcombine.low %v459_v35, %v467_v36  ;;  %v8647_v36 = vcombine.high %v636_v27, %v644_v28 }
 0x20a   :  { %3815 = vmatpush1.bf16.msra.mxu1 %v8580_v46  ;;  %3775 = vmatprep.subr.bf16.mxu0 %v8309_v50  ;;  %v723_v39 = vld [vmem:[#allocation8 + $0xde0] sm:$0xff] }
 0x20b   :  { %3816 = vmatprep.subr.bf16.mxu1 %v8565_v51  ;;  %v8725_v43 = vcombine.high %v715_v37, %v723_v39  ;;  %v443_v45 = vld [vmem:[#allocation8 + $0x520] sm:$0xff]  ;;  %v8724_v53 = vcombine.low %v715_v37, %v723_v39  ;;  %v620_v37 = vld [vmem:[#allocation8 + $0xaa8] sm:$0xff] }
 0x20c   :  { %v451_v46 = vld [vmem:[#allocation8 + $0x560] sm:$0xff]  ;;  %v628_v39 = vld [vmem:[#allocation8 + $0xae8] sm:$0xff] }
 0x20d   :  { %3776 = vmatpush1.bf16.msra.mxu0 %v8308_v56  ;;  %v699_v50 = vld [vmem:[#allocation8 + $0xd20] sm:$0xff]  ;;  %v8453_v54 = vcombine.high %v443_v45, %v451_v46  ;;  %v8452_v60 = vcombine.low %v443_v45, %v451_v46  ;;  %v8646_v45 = vcombine.low %v636_v27, %v644_v28  ;;  %v556_v27 = vld [vmem:[#allocation8 + $0x8a8] sm:$0xff] }
 0x20e   :  { %3817 = vmatpush1.bf16.msra.mxu1 %v8564_v57  ;;  %3777 = vmatprep.subr.bf16.mxu0 %v8293_v58  ;;  %v707_v51 = vld [vmem:[#allocation8 + $0xd60] sm:$0xff]  ;;  %v564_v28 = vld [vmem:[#allocation8 + $0x8e8] sm:$0xff] }
 0x20f   :  { %3818 = vmatprep.subr.bf16.mxu1 %v8549_v59  ;;  %v8709_v55 = vcombine.high %v699_v50, %v707_v51  ;;  %v427_v56 = vld [vmem:[#allocation8 + $0x4a0] sm:$0xff]  ;;  %v8708_v61 = vcombine.low %v699_v50, %v707_v51 }
 0x210   :  { %v435_v57 = vld [vmem:[#allocation8 + $0x4e0] sm:$0xff] }
 0x211   :  { %3778 = vmatpush1.bf16.msra.mxu0 %v8292_v0  ;;  %v683_v58 = vld [vmem:[#allocation8 + $0xca0] sm:$0xff]  ;;  %v8437_v62 = vcombine.high %v427_v56, %v435_v57  ;;  %v8436_v5 = vcombine.low %v427_v56, %v435_v57  ;;  %v604_v57 = vld [vmem:[#allocation8 + $0xa28] sm:$0xff] }
 0x212   :  { %3819 = vmatpush1.bf16.msra.mxu1 %v8548_v1  ;;  %3779 = vmatprep.subr.bf16.mxu0 %v8533_v3  ;;  %v691_v59 = vld [vmem:[#allocation8 + $0xce0] sm:$0xff] }
 0x213   :  { %3820 = vmatprep.subr.bf16.mxu1 %v8789_v4  ;;  %v8693_v63 = vcombine.high %v683_v58, %v691_v59  ;;  %v411_v0 = vld [vmem:[#allocation8 + $0x420] sm:$0xff]  ;;  %v8692_v6 = vcombine.low %v683_v58, %v691_v59  ;;  %v612_v58 = vld [vmem:[#allocation8 + $0xa68] sm:$0xff] }
 0x214   :  { %v419_v1 = vld [vmem:[#allocation8 + $0x460] sm:$0xff] }
 0x215   :  { %3780 = vmatpush2.bf16.msra.mxu0 %v8532_v9  ;;  %v667_v3 = vld [vmem:[#allocation8 + $0xc20] sm:$0xff]  ;;  %v8421_v7 = vcombine.high %v411_v0, %v419_v1  ;;  %v396_v9 = vld [vmem:[#allocation8 + $0x3a8] sm:$0xff]  ;;  %v8420_v14 = vcombine.low %v411_v0, %v419_v1  ;;  %v8615_v1 = vcombine.high %v604_v57, %v612_v58 }
 0x216   :  { %3821 = vmatpush2.bf16.msra.mxu1 %v8788_v10  ;;  %3781 = vmatprep.subr.bf16.mxu0 %v8517_v12  ;;  %v675_v4 = vld [vmem:[#allocation8 + $0xc60] sm:$0xff]  ;;  %v404_v10 = vld [vmem:[#allocation8 + $0x3e8] sm:$0xff] }
 0x217   :  { %3822 = vmatprep.subr.bf16.mxu1 %v8773_v13  ;;  %v8677_v8 = vcombine.high %v667_v3, %v675_v4  ;;  %v652_v12 = vld [vmem:[#allocation8 + $0xba8] sm:$0xff]  ;;  %v8676_v15 = vcombine.low %v667_v3, %v675_v4  ;;  %v8407_v17 = vcombine.high %v396_v9, %v404_v10 }
 0x218   :  { %v660_v13 = vld [vmem:[#allocation8 + $0xbe8] sm:$0xff] }
 0x219   :  { %3782 = vmatpush2.bf16.msra.mxu0 %v8516_v23  ;;  %v8663_v22 = vcombine.high %v652_v12, %v660_v13  ;;  %v380_v23 = vld [vmem:[#allocation8 + $0x328] sm:$0xff]  ;;  %v8662_v29 = vcombine.low %v652_v12, %v660_v13 }
 0x21a   :  { %3823 = vmatpush2.bf16.msra.mxu1 %v8772_v24  ;;  %3783 = vmatprep.subr.bf16.mxu0 %v8501_v25  ;;  %v388_v24 = vld [vmem:[#allocation8 + $0x368] sm:$0xff]  ;;  %v806_v25 = vrot.slane %v10595_v38, %v10561_v19 }
 0x21b   :  { %3824 = vmatprep.subr.bf16.mxu1 %v8757_v26  ;;  %v8406_v26 = vcombine.low %v396_v9, %v404_v10  ;;  %v332_v3 = vld [vmem:[#allocation8 + $0x1a8] sm:$0xff] }
 0x21c   :  { %v340_v4 = vld [vmem:[#allocation8 + $0x1e8] sm:$0xff] }
 0x21d   :  { %3784 = vmatpush2.bf16.msra.mxu0 %v8500_v31  ;;  %v8391_v31 = vcombine.high %v380_v23, %v388_v24  ;;  %v8343_v9 = vcombine.high %v332_v3, %v340_v4  ;;  %v316_v12 = vld [vmem:[#allocation8 + $0x128] sm:$0xff] }
 0x21e   :  { %3825 = vmatpush2.bf16.msra.mxu1 %v8756_v32  ;;  %3785 = vmatprep.subr.bf16.mxu0 %v8485_v33  ;;  %v364_v32 = vld [vmem:[#allocation8 + $0x2a8] sm:$0xff] }
 0x21f   :  { %3826 = vmatprep.subr.bf16.mxu1 %v8741_v34  ;;  %v372_v33 = vld [vmem:[#allocation8 + $0x2e8] sm:$0xff] }
 0x220   :  { %v8375_v46 = vcombine.high %v364_v32, %v372_v33  ;;  %v324_v13 = vld [vmem:[#allocation8 + $0x168] sm:$0xff] }
 0x221   :  { %3786 = vmatpush2.bf16.msra.mxu0 %v8484_v40 }
 0x222   :  { %3827 = vmatpush2.bf16.msra.mxu1 %v8740_v41  ;;  %3787 = vmatprep.subr.bf16.mxu0 %v8469_v42  ;;  %v8390_v41 = vcombine.low %v380_v23, %v388_v24  ;;  %v8327_v23 = vcombine.high %v316_v12, %v324_v13 }
 0x223   :  { %3828 = vmatprep.subr.bf16.mxu1 %v8725_v43 }
 0x225   :  { %3788 = vmatpush2.bf16.msra.mxu0 %v8468_v52  ;;  %v8631_v52 = vcombine.high %v620_v37, %v628_v39 }
 0x226   :  { %3829 = vmatpush2.bf16.msra.mxu1 %v8724_v53  ;;  %3789 = vmatprep.subr.bf16.mxu0 %v8453_v54  ;;  %v348_v53 = vld [vmem:[#allocation8 + $0x228] sm:$0xff] }
 0x227   :  { %3830 = vmatprep.subr.bf16.mxu1 %v8709_v55  ;;  %v356_v54 = vld [vmem:[#allocation8 + $0x268] sm:$0xff] }
 0x228   :  { %v8359_v0 = vcombine.high %v348_v53, %v356_v54 }
 0x229   :  { %3790 = vmatpush2.bf16.msra.mxu0 %v8452_v60  ;;  %v8374_v60 = vcombine.low %v364_v32, %v372_v33  ;;  %v8567_v32 = vcombine.high %v556_v27, %v564_v28  ;;  %v284_v33 = vld [vmem:[#allocation8 + $0x28] sm:$0xff] }
 0x22a   :  { %3831 = vmatpush2.bf16.msra.mxu1 %v8708_v61  ;;  %3791 = vmatprep.subr.bf16.mxu0 %v8437_v62 }
 0x22b   :  { %3832 = vmatprep.subr.bf16.mxu1 %v8693_v63  ;;  %v8630_v63 = vcombine.low %v620_v37, %v628_v39  ;;  %v8566_v39 = vcombine.low %v556_v27, %v564_v28 }
 0x22d   :  { %3792 = vmatpush2.bf16.msra.mxu0 %v8436_v5  ;;  %v588_v5 = vld [vmem:[#allocation8 + $0x9a8] sm:$0xff] }
 0x22e   :  { %3833 = vmatpush2.bf16.msra.mxu1 %v8692_v6  ;;  %3793 = vmatprep.subr.bf16.mxu0 %v8421_v7  ;;  %v596_v6 = vld [vmem:[#allocation8 + $0x9e8] sm:$0xff]  ;;  %v8358_v7 = vcombine.low %v348_v53, %v356_v54 }
 0x22f   :  { %3834 = vmatprep.subr.bf16.mxu1 %v8677_v8  ;;  %v8614_v8 = vcombine.low %v604_v57, %v612_v58  ;;  %v8599_v10 = vcombine.high %v588_v5, %v596_v6  ;;  %v764_v57 = vld [vmem:[#allocation8 + $0xf28] sm:$0xff] }
 0x230   :  { %v772_v58 = vld [vmem:[#allocation8 + $0xf68] sm:$0xff] }
 0x231   :  { %3794 = vmatpush2.bf16.msra.mxu0 %v8420_v14  ;;  %v572_v14 = vld [vmem:[#allocation8 + $0x928] sm:$0xff] }
 0x232   :  { %3835 = vmatpush2.bf16.msra.mxu1 %v8676_v15  ;;  %3845 = vmatprep.subr.bf16.mxu0 %v8407_v17  ;;  %v580_v15 = vld [vmem:[#allocation8 + $0x968] sm:$0xff]  ;;  %v8342_v17 = vcombine.low %v332_v3, %v340_v4 }
 0x233   :  { %3886 = vmatprep.subr.bf16.mxu1 %v8663_v22  ;;  %v8598_v22 = vcombine.low %v588_v5, %v596_v6  ;;  %v8583_v24 = vcombine.high %v572_v14, %v580_v15  ;;  %v748_v3 = vld [vmem:[#allocation8 + $0xea8] sm:$0xff]  ;;  %v8774_v6 = vcombine.low %v764_v57, %v772_v58 }
 0x234   :  { %v3551_v34 = vpop.f32.mrf.mxu0  ;;  %3796 = vmatmul.mubr.bf16.vlgmr.msra.gmra.mxu0 %v10579_v49  ;;  %v756_v4 = vld [vmem:[#allocation8 + $0xee8] sm:$0xff] }
 0x235   :  { %v3592_v35 = vpop.f32.mrf.mxu1  ;;  %v3552_v40 = vadd.f32 %v3551_v34, %v806_v25  ;;  %3837 = vmatmul.mubr.bf16.vlgmr.msra.gmra.mxu1 %v10573_v44  ;;  %3846 = vmatpush1.bf16.msra.mxu0 %v8406_v26  ;;  %v300_v25 = vld [vmem:[#allocation8 + $0xa8] sm:$0xff] }
 0x236   :  { %3877 = vmatprep.mubr.bf16.mxu0 %v10575_v47  ;;  %3887 = vmatpush1.bf16.msra.mxu1 %v8662_v29  ;;  %v3553_v42 = vpop.f32.mrf.mxu0  ;;  %v308_v26 = vld [vmem:[#allocation8 + $0xe8] sm:$0xff]  ;;  %v8326_v29 = vcombine.low %v316_v12, %v324_v13 }
 0x237   :  { %v3594_v43 = vpop.f32.mrf.mxu1  ;;  %v10616_v50 = vadd.f32 %v3592_v35, %v3552_v40  ;;  %3918 = vmatprep.mubr.bf16.mxu1 %v10577_v48  ;;  %v3554_v51 = vadd.f32 %v3553_v42, %v810_v30  ;;  %3847 = vmatprep.subr.bf16.mxu0 %v8391_v31  ;;  %v8582_v30 = vcombine.low %v572_v14, %v580_v15  ;;  %v292_v34 = vld [vmem:[#allocation8 + $0x68] sm:$0xff] }
 0x238   :  { %v3555_v55 = vpop.f32.mrf.mxu0  ;;  %3888 = vmatprep.subr.bf16.mxu1 %v8647_v36  ;;  %v8311_v31 = vcombine.high %v300_v25, %v308_v26  ;;  %v540_v35 = vld [vmem:[#allocation8 + $0x828] sm:$0xff]  ;;  %v8310_v37 = vcombine.low %v300_v25, %v308_v26  ;;  %v8295_v40 = vcombine.high %v284_v33, %v292_v34  ;;  %v8758_v15 = vcombine.low %v748_v3, %v756_v4 }
 0x239   :  { %v3596_v56 = vpop.f32.mrf.mxu1  ;;  %v10619_v59 = vadd.f32 %v3594_v43, %v3554_v51  ;;  %3848 = vmatpush1.bf16.msra.mxu0 %v8390_v41  ;;  %v548_v36 = vld [vmem:[#allocation8 + $0x868] sm:$0xff]  ;;  %v8294_v51 = vcombine.low %v284_v33, %v292_v34 }
 0x23a   :  { %3889 = vmatpush1.bf16.msra.mxu1 %v8646_v45  ;;  %v3556_v61 = vpop.f32.mrf.mxu0  ;;  %3849 = vmatprep.subr.bf16.mxu0 %v8375_v46  ;;  %v8551_v41 = vcombine.high %v540_v35, %v548_v36  ;;  %v524_v42 = vld [vmem:[#allocation8 + $0x7a8] sm:$0xff] }
 0x23b   :  { %v3597_v62 = vpop.f32.mrf.mxu1  ;;  %3890 = vmatprep.subr.bf16.mxu1 %v8631_v52  ;;  %v532_v43 = vld [vmem:[#allocation8 + $0x7e8] sm:$0xff]  ;;  %v8550_v52 = vcombine.low %v540_v35, %v548_v36 }
 0x23c   :  { %v780_v45 = vld [vmem:[#allocation8 + $0xfa8] sm:$0xff]  ;;  %v8535_v53 = vcombine.high %v524_v42, %v532_v43 }
 0x23d   :  { %3850 = vmatpush1.bf16.msra.mxu0 %v8374_v60  ;;  %v788_v46 = vld [vmem:[#allocation8 + $0xfe8] sm:$0xff]  ;;  %v8534_v60 = vcombine.low %v524_v42, %v532_v43 }
 0x23e   :  { %3891 = vmatpush1.bf16.msra.mxu1 %v8630_v63  ;;  %3851 = vmatprep.subr.bf16.mxu0 %v8359_v0  ;;  %v8791_v54 = vcombine.high %v780_v45, %v788_v46  ;;  %v508_v55 = vld [vmem:[#allocation8 + $0x728] sm:$0xff]  ;;  %v8790_v61 = vcombine.low %v780_v45, %v788_v46  ;;  %v8775_v63 = vcombine.high %v764_v57, %v772_v58 }
 0x23f   :  { %3892 = vmatprep.subr.bf16.mxu1 %v8615_v1  ;;  %v516_v56 = vld [vmem:[#allocation8 + $0x768] sm:$0xff] }
 0x240   :  { %v8519_v62 = vcombine.high %v508_v55, %v516_v56  ;;  %v492_v0 = vld [vmem:[#allocation8 + $0x6a8] sm:$0xff]  ;;  %v8518_v5 = vcombine.low %v508_v55, %v516_v56 }
 0x241   :  { %3852 = vmatpush1.bf16.msra.mxu0 %v8358_v7  ;;  %v500_v1 = vld [vmem:[#allocation8 + $0x6e8] sm:$0xff] }
 0x242   :  { %3893 = vmatpush1.bf16.msra.mxu1 %v8614_v8  ;;  %3853 = vmatprep.subr.bf16.mxu0 %v8343_v9  ;;  %v8503_v7 = vcombine.high %v492_v0, %v500_v1  ;;  %v8759_v8 = vcombine.high %v748_v3, %v756_v4  ;;  %v476_v9 = vld [vmem:[#allocation8 + $0x628] sm:$0xff]  ;;  %v8502_v14 = vcombine.low %v492_v0, %v500_v1  ;;  %v653_v0 = vld [vmem:[#allocation8 + $0xbb0] sm:$0xff]  ;;  %v813_v4 = vsub.s32 4, %v10555_v16 }
 0x243   :  { %3894 = vmatprep.subr.bf16.mxu1 %v8599_v10  ;;  %v484_v10 = vld [vmem:[#allocation8 + $0x668] sm:$0xff]  ;;  %v661_v1 = vld [vmem:[#allocation8 + $0xbf0] sm:$0xff] }
 0x244   :  { %v732_v12 = vld [vmem:[#allocation8 + $0xe28] sm:$0xff]  ;;  %v8486_v27 = vcombine.low %v476_v9, %v484_v10 }
 0x245   :  { %3854 = vmatpush1.bf16.msra.mxu0 %v8342_v17  ;;  %v740_v13 = vld [vmem:[#allocation8 + $0xe68] sm:$0xff]  ;;  %v8487_v17 = vcombine.high %v476_v9, %v484_v10  ;;  %v381_v9 = vld [vmem:[#allocation8 + $0x330] sm:$0xff] }
 0x246   :  { %3895 = vmatpush1.bf16.msra.mxu1 %v8598_v22  ;;  %3855 = vmatprep.subr.bf16.mxu0 %v8327_v23  ;;  %v8743_v22 = vcombine.high %v732_v12, %v740_v13  ;;  %v460_v23 = vld [vmem:[#allocation8 + $0x5a8] sm:$0xff]  ;;  %v8742_v28 = vcombine.low %v732_v12, %v740_v13  ;;  %v389_v10 = vld [vmem:[#allocation8 + $0x370] sm:$0xff]  ;;  %v814_v12 = vrot.slane %v10595_v38, %v813_v4 }
 0x247   :  { %3896 = vmatprep.subr.bf16.mxu1 %v8583_v24  ;;  %v468_v24 = vld [vmem:[#allocation8 + $0x5e8] sm:$0xff] }
 0x248   :  { %v716_v25 = vld [vmem:[#allocation8 + $0xda8] sm:$0xff]  ;;  %v8470_v35 = vcombine.low %v460_v23, %v468_v24 }
 0x249   :  { %3856 = vmatpush1.bf16.msra.mxu0 %v8326_v29  ;;  %v724_v26 = vld [vmem:[#allocation8 + $0xde8] sm:$0xff]  ;;  %v8471_v29 = vcombine.high %v460_v23, %v468_v24  ;;  %v8393_v23 = vcombine.high %v381_v9, %v389_v10  ;;  %v365_v24 = vld [vmem:[#allocation8 + $0x2b0] sm:$0xff] }
 0x24a   :  { %3897 = vmatpush1.bf16.msra.mxu1 %v8582_v30  ;;  %3857 = vmatprep.subr.bf16.mxu0 %v8311_v31  ;;  %v8727_v30 = vcombine.high %v716_v25, %v724_v26  ;;  %v444_v31 = vld [vmem:[#allocation8 + $0x528] sm:$0xff]  ;;  %v8726_v36 = vcombine.low %v716_v25, %v724_v26  ;;  %v373_v25 = vld [vmem:[#allocation8 + $0x2f0] sm:$0xff] }
 0x24b   :  { %3898 = vmatprep.subr.bf16.mxu1 %v8567_v32  ;;  %v452_v32 = vld [vmem:[#allocation8 + $0x568] sm:$0xff] }
 0x24c   :  { %v700_v33 = vld [vmem:[#allocation8 + $0xd28] sm:$0xff]  ;;  %v8454_v45 = vcombine.low %v444_v31, %v452_v32 }
 0x24d   :  { %3858 = vmatpush1.bf16.msra.mxu0 %v8310_v37  ;;  %v708_v34 = vld [vmem:[#allocation8 + $0xd68] sm:$0xff]  ;;  %v8455_v37 = vcombine.high %v444_v31, %v452_v32  ;;  %v8392_v32 = vcombine.low %v381_v9, %v389_v10  ;;  %v581_v9 = vld [vmem:[#allocation8 + $0x970] sm:$0xff] }
 0x24e   :  { %3899 = vmatpush1.bf16.msra.mxu1 %v8566_v39  ;;  %3859 = vmatprep.subr.bf16.mxu0 %v8295_v40  ;;  %v8711_v39 = vcombine.high %v700_v33, %v708_v34  ;;  %v428_v40 = vld [vmem:[#allocation8 + $0x4a8] sm:$0xff]  ;;  %v8710_v46 = vcombine.low %v700_v33, %v708_v34  ;;  %v8377_v34 = vcombine.high %v365_v24, %v373_v25 }
 0x24f   :  { %3900 = vmatprep.subr.bf16.mxu1 %v8551_v41  ;;  %v436_v41 = vld [vmem:[#allocation8 + $0x4e8] sm:$0xff] }
 0x250   :  { %v684_v42 = vld [vmem:[#allocation8 + $0xca8] sm:$0xff]  ;;  %v8438_v57 = vcombine.low %v428_v40, %v436_v41 }
 0x251   :  { %3860 = vmatpush1.bf16.msra.mxu0 %v8294_v51  ;;  %v692_v43 = vld [vmem:[#allocation8 + $0xce8] sm:$0xff]  ;;  %v8439_v51 = vcombine.high %v428_v40, %v436_v41  ;;  %v349_v40 = vld [vmem:[#allocation8 + $0x230] sm:$0xff] }
 0x252   :  { %3901 = vmatpush1.bf16.msra.mxu1 %v8550_v52  ;;  %3861 = vmatprep.subr.bf16.mxu0 %v8535_v53  ;;  %v8695_v52 = vcombine.high %v684_v42, %v692_v43  ;;  %v412_v53 = vld [vmem:[#allocation8 + $0x428] sm:$0xff]  ;;  %v8694_v58 = vcombine.low %v684_v42, %v692_v43  ;;  %v357_v41 = vld [vmem:[#allocation8 + $0x270] sm:$0xff] }
 0x253   :  { %3902 = vmatprep.subr.bf16.mxu1 %v8791_v54  ;;  %v420_v54 = vld [vmem:[#allocation8 + $0x468] sm:$0xff]  ;;  %v605_v43 = vld [vmem:[#allocation8 + $0xa30] sm:$0xff] }
 0x254   :  { %v668_v55 = vld [vmem:[#allocation8 + $0xc28] sm:$0xff]  ;;  %v8422_v3 = vcombine.low %v412_v53, %v420_v54 }
 0x255   :  { %3862 = vmatpush2.bf16.msra.mxu0 %v8534_v60  ;;  %v676_v56 = vld [vmem:[#allocation8 + $0xc68] sm:$0xff]  ;;  %v8423_v60 = vcombine.high %v412_v53, %v420_v54 }
 0x256   :  { %3903 = vmatpush2.bf16.msra.mxu1 %v8790_v61  ;;  %3863 = vmatprep.subr.bf16.mxu0 %v8519_v62  ;;  %v8679_v61 = vcombine.high %v668_v55, %v676_v56  ;;  %v397_v62 = vld [vmem:[#allocation8 + $0x3b0] sm:$0xff] }
 0x257   :  { %3904 = vmatprep.subr.bf16.mxu1 %v8775_v63  ;;  %v405_v63 = vld [vmem:[#allocation8 + $0x3f0] sm:$0xff] }
 0x258   :  { %v8408_v13 = vcombine.low %v397_v62, %v405_v63 }
 0x259   :  { %3864 = vmatpush2.bf16.msra.mxu0 %v8518_v5  ;;  %v8678_v5 = vcombine.low %v668_v55, %v676_v56  ;;  %v8361_v55 = vcombine.high %v349_v40, %v357_v41 }
 0x25a   :  { %3905 = vmatpush2.bf16.msra.mxu1 %v8774_v6  ;;  %3865 = vmatprep.subr.bf16.mxu0 %v8503_v7  ;;  %v8409_v6 = vcombine.high %v397_v62, %v405_v63  ;;  %v8665_v7 = vcombine.high %v653_v0, %v661_v1  ;;  %v597_v62 = vld [vmem:[#allocation8 + $0x9f0] sm:$0xff]  ;;  %v8360_v63 = vcombine.low %v349_v40, %v357_v41 }
 0x25b   :  { %3906 = vmatprep.subr.bf16.mxu1 %v8759_v8  ;;  %v817_v8 = vsub.s32 5, %v10555_v16  ;;  %v789_v40 = vld [vmem:[#allocation8 + $0xff0] sm:$0xff] }
 0x25d   :  { %3866 = vmatpush2.bf16.msra.mxu0 %v8502_v14  ;;  %v637_v14 = vld [vmem:[#allocation8 + $0xb30] sm:$0xff] }
 0x25e   :  { %3907 = vmatpush2.bf16.msra.mxu1 %v8758_v15  ;;  %3867 = vmatprep.subr.bf16.mxu0 %v8487_v17  ;;  %v645_v15 = vld [vmem:[#allocation8 + $0xb70] sm:$0xff]  ;;  %v8664_v17 = vcombine.low %v653_v0, %v661_v1 }
 0x25f   :  { %3908 = vmatprep.subr.bf16.mxu1 %v8743_v22  ;;  %v818_v22 = vrot.slane %v10595_v38, %v817_v8  ;;  %v8648_v38 = vcombine.low %v637_v14, %v645_v15 }
 0x261   :  { %3868 = vmatpush2.bf16.msra.mxu0 %v8486_v27  ;;  %v8649_v27 = vcombine.high %v637_v14, %v645_v15  ;;  %v301_v15 = vld [vmem:[#allocation8 + $0xb0] sm:$0xff] }
 0x262   :  { %3909 = vmatpush2.bf16.msra.mxu1 %v8742_v28  ;;  %3869 = vmatprep.subr.bf16.mxu0 %v8471_v29  ;;  %v621_v28 = vld [vmem:[#allocation8 + $0xab0] sm:$0xff] }
 0x263   :  { %3910 = vmatprep.subr.bf16.mxu1 %v8727_v30  ;;  %v629_v29 = vld [vmem:[#allocation8 + $0xaf0] sm:$0xff] }
 0x264   :  { %v8632_v54 = vcombine.low %v621_v28, %v629_v29 }
 0x265   :  { %3870 = vmatpush2.bf16.msra.mxu0 %v8470_v35 }
 0x266   :  { %3911 = vmatpush2.bf16.msra.mxu1 %v8726_v36  ;;  %3871 = vmatprep.subr.bf16.mxu0 %v8455_v37 }
 0x267   :  { %3912 = vmatprep.subr.bf16.mxu1 %v8711_v39  ;;  %v8633_v39 = vcombine.high %v621_v28, %v629_v29  ;;  %v285_v28 = vld [vmem:[#allocation8 + $0x30] sm:$0xff] }
 0x268   :  { %v293_v29 = vld [vmem:[#allocation8 + $0x70] sm:$0xff] }
 0x269   :  { %3872 = vmatpush2.bf16.msra.mxu0 %v8454_v45  ;;  %v613_v45 = vld [vmem:[#allocation8 + $0xa70] sm:$0xff]  ;;  %v8296_v41 = vcombine.low %v285_v28, %v293_v29 }
 0x26a   :  { %3913 = vmatpush2.bf16.msra.mxu1 %v8710_v46  ;;  %3873 = vmatprep.subr.bf16.mxu0 %v8439_v51  ;;  %v8616_v0 = vcombine.low %v605_v43, %v613_v45 }
 0x26b   :  { %3914 = vmatprep.subr.bf16.mxu1 %v8695_v52  ;;  %v8376_v52 = vcombine.low %v365_v24, %v373_v25 }
 0x26d   :  { %3874 = vmatpush2.bf16.msra.mxu0 %v8438_v57  ;;  %v8617_v57 = vcombine.high %v605_v43, %v613_v45 }
 0x26e   :  { %3915 = vmatpush2.bf16.msra.mxu1 %v8694_v58  ;;  %3875 = vmatprep.subr.bf16.mxu0 %v8423_v60  ;;  %v333_v58 = vld [vmem:[#allocation8 + $0x1b0] sm:$0xff] }
 0x26f   :  { %3916 = vmatprep.subr.bf16.mxu1 %v8679_v61  ;;  %v341_v60 = vld [vmem:[#allocation8 + $0x1f0] sm:$0xff] }
 0x270   :  { %v589_v61 = vld [vmem:[#allocation8 + $0x9b0] sm:$0xff]  ;;  %v8345_v1 = vcombine.high %v333_v58, %v341_v60  ;;  %v8344_v10 = vcombine.low %v333_v58, %v341_v60 }
 0x271   :  { %3876 = vmatpush2.bf16.msra.mxu0 %v8422_v3  ;;  %v8601_v3 = vcombine.high %v589_v61, %v597_v62  ;;  %v493_v60 = vld [vmem:[#allocation8 + $0x6b0] sm:$0xff] }
 0x272   :  { %3917 = vmatpush2.bf16.msra.mxu1 %v8678_v5  ;;  %3927 = vmatprep.subr.bf16.mxu0 %v8409_v6  ;;  %v317_v5 = vld [vmem:[#allocation8 + $0x130] sm:$0xff] }
 0x273   :  { %3968 = vmatprep.subr.bf16.mxu1 %v8665_v7  ;;  %v325_v6 = vld [vmem:[#allocation8 + $0x170] sm:$0xff] }
 0x274   :  { %v3633_v26 = vpop.f32.mrf.mxu0  ;;  %3878 = vmatmul.mubr.bf16.vlgmr.msra.gmra.mxu0 %v10579_v49  ;;  %v573_v7 = vld [vmem:[#allocation8 + $0x930] sm:$0xff]  ;;  %v8328_v24 = vcombine.low %v317_v5, %v325_v6 }
 0x275   :  { %v3634_v30 = vadd.f32 %v3633_v26, %v814_v12  ;;  %v3674_v31 = vpop.f32.mrf.mxu1  ;;  %3919 = vmatmul.mubr.bf16.vlgmr.msra.gmra.mxu1 %v10573_v44  ;;  %3928 = vmatpush1.bf16.msra.mxu0 %v8408_v13  ;;  %v8600_v12 = vcombine.low %v589_v61, %v597_v62  ;;  %v8329_v13 = vcombine.high %v317_v5, %v325_v6  ;;  %v501_v61 = vld [vmem:[#allocation8 + $0x6f0] sm:$0xff] }
 0x276   :  { %3959 = vmatprep.mubr.bf16.mxu0 %v10575_v47  ;;  %3969 = vmatpush1.bf16.msra.mxu1 %v8664_v17  ;;  %v3635_v33 = vpop.f32.mrf.mxu0  ;;  %v8585_v14 = vcombine.high %v573_v7, %v581_v9  ;;  %v309_v17 = vld [vmem:[#allocation8 + $0xf0] sm:$0xff]  ;;  %v8584_v25 = vcombine.low %v573_v7, %v581_v9 }
 0x277   :  { %v10632_v35 = vadd.f32 %v3674_v31, %v3634_v30  ;;  %4000 = vmatprep.mubr.bf16.mxu1 %v10577_v48  ;;  %v3636_v36 = vadd.f32 %v3635_v33, %v818_v22  ;;  %v3676_v37 = vpop.f32.mrf.mxu1  ;;  %3929 = vmatprep.subr.bf16.mxu0 %v8393_v23  ;;  %v557_v22 = vld [vmem:[#allocation8 + $0x8b0] sm:$0xff]  ;;  %v8313_v26 = vcombine.high %v301_v15, %v309_v17 }
 0x278   :  { %v3637_v42 = vpop.f32.mrf.mxu0  ;;  %3970 = vmatprep.subr.bf16.mxu1 %v8649_v27  ;;  %v565_v23 = vld [vmem:[#allocation8 + $0x8f0] sm:$0xff] }
 0x279   :  { %v10635_v46 = vadd.f32 %v3676_v37, %v3636_v36  ;;  %v3678_v51 = vpop.f32.mrf.mxu1  ;;  %3930 = vmatpush1.bf16.msra.mxu0 %v8392_v32  ;;  %v8569_v27 = vcombine.high %v557_v22, %v565_v23  ;;  %v541_v30 = vld [vmem:[#allocation8 + $0x830] sm:$0xff]  ;;  %v8312_v32 = vcombine.low %v301_v15, %v309_v17  ;;  %v8568_v33 = vcombine.low %v557_v22, %v565_v23 }
 0x27a   :  { %3971 = vmatpush1.bf16.msra.mxu1 %v8648_v38  ;;  %v3638_v53 = vpop.f32.mrf.mxu0  ;;  %3931 = vmatprep.subr.bf16.mxu0 %v8377_v34  ;;  %v549_v31 = vld [vmem:[#allocation8 + $0x870] sm:$0xff]  ;;  %v8297_v38 = vcombine.high %v285_v28, %v293_v29 }
 0x27b   :  { %v3679_v56 = vpop.f32.mrf.mxu1  ;;  %3972 = vmatprep.subr.bf16.mxu1 %v8633_v39  ;;  %v8553_v34 = vcombine.high %v541_v30, %v549_v31  ;;  %v525_v36 = vld [vmem:[#allocation8 + $0x7b0] sm:$0xff]  ;;  %v8552_v42 = vcombine.low %v541_v30, %v549_v31 }
 0x27c   :  { %v533_v37 = vld [vmem:[#allocation8 + $0x7f0] sm:$0xff] }
 0x27d   :  { %3932 = vmatpush1.bf16.msra.mxu0 %v8376_v52  ;;  %v781_v39 = vld [vmem:[#allocation8 + $0xfb0] sm:$0xff]  ;;  %v8537_v43 = vcombine.high %v525_v36, %v533_v37 }
 0x27e   :  { %3973 = vmatpush1.bf16.msra.mxu1 %v8632_v54  ;;  %3933 = vmatprep.subr.bf16.mxu0 %v8361_v55  ;;  %v8793_v45 = vcombine.high %v781_v39, %v789_v40  ;;  %v509_v51 = vld [vmem:[#allocation8 + $0x730] sm:$0xff]  ;;  %v8536_v55 = vcombine.low %v525_v36, %v533_v37  ;;  %v8792_v56 = vcombine.low %v781_v39, %v789_v40 }
 0x27f   :  { %3974 = vmatprep.subr.bf16.mxu1 %v8617_v57  ;;  %v517_v52 = vld [vmem:[#allocation8 + $0x770] sm:$0xff] }
 0x280   :  { %v765_v53 = vld [vmem:[#allocation8 + $0xf30] sm:$0xff]  ;;  %v8521_v57 = vcombine.high %v509_v51, %v517_v52 }
 0x281   :  { %3934 = vmatpush1.bf16.msra.mxu0 %v8360_v63  ;;  %v773_v54 = vld [vmem:[#allocation8 + $0xf70] sm:$0xff] }
 0x282   :  { %3975 = vmatpush1.bf16.msra.mxu1 %v8616_v0  ;;  %3935 = vmatprep.subr.bf16.mxu0 %v8345_v1  ;;  %v8777_v58 = vcombine.high %v765_v53, %v773_v54  ;;  %v749_v62 = vld [vmem:[#allocation8 + $0xeb0] sm:$0xff]  ;;  %v8520_v0 = vcombine.low %v509_v51, %v517_v52  ;;  %v8776_v1 = vcombine.low %v765_v53, %v773_v54 }
 0x283   :  { %3976 = vmatprep.subr.bf16.mxu1 %v8601_v3  ;;  %v757_v63 = vld [vmem:[#allocation8 + $0xef0] sm:$0xff]  ;;  %v8505_v3 = vcombine.high %v493_v60, %v501_v61 }
 0x284   :  { %v8761_v5 = vcombine.high %v749_v62, %v757_v63  ;;  %v477_v6 = vld [vmem:[#allocation8 + $0x630] sm:$0xff] }
 0x285   :  { %3936 = vmatpush1.bf16.msra.mxu0 %v8344_v10  ;;  %v485_v7 = vld [vmem:[#allocation8 + $0x670] sm:$0xff] }
 0x286   :  { %3977 = vmatpush1.bf16.msra.mxu1 %v8600_v12  ;;  %3937 = vmatprep.subr.bf16.mxu0 %v8329_v13  ;;  %v733_v9 = vld [vmem:[#allocation8 + $0xe30] sm:$0xff]  ;;  %v8504_v12 = vcombine.low %v493_v60, %v501_v61  ;;  %v8760_v13 = vcombine.low %v749_v62, %v757_v63  ;;  %v398_v61 = vld [vmem:[#allocation8 + $0x3b8] sm:$0xff] }
 0x287   :  { %3978 = vmatprep.subr.bf16.mxu1 %v8585_v14  ;;  %v741_v10 = vld [vmem:[#allocation8 + $0xe70] sm:$0xff]  ;;  %v8489_v14 = vcombine.high %v477_v6, %v485_v7  ;;  %v406_v62 = vld [vmem:[#allocation8 + $0x3f8] sm:$0xff] }
 0x288   :  { %v8745_v15 = vcombine.high %v733_v9, %v741_v10  ;;  %v461_v17 = vld [vmem:[#allocation8 + $0x5b0] sm:$0xff]  ;;  %v654_v63 = vld [vmem:[#allocation8 + $0xbb8] sm:$0xff] }
 0x289   :  { %3938 = vmatpush1.bf16.msra.mxu0 %v8328_v24  ;;  %v469_v22 = vld [vmem:[#allocation8 + $0x5f0] sm:$0xff] }
 0x28a   :  { %3979 = vmatpush1.bf16.msra.mxu1 %v8584_v25  ;;  %3939 = vmatprep.subr.bf16.mxu0 %v8313_v26  ;;  %v717_v23 = vld [vmem:[#allocation8 + $0xdb0] sm:$0xff]  ;;  %v8488_v25 = vcombine.low %v477_v6, %v485_v7  ;;  %v8744_v26 = vcombine.low %v733_v9, %v741_v10  ;;  %v8411_v6 = vcombine.high %v398_v61, %v406_v62  ;;  %v825_v9 = vsub.s32 7, %v10555_v16  ;;  %v382_v10 = vld [vmem:[#allocation8 + $0x338] sm:$0xff] }
 0x28b   :  { %3980 = vmatprep.subr.bf16.mxu1 %v8569_v27  ;;  %v725_v24 = vld [vmem:[#allocation8 + $0xdf0] sm:$0xff]  ;;  %v8473_v27 = vcombine.high %v461_v17, %v469_v22 }
 0x28c   :  { %v8729_v28 = vcombine.high %v717_v23, %v725_v24  ;;  %v445_v29 = vld [vmem:[#allocation8 + $0x530] sm:$0xff] }
 0x28d   :  { %3940 = vmatpush1.bf16.msra.mxu0 %v8312_v32  ;;  %v453_v30 = vld [vmem:[#allocation8 + $0x570] sm:$0xff] }
 0x28e   :  { %3981 = vmatpush1.bf16.msra.mxu1 %v8568_v33  ;;  %3941 = vmatprep.subr.bf16.mxu0 %v8297_v38  ;;  %v701_v31 = vld [vmem:[#allocation8 + $0xd30] sm:$0xff]  ;;  %v8472_v33 = vcombine.low %v461_v17, %v469_v22  ;;  %v8728_v38 = vcombine.low %v717_v23, %v725_v24  ;;  %v638_v17 = vld [vmem:[#allocation8 + $0xb38] sm:$0xff] }
 0x28f   :  { %3982 = vmatprep.subr.bf16.mxu1 %v8553_v34  ;;  %v709_v32 = vld [vmem:[#allocation8 + $0xd70] sm:$0xff]  ;;  %v8457_v34 = vcombine.high %v445_v29, %v453_v30  ;;  %v646_v22 = vld [vmem:[#allocation8 + $0xb78] sm:$0xff] }
 0x290   :  { %v8713_v36 = vcombine.high %v701_v31, %v709_v32  ;;  %v429_v37 = vld [vmem:[#allocation8 + $0x4b0] sm:$0xff] }
 0x291   :  { %3942 = vmatpush1.bf16.msra.mxu0 %v8296_v41  ;;  %v437_v39 = vld [vmem:[#allocation8 + $0x4f0] sm:$0xff] }
 0x292   :  { %3983 = vmatpush1.bf16.msra.mxu1 %v8552_v42  ;;  %3943 = vmatprep.subr.bf16.mxu0 %v8537_v43  ;;  %v685_v40 = vld [vmem:[#allocation8 + $0xcb0] sm:$0xff]  ;;  %v8456_v42 = vcombine.low %v445_v29, %v453_v30  ;;  %v8712_v43 = vcombine.low %v701_v31, %v709_v32  ;;  %v8651_v29 = vcombine.high %v638_v17, %v646_v22  ;;  %v622_v30 = vld [vmem:[#allocation8 + $0xab8] sm:$0xff] }
 0x293   :  { %3984 = vmatprep.subr.bf16.mxu1 %v8793_v45  ;;  %v693_v41 = vld [vmem:[#allocation8 + $0xcf0] sm:$0xff]  ;;  %v8441_v45 = vcombine.high %v429_v37, %v437_v39  ;;  %v630_v31 = vld [vmem:[#allocation8 + $0xaf8] sm:$0xff] }
 0x294   :  { %v8697_v51 = vcombine.high %v685_v40, %v693_v41  ;;  %v413_v52 = vld [vmem:[#allocation8 + $0x430] sm:$0xff] }
 0x295   :  { %3944 = vmatpush2.bf16.msra.mxu0 %v8536_v55  ;;  %v421_v53 = vld [vmem:[#allocation8 + $0x470] sm:$0xff] }
 0x296   :  { %3985 = vmatpush2.bf16.msra.mxu1 %v8792_v56  ;;  %3945 = vmatprep.subr.bf16.mxu0 %v8521_v57  ;;  %v669_v54 = vld [vmem:[#allocation8 + $0xc30] sm:$0xff]  ;;  %v8440_v56 = vcombine.low %v429_v37, %v437_v39  ;;  %v8696_v57 = vcombine.low %v685_v40, %v693_v41 }
 0x297   :  { %3986 = vmatprep.subr.bf16.mxu1 %v8777_v58  ;;  %v677_v55 = vld [vmem:[#allocation8 + $0xc70] sm:$0xff]  ;;  %v8425_v58 = vcombine.high %v413_v52, %v421_v53 }
 0x298   :  { %v8681_v60 = vcombine.high %v669_v54, %v677_v55 }
 0x299   :  { %3946 = vmatpush2.bf16.msra.mxu0 %v8520_v0  ;;  %v662_v0 = vld [vmem:[#allocation8 + $0xbf8] sm:$0xff] }
 0x29a   :  { %3987 = vmatpush2.bf16.msra.mxu1 %v8776_v1  ;;  %3947 = vmatprep.subr.bf16.mxu0 %v8505_v3  ;;  %v8424_v1 = vcombine.low %v413_v52, %v421_v53  ;;  %v821_v3 = vsub.s32 6, %v10555_v16  ;;  %v8667_v7 = vcombine.high %v654_v63, %v662_v0  ;;  %v8666_v23 = vcombine.low %v654_v63, %v662_v0  ;;  %v606_v52 = vld [vmem:[#allocation8 + $0xa38] sm:$0xff] }
 0x29b   :  { %3988 = vmatprep.subr.bf16.mxu1 %v8761_v5  ;;  %v8680_v5 = vcombine.low %v669_v54, %v677_v55  ;;  %v614_v53 = vld [vmem:[#allocation8 + $0xa78] sm:$0xff] }
 0x29c   :  { %v590_v63 = vld [vmem:[#allocation8 + $0x9b8] sm:$0xff] }
 0x29d   :  { %3948 = vmatpush2.bf16.msra.mxu0 %v8504_v12  ;;  %v390_v12 = vld [vmem:[#allocation8 + $0x378] sm:$0xff] }
 0x29e   :  { %3989 = vmatpush2.bf16.msra.mxu1 %v8760_v13  ;;  %3949 = vmatprep.subr.bf16.mxu0 %v8489_v14  ;;  %v10209_v13 = vld [vmem:[#allocation10] sm:$0xff]  ;;  %v598_v0 = vld [vmem:[#allocation8 + $0x9f8] sm:$0xff] }
 0x29f   :  { %3990 = vmatprep.subr.bf16.mxu1 %v8745_v15  ;;  %v822_v14 = vrot.slane %v10209_v13, %v821_v3  ;;  %v8410_v15 = vcombine.low %v398_v61, %v406_v62  ;;  %v826_v24 = vrot.slane %v10209_v13, %v825_v9  ;;  %v334_v61 = vld [vmem:[#allocation8 + $0x1b8] sm:$0xff] }
 0x2a0   :  { %v342_v62 = vld [vmem:[#allocation8 + $0x1f8] sm:$0xff] }
 0x2a1   :  { %3950 = vmatpush2.bf16.msra.mxu0 %v8488_v25  ;;  %v8395_v25 = vcombine.high %v382_v10, %v390_v12  ;;  %v574_v13 = vld [vmem:[#allocation8 + $0x938] sm:$0xff] }
 0x2a2   :  { %3991 = vmatpush2.bf16.msra.mxu1 %v8744_v26  ;;  %3951 = vmatprep.subr.bf16.mxu0 %v8473_v27  ;;  %v366_v26 = vld [vmem:[#allocation8 + $0x2b8] sm:$0xff] }
 0x2a3   :  { %3992 = vmatprep.subr.bf16.mxu1 %v8729_v28  ;;  %v374_v27 = vld [vmem:[#allocation8 + $0x2f8] sm:$0xff] }
 0x2a4   :  { %v8379_v37 = vcombine.high %v366_v26, %v374_v27  ;;  %v8378_v55 = vcombine.low %v366_v26, %v374_v27  ;;  %v558_v26 = vld [vmem:[#allocation8 + $0x8b8] sm:$0xff] }
 0x2a5   :  { %3952 = vmatpush2.bf16.msra.mxu0 %v8472_v33  ;;  %v566_v27 = vld [vmem:[#allocation8 + $0x8f8] sm:$0xff] }
 0x2a6   :  { %3993 = vmatpush2.bf16.msra.mxu1 %v8728_v38  ;;  %3953 = vmatprep.subr.bf16.mxu0 %v8457_v34  ;;  %v8394_v38 = vcombine.low %v382_v10, %v390_v12  ;;  %v318_v10 = vld [vmem:[#allocation8 + $0x138] sm:$0xff] }
 0x2a7   :  { %3994 = vmatprep.subr.bf16.mxu1 %v8713_v36  ;;  %v8650_v36 = vcombine.low %v638_v17, %v646_v22  ;;  %v326_v12 = vld [vmem:[#allocation8 + $0x178] sm:$0xff]  ;;  %v8602_v17 = vcombine.low %v590_v63, %v598_v0 }
 0x2a8   :  { %v8331_v22 = vcombine.high %v318_v10, %v326_v12 }
 0x2a9   :  { %3954 = vmatpush2.bf16.msra.mxu0 %v8456_v42  ;;  %v8635_v42 = vcombine.high %v622_v30, %v630_v31 }
 0x2aa   :  { %3995 = vmatpush2.bf16.msra.mxu1 %v8712_v43  ;;  %3955 = vmatprep.subr.bf16.mxu0 %v8441_v45  ;;  %v350_v43 = vld [vmem:[#allocation8 + $0x238] sm:$0xff] }
 0x2ab   :  { %3996 = vmatprep.subr.bf16.mxu1 %v8697_v51  ;;  %v358_v45 = vld [vmem:[#allocation8 + $0x278] sm:$0xff] }
 0x2ad   :  { %3956 = vmatpush2.bf16.msra.mxu0 %v8440_v56 }
 0x2ae   :  { %3997 = vmatpush2.bf16.msra.mxu1 %v8696_v57  ;;  %3957 = vmatprep.subr.bf16.mxu0 %v8425_v58  ;;  %v8634_v57 = vcombine.low %v622_v30, %v630_v31  ;;  %v8571_v31 = vcombine.high %v558_v26, %v566_v27 }
 0x2af   :  { %3998 = vmatprep.subr.bf16.mxu1 %v8681_v60  ;;  %v8619_v60 = vcombine.high %v606_v52, %v614_v53 }
 0x2b1   :  { %3958 = vmatpush2.bf16.msra.mxu0 %v8424_v1  ;;  %v8362_v1 = vcombine.low %v350_v43, %v358_v45 }
 0x2b2   :  { %3999 = vmatpush2.bf16.msra.mxu1 %v8680_v5  ;;  %4009 = vmatprep.subr.bf16.mxu0 %v8411_v6  ;;  %v8618_v5 = vcombine.low %v606_v52, %v614_v53  ;;  %v8347_v6 = vcombine.high %v334_v61, %v342_v62 }
 0x2b3   :  { %4050 = vmatprep.subr.bf16.mxu1 %v8667_v7  ;;  %v8603_v7 = vcombine.high %v590_v63, %v598_v0  ;;  %v494_v0 = vld [vmem:[#allocation8 + $0x6b8] sm:$0xff] }
 0x2b4   :  { %v3715_v28 = vpop.f32.mrf.mxu0  ;;  %3960 = vmatmul.mubr.bf16.vlgmr.msra.gmra.mxu0 %v10579_v49 }
 0x2b5   :  { %v3716_v32 = vadd.f32 %v3715_v28, %v822_v14  ;;  %v3756_v33 = vpop.f32.mrf.mxu1  ;;  %4001 = vmatmul.mubr.bf16.vlgmr.msra.gmra.mxu1 %v10573_v44  ;;  %4010 = vmatpush1.bf16.msra.mxu0 %v8410_v15  ;;  %v582_v14 = vld [vmem:[#allocation8 + $0x978] sm:$0xff]  ;;  %v8346_v15 = vcombine.low %v334_v61, %v342_v62  ;;  %v8330_v28 = vcombine.low %v318_v10, %v326_v12 }
 0x2b6   :  { %4041 = vmatprep.mubr.bf16.mxu0 %v10575_v47  ;;  %4051 = vmatpush1.bf16.msra.mxu1 %v8666_v23  ;;  %v3717_v34 = vpop.f32.mrf.mxu0  ;;  %v8587_v23 = vcombine.high %v574_v13, %v582_v14 }
 0x2b7   :  { %v10646_v39 = vadd.f32 %v3756_v33, %v3716_v32  ;;  %4082 = vmatprep.mubr.bf16.mxu1 %v10577_v48  ;;  %v3718_v40 = vadd.f32 %v3717_v34, %v826_v24  ;;  %v3758_v41 = vpop.f32.mrf.mxu1  ;;  %4011 = vmatprep.subr.bf16.mxu0 %v8395_v25  ;;  %v8363_v48 = vcombine.high %v350_v43, %v358_v45  ;;  %v302_v24 = vld [vmem:[#allocation8 + $0xb8] sm:$0xff] }
 0x2b8   :  { %v3719_v51 = vpop.f32.mrf.mxu0  ;;  %4052 = vmatprep.subr.bf16.mxu1 %v8651_v29  ;;  %v310_v25 = vld [vmem:[#allocation8 + $0xf8] sm:$0xff]  ;;  %v8586_v29 = vcombine.low %v574_v13, %v582_v14 }
 0x2b9   :  { %v10649_v54 = vadd.f32 %v3758_v41, %v3718_v40  ;;  %v3760_v47 = vpop.f32.mrf.mxu1  ;;  %4012 = vmatpush1.bf16.msra.mxu0 %v8394_v38  ;;  %v8315_v30 = vcombine.high %v302_v24, %v310_v25  ;;  %v286_v32 = vld [vmem:[#allocation8 + $0x38] sm:$0xff] }
 0x2ba   :  { %4053 = vmatpush1.bf16.msra.mxu1 %v8650_v36  ;;  %v3720_v56 = vpop.f32.mrf.mxu0  ;;  %4013 = vmatprep.subr.bf16.mxu0 %v8379_v37  ;;  %v294_v33 = vld [vmem:[#allocation8 + $0x78] sm:$0xff]  ;;  %v8314_v36 = vcombine.low %v302_v24, %v310_v25  ;;  %v8570_v37 = vcombine.low %v558_v26, %v566_v27 }
 0x2bb   :  { %v3761_v58 = vpop.f32.mrf.mxu1  ;;  %4054 = vmatprep.subr.bf16.mxu1 %v8635_v42  ;;  %v542_v38 = vld [vmem:[#allocation8 + $0x838] sm:$0xff]  ;;  %v8299_v40 = vcombine.high %v286_v32, %v294_v33  ;;  %v8298_v52 = vcombine.low %v286_v32, %v294_v33 }
 0x2bc   :  { %v550_v34 = vld [vmem:[#allocation8 + $0x878] sm:$0xff] }
 0x2bd   :  { %4014 = vmatpush1.bf16.msra.mxu0 %v8378_v55  ;;  %v8555_v41 = vcombine.high %v542_v38, %v550_v34  ;;  %v526_v42 = vld [vmem:[#allocation8 + $0x7b8] sm:$0xff]  ;;  %v8554_v53 = vcombine.low %v542_v38, %v550_v34 }
 0x2be   :  { %4055 = vmatpush1.bf16.msra.mxu1 %v8634_v57  ;;  %4015 = vmatprep.subr.bf16.mxu0 %v8363_v48  ;;  %v534_v43 = vld [vmem:[#allocation8 + $0x7f8] sm:$0xff] }
 0x2bf   :  { %4056 = vmatprep.subr.bf16.mxu1 %v8619_v60  ;;  %v782_v45 = vld [vmem:[#allocation8 + $0xfb8] sm:$0xff]  ;;  %v8539_v47 = vcombine.high %v526_v42, %v534_v43  ;;  %v8538_v60 = vcombine.low %v526_v42, %v534_v43 }
 0x2c0   :  { %v790_v51 = vld [vmem:[#allocation8 + $0xff8] sm:$0xff] }
 0x2c1   :  { %4016 = vmatpush1.bf16.msra.mxu0 %v8362_v1  ;;  %v8795_v55 = vcombine.high %v782_v45, %v790_v51  ;;  %v510_v56 = vld [vmem:[#allocation8 + $0x738] sm:$0xff]  ;;  %v8794_v61 = vcombine.low %v782_v45, %v790_v51 }
 0x2c2   :  { %4057 = vmatpush1.bf16.msra.mxu1 %v8618_v5  ;;  %4017 = vmatprep.subr.bf16.mxu0 %v8347_v6  ;;  %v518_v57 = vld [vmem:[#allocation8 + $0x778] sm:$0xff] }
 0x2c3   :  { %4058 = vmatprep.subr.bf16.mxu1 %v8603_v7  ;;  %v766_v48 = vld [vmem:[#allocation8 + $0xf38] sm:$0xff]  ;;  %v8523_v62 = vcombine.high %v510_v56, %v518_v57  ;;  %v8522_v7 = vcombine.low %v510_v56, %v518_v57 }
 0x2c4   :  { %v774_v58 = vld [vmem:[#allocation8 + $0xf78] sm:$0xff] }
 0x2c5   :  { %4018 = vmatpush1.bf16.msra.mxu0 %v8346_v15  ;;  %v8779_v63 = vcombine.high %v766_v48, %v774_v58  ;;  %v502_v1 = vld [vmem:[#allocation8 + $0x6f8] sm:$0xff]  ;;  %v8778_v10 = vcombine.low %v766_v48, %v774_v58 }
 0x2c6   :  { %4059 = vmatpush1.bf16.msra.mxu1 %v8602_v17  ;;  %4019 = vmatprep.subr.bf16.mxu0 %v8331_v22  ;;  %v750_v5 = vld [vmem:[#allocation8 + $0xeb8] sm:$0xff]  ;;  %v8507_v12 = vcombine.high %v494_v0, %v502_v1 }
 0x2c7   :  { %4060 = vmatprep.subr.bf16.mxu1 %v8587_v23  ;;  %v758_v6 = vld [vmem:[#allocation8 + $0xef8] sm:$0xff]  ;;  %v8506_v23 = vcombine.low %v494_v0, %v502_v1 }
 0x2c8   :  { %v8763_v13 = vcombine.high %v750_v5, %v758_v6  ;;  %v478_v14 = vld [vmem:[#allocation8 + $0x638] sm:$0xff]  ;;  %v8762_v24 = vcombine.low %v750_v5, %v758_v6 }
 0x2c9   :  { %4020 = vmatpush1.bf16.msra.mxu0 %v8330_v28  ;;  %v486_v15 = vld [vmem:[#allocation8 + $0x678] sm:$0xff] }
 0x2ca   :  { %4061 = vmatpush1.bf16.msra.mxu1 %v8586_v29  ;;  %4021 = vmatprep.subr.bf16.mxu0 %v8315_v30  ;;  %v734_v17 = vld [vmem:[#allocation8 + $0xe38] sm:$0xff]  ;;  %v8491_v25 = vcombine.high %v478_v14, %v486_v15 }
 0x2cb   :  { %4062 = vmatprep.subr.bf16.mxu1 %v8571_v31  ;;  %v742_v22 = vld [vmem:[#allocation8 + $0xe78] sm:$0xff]  ;;  %v8490_v31 = vcombine.low %v478_v14, %v486_v15  ;;  %v4092_v14 = vmax.f32 %v10607_v11, 0.0  ;;  %v4094_v15 = vmax.f32 %v10619_v59, 0.0  ;;  %v9418_v11 = vld [vmem:[#allocation11 + $0x2c4] ss:$16 sps:$4 sm:$0xff]  }
 0x2cc   :  { %v8747_v26 = vcombine.high %v734_v17, %v742_v22  ;;  %v462_v27 = vld [vmem:[#allocation8 + $0x5b8] sm:$0xff]  ;;  %v8746_v32 = vcombine.low %v734_v17, %v742_v22  ;;  %v9407_v22 = vld [vmem:[#allocation11 + $0xe0] ss:$16 sps:$4 sm:$0xff]  }
 0x2cd   :  { %4022 = vmatpush1.bf16.msra.mxu0 %v8314_v36  ;;  %v470_v28 = vld [vmem:[#allocation8 + $0x5f8] sm:$0xff]  ;;  %v10662_v59 = vpack.c.bf16 %v4094_v15, %v4094_v15  ;;  %v9460_v15 = vld [vmem:[#allocation11 + $0x3e4] ss:$16 sps:$4 sm:$0xff]  }
 0x2ce   :  { %4063 = vmatpush1.bf16.msra.mxu1 %v8570_v37  ;;  %4023 = vmatprep.subr.bf16.mxu0 %v8299_v40  ;;  %v718_v29 = vld [vmem:[#allocation8 + $0xdb8] sm:$0xff]  ;;  %v8475_v33 = vcombine.high %v462_v27, %v470_v28 }
 0x2cf   :  { %4064 = vmatprep.subr.bf16.mxu1 %v8555_v41  ;;  %v726_v30 = vld [vmem:[#allocation8 + $0xdf8] sm:$0xff]  ;;  %v8474_v41 = vcombine.low %v462_v27, %v470_v28 }
 0x2d0   :  { %v8731_v38 = vcombine.high %v718_v29, %v726_v30  ;;  %v446_v34 = vld [vmem:[#allocation8 + $0x538] sm:$0xff]  ;;  %v8730_v42 = vcombine.low %v718_v29, %v726_v30  ;;  %v9413_v30 = vld [vmem:[#allocation11 + $0xc0] ss:$16 sps:$4 sm:$0xff]  }
 0x2d1   :  { %4024 = vmatpush1.bf16.msra.mxu0 %v8298_v52  ;;  %v454_v36 = vld [vmem:[#allocation8 + $0x578] sm:$0xff] }
 0x2d2   :  { %4065 = vmatpush1.bf16.msra.mxu1 %v8554_v53  ;;  %4025 = vmatprep.subr.bf16.mxu0 %v8539_v47  ;;  %v702_v37 = vld [vmem:[#allocation8 + $0xd38] sm:$0xff]  ;;  %v8459_v43 = vcombine.high %v446_v34, %v454_v36 }
 0x2d3   :  { %4066 = vmatprep.subr.bf16.mxu1 %v8795_v55  ;;  %v710_v40 = vld [vmem:[#allocation8 + $0xd78] sm:$0xff]  ;;  %v8458_v55 = vcombine.low %v446_v34, %v454_v36  ;;  %v9424_v36 = vld [vmem:[#allocation11 + $0x2a4] ss:$16 sps:$4 sm:$0xff]  }
 0x2d4   :  { %v8715_v45 = vcombine.high %v702_v37, %v710_v40  ;;  %v430_v51 = vld [vmem:[#allocation8 + $0x4b8] sm:$0xff]  ;;  %v8714_v56 = vcombine.low %v702_v37, %v710_v40 }
 0x2d5   :  { %4026 = vmatpush2.bf16.msra.mxu0 %v8538_v60  ;;  %v438_v52 = vld [vmem:[#allocation8 + $0x4f8] sm:$0xff] }
 0x2d6   :  { %4067 = vmatpush2.bf16.msra.mxu1 %v8794_v61  ;;  %4027 = vmatprep.subr.bf16.mxu0 %v8523_v62  ;;  %v686_v53 = vld [vmem:[#allocation8 + $0xcb8] sm:$0xff]  ;;  %v8443_v57 = vcombine.high %v430_v51, %v438_v52 }
 0x2d7   :  { %4068 = vmatprep.subr.bf16.mxu1 %v8779_v63  ;;  %v694_v47 = vld [vmem:[#allocation8 + $0xcf8] sm:$0xff]  ;;  %v8442_v63 = vcombine.low %v430_v51, %v438_v52  ;;  %v9430_v52 = vld [vmem:[#allocation11 + $0x284] ss:$16 sps:$4 sm:$0xff]  }
 0x2d8   :  { %v8699_v48 = vcombine.high %v686_v53, %v694_v47  ;;  %v414_v58 = vld [vmem:[#allocation8 + $0x438] sm:$0xff]  ;;  %v8698_v0 = vcombine.low %v686_v53, %v694_v47  ;;  %v9425_v53 = vld [vmem:[#allocation11 + $0x80] ss:$16 sps:$4 sm:$0xff]  }
 0x2d9   :  { %4028 = vmatpush2.bf16.msra.mxu0 %v8522_v7  ;;  %v422_v60 = vld [vmem:[#allocation8 + $0x478] sm:$0xff]  ;;  %v9428_v47 = vld [vmem:[#allocation11 + $0x280] ss:$16 sps:$4 sm:$0xff]  }
 0x2da   :  { %4069 = vmatpush2.bf16.msra.mxu1 %v8778_v10  ;;  %4029 = vmatprep.subr.bf16.mxu0 %v8507_v12  ;;  %v670_v61 = vld [vmem:[#allocation8 + $0xc38] sm:$0xff]  ;;  %v8427_v1 = vcombine.high %v414_v58, %v422_v60  ;;  %v8426_v6 = vcombine.low %v414_v58, %v422_v60  ;;  %v10651_v10 = vld [vmem:[#allocation10 + $0x8] sm:$0xff]  ;;  %v9409_v12 = vld [vmem:[#allocation11 + $0xe4] ss:$16 sps:$4 sm:$0xff]  }
 0x2db   :  { %4070 = vmatprep.subr.bf16.mxu1 %v8763_v13  ;;  %v678_v62 = vld [vmem:[#allocation8 + $0xc78] sm:$0xff]  ;;  %v9412_v13 = vld [vmem:[#allocation11 + $0x2e4] ss:$16 sps:$4 sm:$0xff]   ;;  %v830_v17 = vrot.slane %v10651_v10, %v10558_v18 }
 0x2dc   :  { %v8683_v5 = vcombine.high %v670_v61, %v678_v62  ;;  %v8682_v7 = vcombine.low %v670_v61, %v678_v62  ;;  %v9439_v58 = vld [vmem:[#allocation11 + $0x44] ss:$16 sps:$4 sm:$0xff]   ;;  %v9437_v61 = vld [vmem:[#allocation11 + $0x40] ss:$16 sps:$4 sm:$0xff]  }
 0x2dd   :  { %4030 = vmatpush2.bf16.msra.mxu0 %v8506_v23  ;;  %v9410_v23 = vld [vmem:[#allocation11 + $0x2e0] ss:$16 sps:$4 sm:$0xff]   ;;  %v9442_v60 = vld [vmem:[#allocation11 + $0x244] ss:$16 sps:$4 sm:$0xff]  }
 0x2de   :  { %4071 = vmatpush2.bf16.msra.mxu1 %v8762_v24  ;;  %4031 = vmatprep.subr.bf16.mxu0 %v8491_v25  ;;  %v834_v24 = vrot.slane %v10651_v10, %v10564_v20  ;;  %v9415_v25 = vld [vmem:[#allocation11 + $0xc4] ss:$16 sps:$4 sm:$0xff]   ;;  %v9440_v62 = vld [vmem:[#allocation11 + $0x240] ss:$16 sps:$4 sm:$0xff]  }
 0x2df   :  { %4072 = vmatprep.subr.bf16.mxu1 %v8747_v26  ;;  %v10659_v26 = vpack.c.bf16 %v4092_v14, %v4092_v14  ;;  %v9457_v14 = vld [vmem:[#allocation11 + $0x1e4] ss:$16 sps:$4 sm:$0xff]  }
 0x2e1   :  { %4032 = vmatpush2.bf16.msra.mxu0 %v8490_v31 }
 0x2e2   :  { %4073 = vmatpush2.bf16.msra.mxu1 %v8746_v32  ;;  %4033 = vmatprep.subr.bf16.mxu0 %v8475_v33  ;;  %v9416_v32 = vld [vmem:[#allocation11 + $0x2c0] ss:$16 sps:$4 sm:$0xff]   ;;  %v9421_v33 = vld [vmem:[#allocation11 + $0xa4] ss:$16 sps:$4 sm:$0xff]  }
 0x2e3   :  { %4074 = vmatprep.subr.bf16.mxu1 %v8731_v38 }
 0x2e5   :  { %4034 = vmatpush2.bf16.msra.mxu0 %v8474_v41  ;;  %v9419_v41 = vld [vmem:[#allocation11 + $0xa0] ss:$16 sps:$4 sm:$0xff]  }
 0x2e6   :  { %4075 = vmatpush2.bf16.msra.mxu1 %v8730_v42  ;;  %4035 = vmatprep.subr.bf16.mxu0 %v8459_v43  ;;  %v9422_v43 = vld [vmem:[#allocation11 + $0x2a0] ss:$16 sps:$4 sm:$0xff]  }
 0x2e7   :  { %4076 = vmatprep.subr.bf16.mxu1 %v8715_v45  ;;  %v9427_v45 = vld [vmem:[#allocation11 + $0x84] ss:$16 sps:$4 sm:$0xff]  }
 0x2e9   :  { %4036 = vmatpush2.bf16.msra.mxu0 %v8458_v55  ;;  %v9433_v55 = vld [vmem:[#allocation11 + $0x64] ss:$16 sps:$4 sm:$0xff]  }
 0x2ea   :  { %4077 = vmatpush2.bf16.msra.mxu1 %v8714_v56  ;;  %4037 = vmatprep.subr.bf16.mxu0 %v8443_v57  ;;  %v9436_v56 = vld [vmem:[#allocation11 + $0x264] ss:$16 sps:$4 sm:$0xff]   ;;  %v9431_v57 = vld [vmem:[#allocation11 + $0x60] ss:$16 sps:$4 sm:$0xff]  }
 0x2eb   :  { %4078 = vmatprep.subr.bf16.mxu1 %v8699_v48  ;;  %v9434_v48 = vld [vmem:[#allocation11 + $0x260] ss:$16 sps:$4 sm:$0xff]  }
 0x2ed   :  { %4038 = vmatpush2.bf16.msra.mxu0 %v8442_v63  ;;  %v9445_v63 = vld [vmem:[#allocation11 + $0x24] ss:$16 sps:$4 sm:$0xff]  }
 0x2ee   :  { %4079 = vmatpush2.bf16.msra.mxu1 %v8698_v0  ;;  %4039 = vmatprep.subr.bf16.mxu0 %v8427_v1  ;;  %v9448_v0 = vld [vmem:[#allocation11 + $0x224] ss:$16 sps:$4 sm:$0xff]   ;;  %v9443_v1 = vld [vmem:[#allocation11 + $0x20] ss:$16 sps:$4 sm:$0xff]  }
 0x2ef   :  { %4080 = vmatprep.subr.bf16.mxu1 %v8683_v5  ;;  %v9446_v5 = vld [vmem:[#allocation11 + $0x220] ss:$16 sps:$4 sm:$0xff]  }
 0x2f1   :  { %4040 = vmatpush2.bf16.msra.mxu0 %v8426_v6  ;;  %v9451_v6 = vld [vmem:[#allocation11 + $0x4] ss:$16 sps:$4 sm:$0xff]  }
 0x2f2   :  { %4081 = vmatpush2.bf16.msra.mxu1 %v8682_v7  ;;  %7217 = vmatprep.subr.bf16.mxu0 %v9409_v12  ;;  %v9454_v7 = vld [vmem:[#allocation11 + $0x204] ss:$16 sps:$4 sm:$0xff]   ;;  %v9449_v12 = vld [vmem:[#allocation11] ss:$16 sps:$4 sm:$0xff]  }
 0x2f3   :  { %7258 = vmatprep.subr.bf16.mxu1 %v9412_v13  ;;  %v9452_v13 = vld [vmem:[#allocation11 + $0x200] ss:$16 sps:$4 sm:$0xff]  }
 0x2f4   :  { %v3797_v27 = vpop.f32.mrf.mxu0  ;;  %4042 = vmatmul.mubr.bf16.vlgmr.msra.gmra.mxu0 %v10579_v49 }
 0x2f5   :  { %v3798_v28 = vadd.f32 %v3797_v27, %v830_v17  ;;  %v3838_v29 = vpop.f32.mrf.mxu1  ;;  %4083 = vmatmul.mubr.bf16.vlgmr.msra.gmra.mxu1 %v10573_v44  ;;  %7218 = vmatpush1.bf16.msra.mxu0 %v9407_v22  ;;  %v9455_v17 = vld [vmem:[#allocation11 + $0x1e0] ss:$16 sps:$4 sm:$0xff]  }
 0x2f6   :  { %7249 = vmatprep.mubr.bf16.mxu0 %v10659_v26  ;;  %7259 = vmatpush1.bf16.msra.mxu1 %v9410_v23  ;;  %v3799_v31 = vpop.f32.mrf.mxu0  ;;  %v9458_v22 = vld [vmem:[#allocation11 + $0x3e0] ss:$16 sps:$4 sm:$0xff]   ;;  %v9463_v23 = vld [vmem:[#allocation11 + $0x1c4] ss:$16 sps:$4 sm:$0xff]  }
 0x2f7   :  { %v10666_v38 = vadd.f32 %v3838_v29, %v3798_v28  ;;  %7290 = vmatprep.mubr.bf16.mxu1 %v10662_v59  ;;  %v3800_v49 = vadd.f32 %v3799_v31, %v834_v24  ;;  %v3840_v34 = vpop.f32.mrf.mxu1  ;;  %7219 = vmatprep.subr.bf16.mxu0 %v9415_v25  ;;  %v9466_v24 = vld [vmem:[#allocation11 + $0x3c4] ss:$16 sps:$4 sm:$0xff]   ;;  %v9461_v25 = vld [vmem:[#allocation11 + $0x1c0] ss:$16 sps:$4 sm:$0xff]  }
 0x2f8   :  { %v3801_v37 = vpop.f32.mrf.mxu0  ;;  %7260 = vmatprep.subr.bf16.mxu1 %v9418_v11  ;;  %v9464_v27 = vld [vmem:[#allocation11 + $0x3c0] ss:$16 sps:$4 sm:$0xff]   ;;  %v9469_v11 = vld [vmem:[#allocation11 + $0x1a4] ss:$16 sps:$4 sm:$0xff]  }
 0x2f9   :  { %v10669_v40 = vadd.f32 %v3840_v34, %v3800_v49  ;;  %v3842_v44 = vpop.f32.mrf.mxu1  ;;  %7220 = vmatpush1.bf16.msra.mxu0 %v9413_v30  ;;  %v9472_v28 = vld [vmem:[#allocation11 + $0x3a4] ss:$16 sps:$4 sm:$0xff]   ;;  %v9467_v29 = vld [vmem:[#allocation11 + $0x1a0] ss:$16 sps:$4 sm:$0xff]  }
 0x2fa   :  { %7261 = vmatpush1.bf16.msra.mxu1 %v9416_v32  ;;  %v3802_v42 = vpop.f32.mrf.mxu0  ;;  %7221 = vmatprep.subr.bf16.mxu0 %v9421_v33  ;;  %v9470_v30 = vld [vmem:[#allocation11 + $0x3a0] ss:$16 sps:$4 sm:$0xff]   ;;  %v9475_v31 = vld [vmem:[#allocation11 + $0x184] ss:$16 sps:$4 sm:$0xff]  }
 0x2fb   :  { %v3843_v51 = vpop.f32.mrf.mxu1  ;;  %7262 = vmatprep.subr.bf16.mxu1 %v9424_v36  ;;  %v9478_v32 = vld [vmem:[#allocation11 + $0x384] ss:$16 sps:$4 sm:$0xff]   ;;  %v9473_v33 = vld [vmem:[#allocation11 + $0x180] ss:$16 sps:$4 sm:$0xff]  }
 0x2fc   :  { %v9476_v49 = vld [vmem:[#allocation11 + $0x380] ss:$16 sps:$4 sm:$0xff]   ;;  %v9481_v34 = vld [vmem:[#allocation11 + $0x164] ss:$16 sps:$4 sm:$0xff]  }
 0x2fd   :  { %7222 = vmatpush1.bf16.msra.mxu0 %v9419_v41  ;;  %v9484_v36 = vld [vmem:[#allocation11 + $0x364] ss:$16 sps:$4 sm:$0xff]   ;;  %v9479_v37 = vld [vmem:[#allocation11 + $0x160] ss:$16 sps:$4 sm:$0xff]  }
 0x2fe   :  { %7263 = vmatpush1.bf16.msra.mxu1 %v9422_v43  ;;  %7223 = vmatprep.subr.bf16.mxu0 %v9427_v45  ;;  %v9482_v44 = vld [vmem:[#allocation11 + $0x360] ss:$16 sps:$4 sm:$0xff]   ;;  %v9487_v41 = vld [vmem:[#allocation11 + $0x144] ss:$16 sps:$4 sm:$0xff]  }
 0x2ff   :  { %7264 = vmatprep.subr.bf16.mxu1 %v9430_v52  ;;  %v9490_v42 = vld [vmem:[#allocation11 + $0x344] ss:$16 sps:$4 sm:$0xff]   ;;  %v9485_v43 = vld [vmem:[#allocation11 + $0x140] ss:$16 sps:$4 sm:$0xff]  }
 0x300   :  { %v9488_v45 = vld [vmem:[#allocation11 + $0x340] ss:$16 sps:$4 sm:$0xff]   ;;  %v9493_v51 = vld [vmem:[#allocation11 + $0x124] ss:$16 sps:$4 sm:$0xff]  }
 0x301   :  { %7224 = vmatpush1.bf16.msra.mxu0 %v9425_v53  ;;  %v9496_v52 = vld [vmem:[#allocation11 + $0x324] ss:$16 sps:$4 sm:$0xff]   ;;  %v9491_v53 = vld [vmem:[#allocation11 + $0x120] ss:$16 sps:$4 sm:$0xff]  }
 0x302   :  { %7265 = vmatpush1.bf16.msra.mxu1 %v9428_v47  ;;  %7225 = vmatprep.subr.bf16.mxu0 %v9433_v55  ;;  %v9494_v47 = vld [vmem:[#allocation11 + $0x320] ss:$16 sps:$4 sm:$0xff]   ;;  %v9499_v55 = vld [vmem:[#allocation11 + $0x104] ss:$16 sps:$4 sm:$0xff]  }
 0x303   :  { %7266 = vmatprep.subr.bf16.mxu1 %v9436_v56  ;;  %v9502_v56 = vld [vmem:[#allocation11 + $0x304] ss:$16 sps:$4 sm:$0xff]  }
 0x305   :  { %7226 = vmatpush1.bf16.msra.mxu0 %v9431_v57  ;;  %v9497_v57 = vld [vmem:[#allocation11 + $0x100] ss:$16 sps:$4 sm:$0xff]  }
 0x306   :  { %7267 = vmatpush1.bf16.msra.mxu1 %v9434_v48  ;;  %7227 = vmatprep.subr.bf16.mxu0 %v9439_v58  ;;  %v4091_v48 = vmax.f32 %v10604_v2, 0.0  ;;  %v9500_v58 = vld [vmem:[#allocation11 + $0x300] ss:$16 sps:$4 sm:$0xff]  }
 0x307   :  { %7268 = vmatprep.subr.bf16.mxu1 %v9442_v60  ;;  %v9505_v60 = vld [vmem:[#allocation11 + $0x4e4] ss:$16 sps:$4 sm:$0xff]   ;;  %v9506_v2 = vld [vmem:[#allocation11 + $0x6e0] ss:$16 sps:$4 sm:$0xff]  }
 0x309   :  { %7228 = vmatpush1.bf16.msra.mxu0 %v9437_v61  ;;  %v4093_v61 = vmax.f32 %v10616_v50, 0.0  ;;  %v9511_v50 = vld [vmem:[#allocation11 + $0x4c4] ss:$16 sps:$4 sm:$0xff]  }
 0x30a   :  { %7269 = vmatpush1.bf16.msra.mxu1 %v9440_v62  ;;  %7229 = vmatprep.subr.bf16.mxu0 %v9445_v63  ;;  %v9508_v62 = vld [vmem:[#allocation11 + $0x6e4] ss:$16 sps:$4 sm:$0xff]   ;;  %v4096_v63 = vmax.f32 %v10635_v46, 0.0 }
 0x30b   :  { %7270 = vmatprep.subr.bf16.mxu1 %v9448_v0  ;;  %v4098_v0 = vmax.f32 %v10649_v54, 0.0  ;;  %v9514_v46 = vld [vmem:[#allocation11 + $0x6c4] ss:$16 sps:$4 sm:$0xff]  }
 0x30d   :  { %7230 = vmatpush1.bf16.msra.mxu0 %v9443_v1  ;;  %v838_v1 = vrot.slane %v10651_v10, %v10561_v19  ;;  %v10684_v54 = vpack.c.bf16 %v4098_v0, %v4098_v0  ;;  %v9551_v0 = vld [vmem:[#allocation11 + $0x5e0] ss:$16 sps:$4 sm:$0xff]  }
 0x30e   :  { %7271 = vmatpush1.bf16.msra.mxu1 %v9446_v5  ;;  %7231 = vmatprep.subr.bf16.mxu0 %v9451_v6  ;;  %v9503_v5 = vld [vmem:[#allocation11 + $0x4e0] ss:$16 sps:$4 sm:$0xff]   ;;  %v10677_v6 = vpack.c.bf16 %v4091_v48, %v4091_v48  ;;  %v9547_v48 = vld [vmem:[#allocation11 + $0x404] ss:$16 sps:$4 sm:$0xff]  }
 0x30f   :  { %7272 = vmatprep.subr.bf16.mxu1 %v9454_v7  ;;  %v10679_v7 = vpack.c.bf16 %v4093_v61, %v4093_v61  ;;  %v9548_v61 = vld [vmem:[#allocation11 + $0x600] ss:$16 sps:$4 sm:$0xff]  }
 0x311   :  { %7232 = vmatpush1.bf16.msra.mxu0 %v9449_v12  ;;  %v10681_v12 = vpack.c.bf16 %v4096_v63, %v4096_v63  ;;  %v9556_v63 = vld [vmem:[#allocation11 + $0x7e4] ss:$16 sps:$4 sm:$0xff]  }
 0x312   :  { %7273 = vmatpush1.bf16.msra.mxu1 %v9452_v13  ;;  %7233 = vmatprep.subr.bf16.mxu0 %v9457_v14 }
 0x313   :  { %7274 = vmatprep.subr.bf16.mxu1 %v9460_v15 }
 0x315   :  { %7234 = vmatpush2.bf16.msra.mxu0 %v9455_v17  ;;  %v9509_v17 = vld [vmem:[#allocation11 + $0x4c0] ss:$16 sps:$4 sm:$0xff]  }
 0x316   :  { %7275 = vmatpush2.bf16.msra.mxu1 %v9458_v22  ;;  %7235 = vmatprep.subr.bf16.mxu0 %v9463_v23  ;;  %v9512_v23 = vld [vmem:[#allocation11 + $0x6c0] ss:$16 sps:$4 sm:$0xff]  }
 0x317   :  { %7276 = vmatprep.subr.bf16.mxu1 %v9466_v24  ;;  %v9517_v24 = vld [vmem:[#allocation11 + $0x4a4] ss:$16 sps:$4 sm:$0xff]  }
 0x319   :  { %7236 = vmatpush2.bf16.msra.mxu0 %v9461_v25 }
 0x31a   :  { %7277 = vmatpush2.bf16.msra.mxu1 %v9464_v27  ;;  %7237 = vmatprep.subr.bf16.mxu0 %v9469_v11  ;;  %v9520_v11 = vld [vmem:[#allocation11 + $0x6a4] ss:$16 sps:$4 sm:$0xff]  }
 0x31b   :  { %7278 = vmatprep.subr.bf16.mxu1 %v9472_v28 }
 0x31d   :  { %7238 = vmatpush2.bf16.msra.mxu0 %v9467_v29 }
 0x31e   :  { %7279 = vmatpush2.bf16.msra.mxu1 %v9470_v30  ;;  %7239 = vmatprep.subr.bf16.mxu0 %v9475_v31  ;;  %v9515_v30 = vld [vmem:[#allocation11 + $0x4a0] ss:$16 sps:$4 sm:$0xff]  }
 0x31f   :  { %7280 = vmatprep.subr.bf16.mxu1 %v9478_v32  ;;  %v9518_v32 = vld [vmem:[#allocation11 + $0x6a0] ss:$16 sps:$4 sm:$0xff]  }
 0x321   :  { %7240 = vmatpush2.bf16.msra.mxu0 %v9473_v33  ;;  %v9523_v33 = vld [vmem:[#allocation11 + $0x484] ss:$16 sps:$4 sm:$0xff]  }
 0x322   :  { %7281 = vmatpush2.bf16.msra.mxu1 %v9476_v49  ;;  %7241 = vmatprep.subr.bf16.mxu0 %v9481_v34  ;;  %v9526_v34 = vld [vmem:[#allocation11 + $0x684] ss:$16 sps:$4 sm:$0xff]  }
 0x323   :  { %7282 = vmatprep.subr.bf16.mxu1 %v9484_v36  ;;  %v9521_v36 = vld [vmem:[#allocation11 + $0x480] ss:$16 sps:$4 sm:$0xff]  }
 0x325   :  { %7242 = vmatpush2.bf16.msra.mxu0 %v9479_v37  ;;  %v9524_v37 = vld [vmem:[#allocation11 + $0x680] ss:$16 sps:$4 sm:$0xff]  }
 0x326   :  { %7283 = vmatpush2.bf16.msra.mxu1 %v9482_v44  ;;  %7243 = vmatprep.subr.bf16.mxu0 %v9487_v41  ;;  %v9529_v44 = vld [vmem:[#allocation11 + $0x464] ss:$16 sps:$4 sm:$0xff]  }
 0x327   :  { %7284 = vmatprep.subr.bf16.mxu1 %v9490_v42  ;;  %v9532_v41 = vld [vmem:[#allocation11 + $0x664] ss:$16 sps:$4 sm:$0xff]   ;;  %v9527_v42 = vld [vmem:[#allocation11 + $0x460] ss:$16 sps:$4 sm:$0xff]  }
 0x329   :  { %7244 = vmatpush2.bf16.msra.mxu0 %v9485_v43  ;;  %v9530_v43 = vld [vmem:[#allocation11 + $0x660] ss:$16 sps:$4 sm:$0xff]  }
 0x32a   :  { %7285 = vmatpush2.bf16.msra.mxu1 %v9488_v45  ;;  %7245 = vmatprep.subr.bf16.mxu0 %v9493_v51  ;;  %v9535_v45 = vld [vmem:[#allocation11 + $0x444] ss:$16 sps:$4 sm:$0xff]  }
 0x32b   :  { %7286 = vmatprep.subr.bf16.mxu1 %v9496_v52  ;;  %v9538_v51 = vld [vmem:[#allocation11 + $0x644] ss:$16 sps:$4 sm:$0xff]   ;;  %v9533_v52 = vld [vmem:[#allocation11 + $0x440] ss:$16 sps:$4 sm:$0xff]  }
 0x32d   :  { %7246 = vmatpush2.bf16.msra.mxu0 %v9491_v53  ;;  %v9536_v53 = vld [vmem:[#allocation11 + $0x640] ss:$16 sps:$4 sm:$0xff]  }
 0x32e   :  { %7287 = vmatpush2.bf16.msra.mxu1 %v9494_v47  ;;  %7247 = vmatprep.subr.bf16.mxu0 %v9499_v55  ;;  %v9541_v47 = vld [vmem:[#allocation11 + $0x424] ss:$16 sps:$4 sm:$0xff]  }
 0x32f   :  { %7288 = vmatprep.subr.bf16.mxu1 %v9502_v56  ;;  %v9544_v55 = vld [vmem:[#allocation11 + $0x624] ss:$16 sps:$4 sm:$0xff]   ;;  %v9539_v56 = vld [vmem:[#allocation11 + $0x420] ss:$16 sps:$4 sm:$0xff]  }
 0x331   :  { %7248 = vmatpush2.bf16.msra.mxu0 %v9497_v57  ;;  %v9542_v57 = vld [vmem:[#allocation11 + $0x620] ss:$16 sps:$4 sm:$0xff]  }
 0x332   :  { %7289 = vmatpush2.bf16.msra.mxu1 %v9500_v58  ;;  %7299 = vmatprep.subr.bf16.mxu0 %v9505_v60  ;;  %v9550_v58 = vld [vmem:[#allocation11 + $0x604] ss:$16 sps:$4 sm:$0xff]   ;;  %v9545_v60 = vld [vmem:[#allocation11 + $0x400] ss:$16 sps:$4 sm:$0xff]  }
 0x333   :  { %7340 = vmatprep.subr.bf16.mxu1 %v9508_v62  ;;  %v9553_v62 = vld [vmem:[#allocation11 + $0x5e4] ss:$16 sps:$4 sm:$0xff]  }
 0x334   :  { %v3879_v13 = vpop.f32.mrf.mxu0  ;;  %7250 = vmatmul.mubr.bf16.vlgmr.msra.gmra.mxu0 %v10677_v6 }
 0x335   :  { %v3880_v14 = vadd.f32 %v3879_v13, %v838_v1  ;;  %v3920_v15 = vpop.f32.mrf.mxu1  ;;  %7291 = vmatmul.mubr.bf16.vlgmr.msra.gmra.mxu1 %v10679_v7  ;;  %7300 = vmatpush1.bf16.msra.mxu0 %v9503_v5  ;;  %v9554_v1 = vld [vmem:[#allocation11 + $0x7e0] ss:$16 sps:$4 sm:$0xff]   ;;  %v9559_v5 = vld [vmem:[#allocation11 + $0x5c4] ss:$16 sps:$4 sm:$0xff]  }
 0x336   :  { %7331 = vmatprep.mubr.bf16.mxu0 %v10681_v12  ;;  %7341 = vmatpush1.bf16.msra.mxu1 %v9506_v2  ;;  %v10688_v22 = vpop.f32.mrf.mxu0  ;;  %v9562_v2 = vld [vmem:[#allocation11 + $0x7c4] ss:$16 sps:$4 sm:$0xff]   ;;  %v9560_v13 = vld [vmem:[#allocation11 + $0x7c0] ss:$16 sps:$4 sm:$0xff]  }
 0x337   :  { %v10690_v25 = vadd.f32 %v3920_v15, %v3880_v14  ;;  %7372 = vmatprep.mubr.bf16.mxu1 %v10684_v54  ;;  %v10693_v27 = vpop.f32.mrf.mxu1  ;;  %7301 = vmatprep.subr.bf16.mxu0 %v9511_v50  ;;  %v9557_v50 = vld [vmem:[#allocation11 + $0x5c0] ss:$16 sps:$4 sm:$0xff]   ;;  %v9568_v14 = vld [vmem:[#allocation11 + $0x7a4] ss:$16 sps:$4 sm:$0xff]  }
 0x338   :  { %v3883_v28 = vpop.f32.mrf.mxu0  ;;  %7342 = vmatprep.subr.bf16.mxu1 %v9514_v46  ;;  %v9565_v46 = vld [vmem:[#allocation11 + $0x5a4] ss:$16 sps:$4 sm:$0xff]   ;;  %v9563_v15 = vld [vmem:[#allocation11 + $0x5a0] ss:$16 sps:$4 sm:$0xff]  }
 0x339   :  { %v3924_v29 = vpop.f32.mrf.mxu1  ;;  %7302 = vmatpush1.bf16.msra.mxu0 %v9509_v17  ;;  %v9566_v17 = vld [vmem:[#allocation11 + $0x7a0] ss:$16 sps:$4 sm:$0xff]  }
 0x33a   :  { %7343 = vmatpush1.bf16.msra.mxu1 %v9512_v23  ;;  %v3884_v31 = vpop.f32.mrf.mxu0  ;;  %7303 = vmatprep.subr.bf16.mxu0 %v9517_v24  ;;  %v9571_v23 = vld [vmem:[#allocation11 + $0x584] ss:$16 sps:$4 sm:$0xff]   ;;  %v9572_v28 = vld [vmem:[#allocation11 + $0x780] ss:$16 sps:$4 sm:$0xff]  }
 0x33b   :  { %v3925_v49 = vpop.f32.mrf.mxu1  ;;  %7344 = vmatprep.subr.bf16.mxu1 %v9520_v11  ;;  %v9574_v24 = vld [vmem:[#allocation11 + $0x784] ss:$16 sps:$4 sm:$0xff]   ;;  %v9569_v11 = vld [vmem:[#allocation11 + $0x580] ss:$16 sps:$4 sm:$0xff]  }
 0x33c   :  { %v9577_v29 = vld [vmem:[#allocation11 + $0x564] ss:$16 sps:$4 sm:$0xff]   ;;  %v9575_v31 = vld [vmem:[#allocation11 + $0x560] ss:$16 sps:$4 sm:$0xff]  }
 0x33d   :  { %7304 = vmatpush1.bf16.msra.mxu0 %v9515_v30  ;;  %v9580_v30 = vld [vmem:[#allocation11 + $0x764] ss:$16 sps:$4 sm:$0xff]  }
 0x33e   :  { %7345 = vmatpush1.bf16.msra.mxu1 %v9518_v32  ;;  %7305 = vmatprep.subr.bf16.mxu0 %v9523_v33  ;;  %v9578_v32 = vld [vmem:[#allocation11 + $0x760] ss:$16 sps:$4 sm:$0xff]   ;;  %v9583_v33 = vld [vmem:[#allocation11 + $0x544] ss:$16 sps:$4 sm:$0xff]  }
 0x33f   :  { %7346 = vmatprep.subr.bf16.mxu1 %v9526_v34  ;;  %v9586_v49 = vld [vmem:[#allocation11 + $0x744] ss:$16 sps:$4 sm:$0xff]   ;;  %v842_v34 = vrot.slane %v10651_v10, %v10567_v21 }
 0x341   :  { %7306 = vmatpush1.bf16.msra.mxu0 %v9521_v36  ;;  %v9581_v36 = vld [vmem:[#allocation11 + $0x540] ss:$16 sps:$4 sm:$0xff]  }
 0x342   :  { %7347 = vmatpush1.bf16.msra.mxu1 %v9524_v37  ;;  %7307 = vmatprep.subr.bf16.mxu0 %v9529_v44  ;;  %v9584_v37 = vld [vmem:[#allocation11 + $0x740] ss:$16 sps:$4 sm:$0xff]   ;;  %v9589_v44 = vld [vmem:[#allocation11 + $0x524] ss:$16 sps:$4 sm:$0xff]  }
 0x343   :  { %7348 = vmatprep.subr.bf16.mxu1 %v9532_v41  ;;  %v9592_v41 = vld [vmem:[#allocation11 + $0x724] ss:$16 sps:$4 sm:$0xff]  }
 0x345   :  { %7308 = vmatpush1.bf16.msra.mxu0 %v9527_v42  ;;  %v3882_v42 = vadd.f32 %v10688_v22, %v842_v34  ;;  %v4097_v22 = vmax.f32 %v10646_v39, 0.0  ;;  %v9607_v39 = vld [vmem:[#allocation11 + $0x8c4] ss:$16 sps:$4 sm:$0xff]   ;;  %v9620_v34 = vld [vmem:[#allocation11 + $0xa80] ss:$16 sps:$4 sm:$0xff]  }
 0x346   :  { %7349 = vmatpush1.bf16.msra.mxu1 %v9530_v43  ;;  %7309 = vmatprep.subr.bf16.mxu0 %v9535_v45  ;;  %v9587_v43 = vld [vmem:[#allocation11 + $0x520] ss:$16 sps:$4 sm:$0xff]  }
 0x347   :  { %7350 = vmatprep.subr.bf16.mxu1 %v9538_v51  ;;  %v9590_v45 = vld [vmem:[#allocation11 + $0x720] ss:$16 sps:$4 sm:$0xff]   ;;  %v9595_v51 = vld [vmem:[#allocation11 + $0x504] ss:$16 sps:$4 sm:$0xff]  }
 0x349   :  { %7310 = vmatpush1.bf16.msra.mxu0 %v9533_v52  ;;  %v9598_v52 = vld [vmem:[#allocation11 + $0x704] ss:$16 sps:$4 sm:$0xff]  }
 0x34a   :  { %7351 = vmatpush1.bf16.msra.mxu1 %v9536_v53  ;;  %7311 = vmatprep.subr.bf16.mxu0 %v9541_v47  ;;  %v3923_v53 = vadd.f32 %v10693_v27, %v3882_v42  ;;  %v9593_v47 = vld [vmem:[#allocation11 + $0x500] ss:$16 sps:$4 sm:$0xff]   ;;  %v846_v27 = vrot.slane %v10651_v10, %v813_v4  ;;  %v9631_v42 = vld [vmem:[#allocation11 + $0x844] ss:$16 sps:$4 sm:$0xff]  }
 0x34b   :  { %7352 = vmatprep.subr.bf16.mxu1 %v9544_v55  ;;  %v4095_v55 = vmax.f32 %v10632_v35, 0.0  ;;  %v9602_v35 = vld [vmem:[#allocation11 + $0xae0] ss:$16 sps:$4 sm:$0xff]  }
 0x34d   :  { %7312 = vmatpush1.bf16.msra.mxu0 %v9539_v56  ;;  %v9596_v56 = vld [vmem:[#allocation11 + $0x700] ss:$16 sps:$4 sm:$0xff]  }
 0x34e   :  { %7353 = vmatpush1.bf16.msra.mxu1 %v9542_v57  ;;  %7313 = vmatprep.subr.bf16.mxu0 %v9547_v48  ;;  %v9601_v57 = vld [vmem:[#allocation11 + $0x8e4] ss:$16 sps:$4 sm:$0xff]  }
 0x34f   :  { %7354 = vmatprep.subr.bf16.mxu1 %v9550_v58  ;;  %v9604_v48 = vld [vmem:[#allocation11 + $0xae4] ss:$16 sps:$4 sm:$0xff]   ;;  %v4100_v58 = vmax.f32 %v10669_v40, 0.0 }
 0x350   :  { %v9610_v40 = vld [vmem:[#allocation11 + $0xac4] ss:$16 sps:$4 sm:$0xff]  }
 0x351   :  { %7314 = vmatpush1.bf16.msra.mxu0 %v9545_v60  ;;  %v4102_v60 = vmax.f32 %v3923_v53, 0.0  ;;  %v9640_v53 = vld [vmem:[#allocation11 + $0xa24] ss:$16 sps:$4 sm:$0xff]  }
 0x352   :  { %7355 = vmatpush1.bf16.msra.mxu1 %v9548_v61  ;;  %7315 = vmatprep.subr.bf16.mxu0 %v9553_v62  ;;  %v9599_v61 = vld [vmem:[#allocation11 + $0x8e0] ss:$16 sps:$4 sm:$0xff]   ;;  %v10705_v62 = vpack.c.bf16 %v4095_v55, %v4095_v55 }
 0x353   :  { %7356 = vmatprep.subr.bf16.mxu1 %v9556_v63  ;;  %v10707_v63 = vpack.c.bf16 %v4097_v22, %v4097_v22  ;;  %v9638_v55 = vld [vmem:[#allocation11 + $0xa20] ss:$16 sps:$4 sm:$0xff]  }
 0x354   :  { %v9641_v22 = vld [vmem:[#allocation11 + $0x800] ss:$16 sps:$4 sm:$0xff]  }
 0x355   :  { %7316 = vmatpush2.bf16.msra.mxu0 %v9551_v0  ;;  %v10709_v0 = vpack.c.bf16 %v4100_v58, %v4100_v58  ;;  %v9649_v58 = vld [vmem:[#allocation11 + $0x9e4] ss:$16 sps:$4 sm:$0xff]  }
 0x356   :  { %7357 = vmatpush2.bf16.msra.mxu1 %v9554_v1  ;;  %7317 = vmatprep.subr.bf16.mxu0 %v9559_v5  ;;  %v10712_v5 = vpack.c.bf16 %v4102_v60, %v4102_v60  ;;  %v9652_v60 = vld [vmem:[#allocation11 + $0xbe4] ss:$16 sps:$4 sm:$0xff]  }
 0x357   :  { %7358 = vmatprep.subr.bf16.mxu1 %v9562_v2 }
 0x359   :  { %7318 = vmatpush2.bf16.msra.mxu0 %v9557_v50  ;;  %v9605_v50 = vld [vmem:[#allocation11 + $0x8c0] ss:$16 sps:$4 sm:$0xff]  }
 0x35a   :  { %7359 = vmatpush2.bf16.msra.mxu1 %v9560_v13  ;;  %7319 = vmatprep.subr.bf16.mxu0 %v9565_v46  ;;  %v9608_v46 = vld [vmem:[#allocation11 + $0xac0] ss:$16 sps:$4 sm:$0xff]  }
 0x35b   :  { %7360 = vmatprep.subr.bf16.mxu1 %v9568_v14  ;;  %v9613_v14 = vld [vmem:[#allocation11 + $0x8a4] ss:$16 sps:$4 sm:$0xff]  }
 0x35d   :  { %7320 = vmatpush2.bf16.msra.mxu0 %v9563_v15 }
 0x35e   :  { %7361 = vmatpush2.bf16.msra.mxu1 %v9566_v17  ;;  %7321 = vmatprep.subr.bf16.mxu0 %v9571_v23  ;;  %v9616_v23 = vld [vmem:[#allocation11 + $0xaa4] ss:$16 sps:$4 sm:$0xff]  }
 0x35f   :  { %7362 = vmatprep.subr.bf16.mxu1 %v9574_v24 }
 0x361   :  { %7322 = vmatpush2.bf16.msra.mxu0 %v9569_v11 }
 0x362   :  { %7363 = vmatpush2.bf16.msra.mxu1 %v9572_v28  ;;  %7323 = vmatprep.subr.bf16.mxu0 %v9577_v29  ;;  %v9611_v28 = vld [vmem:[#allocation11 + $0x8a0] ss:$16 sps:$4 sm:$0xff]  }
 0x363   :  { %7364 = vmatprep.subr.bf16.mxu1 %v9580_v30  ;;  %v9614_v30 = vld [vmem:[#allocation11 + $0xaa0] ss:$16 sps:$4 sm:$0xff]  }
 0x365   :  { %7324 = vmatpush2.bf16.msra.mxu0 %v9575_v31  ;;  %v9619_v31 = vld [vmem:[#allocation11 + $0x884] ss:$16 sps:$4 sm:$0xff]  }
 0x366   :  { %7365 = vmatpush2.bf16.msra.mxu1 %v9578_v32  ;;  %7325 = vmatprep.subr.bf16.mxu0 %v9583_v33  ;;  %v9622_v33 = vld [vmem:[#allocation11 + $0xa84] ss:$16 sps:$4 sm:$0xff]  }
 0x367   :  { %7366 = vmatprep.subr.bf16.mxu1 %v9586_v49  ;;  %v9617_v49 = vld [vmem:[#allocation11 + $0x880] ss:$16 sps:$4 sm:$0xff]  }
 0x369   :  { %7326 = vmatpush2.bf16.msra.mxu0 %v9581_v36  ;;  %v9625_v36 = vld [vmem:[#allocation11 + $0x864] ss:$16 sps:$4 sm:$0xff]  }
 0x36a   :  { %7367 = vmatpush2.bf16.msra.mxu1 %v9584_v37  ;;  %7327 = vmatprep.subr.bf16.mxu0 %v9589_v44  ;;  %v9628_v37 = vld [vmem:[#allocation11 + $0xa64] ss:$16 sps:$4 sm:$0xff]   ;;  %v9623_v44 = vld [vmem:[#allocation11 + $0x860] ss:$16 sps:$4 sm:$0xff]  }
 0x36b   :  { %7368 = vmatprep.subr.bf16.mxu1 %v9592_v41  ;;  %v9626_v41 = vld [vmem:[#allocation11 + $0xa60] ss:$16 sps:$4 sm:$0xff]  }
 0x36d   :  { %7328 = vmatpush2.bf16.msra.mxu0 %v9587_v43  ;;  %v9634_v43 = vld [vmem:[#allocation11 + $0xa44] ss:$16 sps:$4 sm:$0xff]  }
 0x36e   :  { %7369 = vmatpush2.bf16.msra.mxu1 %v9590_v45  ;;  %7329 = vmatprep.subr.bf16.mxu0 %v9595_v51  ;;  %v9629_v45 = vld [vmem:[#allocation11 + $0x840] ss:$16 sps:$4 sm:$0xff]  }
 0x36f   :  { %7370 = vmatprep.subr.bf16.mxu1 %v9598_v52  ;;  %v9632_v51 = vld [vmem:[#allocation11 + $0xa40] ss:$16 sps:$4 sm:$0xff]   ;;  %v9637_v52 = vld [vmem:[#allocation11 + $0x824] ss:$16 sps:$4 sm:$0xff]  }
 0x371   :  { %7330 = vmatpush2.bf16.msra.mxu0 %v9593_v47  ;;  %v9635_v47 = vld [vmem:[#allocation11 + $0x820] ss:$16 sps:$4 sm:$0xff]  }
 0x372   :  { %7371 = vmatpush2.bf16.msra.mxu1 %v9596_v56  ;;  %7381 = vmatprep.subr.bf16.mxu0 %v9601_v57  ;;  %v9643_v56 = vld [vmem:[#allocation11 + $0x804] ss:$16 sps:$4 sm:$0xff]  }
 0x373   :  { %7422 = vmatprep.subr.bf16.mxu1 %v9604_v48  ;;  %v9646_v57 = vld [vmem:[#allocation11 + $0xa04] ss:$16 sps:$4 sm:$0xff]   ;;  %v9644_v48 = vld [vmem:[#allocation11 + $0xa00] ss:$16 sps:$4 sm:$0xff]  }
 0x374   :  { %v3961_v1 = vpop.f32.mrf.mxu0  ;;  %7332 = vmatmul.mubr.bf16.vlgmr.msra.gmra.mxu0 %v10705_v62 }
 0x375   :  { %v3962_v2 = vadd.f32 %v3961_v1, %v846_v27  ;;  %v4002_v4 = vpop.f32.mrf.mxu1  ;;  %7373 = vmatmul.mubr.bf16.vlgmr.msra.gmra.mxu1 %v10707_v63  ;;  %7382 = vmatpush1.bf16.msra.mxu0 %v9599_v61  ;;  %v9647_v27 = vld [vmem:[#allocation11 + $0x9e0] ss:$16 sps:$4 sm:$0xff]  }
 0x376   :  { %7413 = vmatprep.mubr.bf16.mxu0 %v10709_v0  ;;  %7423 = vmatpush1.bf16.msra.mxu1 %v9602_v35  ;;  %v10716_v13 = vpop.f32.mrf.mxu0  ;;  %v9650_v61 = vld [vmem:[#allocation11 + $0xbe0] ss:$16 sps:$4 sm:$0xff]   ;;  %v9655_v35 = vld [vmem:[#allocation11 + $0x9c4] ss:$16 sps:$4 sm:$0xff]  }
 0x377   :  { %v10718_v15 = vadd.f32 %v4002_v4, %v3962_v2  ;;  %7454 = vmatprep.mubr.bf16.mxu1 %v10712_v5  ;;  %v10721_v17 = vpop.f32.mrf.mxu1  ;;  %7383 = vmatprep.subr.bf16.mxu0 %v9607_v39  ;;  %v9658_v39 = vld [vmem:[#allocation11 + $0xbc4] ss:$16 sps:$4 sm:$0xff]   ;;  %v9653_v1 = vld [vmem:[#allocation11 + $0x9c0] ss:$16 sps:$4 sm:$0xff]  }
 0x378   :  { %v3965_v24 = vpop.f32.mrf.mxu0  ;;  %7424 = vmatprep.subr.bf16.mxu1 %v9610_v40  ;;  %v9656_v40 = vld [vmem:[#allocation11 + $0xbc0] ss:$16 sps:$4 sm:$0xff]   ;;  %v9661_v2 = vld [vmem:[#allocation11 + $0x9a4] ss:$16 sps:$4 sm:$0xff]  }
 0x379   :  { %v4006_v11 = vpop.f32.mrf.mxu1  ;;  %7384 = vmatpush1.bf16.msra.mxu0 %v9605_v50  ;;  %v9664_v4 = vld [vmem:[#allocation11 + $0xba4] ss:$16 sps:$4 sm:$0xff]   ;;  %v9659_v50 = vld [vmem:[#allocation11 + $0x9a0] ss:$16 sps:$4 sm:$0xff]  }
 0x37a   :  { %7425 = vmatpush1.bf16.msra.mxu1 %v9608_v46  ;;  %v3966_v29 = vpop.f32.mrf.mxu0  ;;  %7385 = vmatprep.subr.bf16.mxu0 %v9613_v14  ;;  %v9662_v46 = vld [vmem:[#allocation11 + $0xba0] ss:$16 sps:$4 sm:$0xff]   ;;  %v9667_v14 = vld [vmem:[#allocation11 + $0x984] ss:$16 sps:$4 sm:$0xff]  }
 0x37b   :  { %v4007_v32 = vpop.f32.mrf.mxu1  ;;  %7426 = vmatprep.subr.bf16.mxu1 %v9616_v23  ;;  %v9670_v23 = vld [vmem:[#allocation11 + $0xb84] ss:$16 sps:$4 sm:$0xff]   ;;  %v9665_v24 = vld [vmem:[#allocation11 + $0x980] ss:$16 sps:$4 sm:$0xff]  }
 0x37c   :  { %v9668_v11 = vld [vmem:[#allocation11 + $0xb80] ss:$16 sps:$4 sm:$0xff]   ;;  %v9676_v29 = vld [vmem:[#allocation11 + $0xb64] ss:$16 sps:$4 sm:$0xff]  }
 0x37d   :  { %7386 = vmatpush1.bf16.msra.mxu0 %v9611_v28  ;;  %v9673_v28 = vld [vmem:[#allocation11 + $0x964] ss:$16 sps:$4 sm:$0xff]  }
 0x37e   :  { %7427 = vmatpush1.bf16.msra.mxu1 %v9614_v30  ;;  %7387 = vmatprep.subr.bf16.mxu0 %v9619_v31  ;;  %v9671_v30 = vld [vmem:[#allocation11 + $0x960] ss:$16 sps:$4 sm:$0xff]   ;;  %v9679_v32 = vld [vmem:[#allocation11 + $0x944] ss:$16 sps:$4 sm:$0xff]  }
 0x37f   :  { %7428 = vmatprep.subr.bf16.mxu1 %v9622_v33  ;;  %v9674_v31 = vld [vmem:[#allocation11 + $0xb60] ss:$16 sps:$4 sm:$0xff]   ;;  %v9682_v33 = vld [vmem:[#allocation11 + $0xb44] ss:$16 sps:$4 sm:$0xff]  }
 0x381   :  { %7388 = vmatpush1.bf16.msra.mxu0 %v9617_v49  ;;  %v850_v49 = vrot.slane %v10651_v10, %v817_v8 }
 0x382   :  { %7429 = vmatpush1.bf16.msra.mxu1 %v9620_v34  ;;  %7389 = vmatprep.subr.bf16.mxu0 %v9625_v36  ;;  %v9677_v34 = vld [vmem:[#allocation11 + $0x940] ss:$16 sps:$4 sm:$0xff]  }
 0x383   :  { %7430 = vmatprep.subr.bf16.mxu1 %v9628_v37  ;;  %v9680_v36 = vld [vmem:[#allocation11 + $0xb40] ss:$16 sps:$4 sm:$0xff]   ;;  %v9685_v37 = vld [vmem:[#allocation11 + $0x924] ss:$16 sps:$4 sm:$0xff]  }
 0x385   :  { %7390 = vmatpush1.bf16.msra.mxu0 %v9623_v44  ;;  %v9688_v44 = vld [vmem:[#allocation11 + $0xb24] ss:$16 sps:$4 sm:$0xff]  }
 0x386   :  { %7431 = vmatpush1.bf16.msra.mxu1 %v9626_v41  ;;  %7391 = vmatprep.subr.bf16.mxu0 %v9631_v42  ;;  %v3964_v41 = vadd.f32 %v10716_v13, %v850_v49  ;;  %v9683_v42 = vld [vmem:[#allocation11 + $0x920] ss:$16 sps:$4 sm:$0xff]   ;;  %v4101_v13 = vmax.f32 %v10690_v25, 0.0 }
 0x387   :  { %7432 = vmatprep.subr.bf16.mxu1 %v9634_v43  ;;  %v9686_v43 = vld [vmem:[#allocation11 + $0xb20] ss:$16 sps:$4 sm:$0xff]  }
 0x388   :  { %v4005_v8 = vadd.f32 %v10721_v17, %v3964_v41  ;;  %v9698_v17 = vld [vmem:[#allocation11 + $0xee0] ss:$16 sps:$4 sm:$0xff]   ;;  %v9727_v41 = vld [vmem:[#allocation11 + $0xc44] ss:$16 sps:$4 sm:$0xff]  }
 0x389   :  { %7392 = vmatpush1.bf16.msra.mxu0 %v9629_v45  ;;  %v9691_v45 = vld [vmem:[#allocation11 + $0x904] ss:$16 sps:$4 sm:$0xff]   ;;  %v9716_v49 = vld [vmem:[#allocation11 + $0xe80] ss:$16 sps:$4 sm:$0xff]  }
 0x38a   :  { %7433 = vmatpush1.bf16.msra.mxu1 %v9632_v51  ;;  %7393 = vmatprep.subr.bf16.mxu0 %v9637_v52  ;;  %v9694_v51 = vld [vmem:[#allocation11 + $0xb04] ss:$16 sps:$4 sm:$0xff]   ;;  %v9689_v52 = vld [vmem:[#allocation11 + $0x900] ss:$16 sps:$4 sm:$0xff]  }
 0x38b   :  { %7434 = vmatprep.subr.bf16.mxu1 %v9640_v53  ;;  %v4099_v53 = vmax.f32 %v10666_v38, 0.0  ;;  %v858_v38 = vrot.slane %v10651_v10, %v825_v9  ;;  %v9709_v9 = vld [vmem:[#allocation11 + $0xca4] ss:$16 sps:$4 sm:$0xff]  }
 0x38d   :  { %7394 = vmatpush1.bf16.msra.mxu0 %v9635_v47  ;;  %v9692_v47 = vld [vmem:[#allocation11 + $0xb00] ss:$16 sps:$4 sm:$0xff]  }
 0x38e   :  { %7435 = vmatpush1.bf16.msra.mxu1 %v9638_v55  ;;  %7395 = vmatprep.subr.bf16.mxu0 %v9643_v56  ;;  %v9697_v55 = vld [vmem:[#allocation11 + $0xce4] ss:$16 sps:$4 sm:$0xff]  }
 0x38f   :  { %7436 = vmatprep.subr.bf16.mxu1 %v9646_v57  ;;  %v9700_v56 = vld [vmem:[#allocation11 + $0xee4] ss:$16 sps:$4 sm:$0xff]   ;;  %v4104_v57 = vmax.f32 %v4005_v8, 0.0 }
 0x390   :  { %v9736_v8 = vld [vmem:[#allocation11 + $0xe24] ss:$16 sps:$4 sm:$0xff]  }
 0x391   :  { %7396 = vmatpush1.bf16.msra.mxu0 %v9641_v22  ;;  %v9695_v22 = vld [vmem:[#allocation11 + $0xce0] ss:$16 sps:$4 sm:$0xff]   ;;  %v10737_v25 = vpack.c.bf16 %v4104_v57, %v4104_v57  ;;  %v9745_v57 = vld [vmem:[#allocation11 + $0xde4] ss:$16 sps:$4 sm:$0xff]  }
 0x392   :  { %7437 = vmatpush1.bf16.msra.mxu1 %v9644_v48  ;;  %7397 = vmatprep.subr.bf16.mxu0 %v9649_v58  ;;  %v10730_v48 = vpack.c.bf16 %v4099_v53, %v4099_v53  ;;  %v10732_v58 = vpack.c.bf16 %v4101_v13, %v4101_v13  ;;  %v9734_v53 = vld [vmem:[#allocation11 + $0xe20] ss:$16 sps:$4 sm:$0xff]  }
 0x393   :  { %7438 = vmatprep.subr.bf16.mxu1 %v9652_v60  ;;  %v9703_v60 = vld [vmem:[#allocation11 + $0xcc4] ss:$16 sps:$4 sm:$0xff]   ;;  %v9737_v13 = vld [vmem:[#allocation11 + $0xc00] ss:$16 sps:$4 sm:$0xff]  }
 0x395   :  { %7398 = vmatpush2.bf16.msra.mxu0 %v9647_v27  ;;  %v9706_v27 = vld [vmem:[#allocation11 + $0xec4] ss:$16 sps:$4 sm:$0xff]  }
 0x396   :  { %7439 = vmatpush2.bf16.msra.mxu1 %v9650_v61  ;;  %7399 = vmatprep.subr.bf16.mxu0 %v9655_v35 }
 0x397   :  { %7440 = vmatprep.subr.bf16.mxu1 %v9658_v39  ;;  %v9701_v39 = vld [vmem:[#allocation11 + $0xcc0] ss:$16 sps:$4 sm:$0xff]  }
 0x399   :  { %7400 = vmatpush2.bf16.msra.mxu0 %v9653_v1 }
 0x39a   :  { %7441 = vmatpush2.bf16.msra.mxu1 %v9656_v40  ;;  %7401 = vmatprep.subr.bf16.mxu0 %v9661_v2  ;;  %v9704_v40 = vld [vmem:[#allocation11 + $0xec0] ss:$16 sps:$4 sm:$0xff]  }
 0x39b   :  { %7442 = vmatprep.subr.bf16.mxu1 %v9664_v4  ;;  %v9712_v4 = vld [vmem:[#allocation11 + $0xea4] ss:$16 sps:$4 sm:$0xff]  }
 0x39d   :  { %7402 = vmatpush2.bf16.msra.mxu0 %v9659_v50 }
 0x39e   :  { %7443 = vmatpush2.bf16.msra.mxu1 %v9662_v46  ;;  %7403 = vmatprep.subr.bf16.mxu0 %v9667_v14 }
 0x39f   :  { %7444 = vmatprep.subr.bf16.mxu1 %v9670_v23  ;;  %v9707_v23 = vld [vmem:[#allocation11 + $0xca0] ss:$16 sps:$4 sm:$0xff]  }
 0x3a1   :  { %7404 = vmatpush2.bf16.msra.mxu0 %v9665_v24 }
 0x3a2   :  { %7445 = vmatpush2.bf16.msra.mxu1 %v9668_v11  ;;  %7405 = vmatprep.subr.bf16.mxu0 %v9673_v28  ;;  %v9710_v11 = vld [vmem:[#allocation11 + $0xea0] ss:$16 sps:$4 sm:$0xff]   ;;  %v9715_v28 = vld [vmem:[#allocation11 + $0xc84] ss:$16 sps:$4 sm:$0xff]  }
 0x3a3   :  { %7446 = vmatprep.subr.bf16.mxu1 %v9676_v29 }
 0x3a5   :  { %7406 = vmatpush2.bf16.msra.mxu0 %v9671_v30 }
 0x3a6   :  { %7447 = vmatpush2.bf16.msra.mxu1 %v9674_v31  ;;  %7407 = vmatprep.subr.bf16.mxu0 %v9679_v32  ;;  %v9718_v31 = vld [vmem:[#allocation11 + $0xe84] ss:$16 sps:$4 sm:$0xff]  }
 0x3a7   :  { %7448 = vmatprep.subr.bf16.mxu1 %v9682_v33  ;;  %v9713_v33 = vld [vmem:[#allocation11 + $0xc80] ss:$16 sps:$4 sm:$0xff]  }
 0x3a9   :  { %7408 = vmatpush2.bf16.msra.mxu0 %v9677_v34  ;;  %v9721_v34 = vld [vmem:[#allocation11 + $0xc64] ss:$16 sps:$4 sm:$0xff]  }
 0x3aa   :  { %7449 = vmatpush2.bf16.msra.mxu1 %v9680_v36  ;;  %7409 = vmatprep.subr.bf16.mxu0 %v9685_v37  ;;  %v9724_v36 = vld [vmem:[#allocation11 + $0xe64] ss:$16 sps:$4 sm:$0xff]   ;;  %v9719_v37 = vld [vmem:[#allocation11 + $0xc60] ss:$16 sps:$4 sm:$0xff]  }
 0x3ab   :  { %7450 = vmatprep.subr.bf16.mxu1 %v9688_v44  ;;  %v9722_v44 = vld [vmem:[#allocation11 + $0xe60] ss:$16 sps:$4 sm:$0xff]  }
 0x3ad   :  { %7410 = vmatpush2.bf16.msra.mxu0 %v9683_v42  ;;  %v9730_v42 = vld [vmem:[#allocation11 + $0xe44] ss:$16 sps:$4 sm:$0xff]  }
 0x3ae   :  { %7451 = vmatpush2.bf16.msra.mxu1 %v9686_v43  ;;  %7411 = vmatprep.subr.bf16.mxu0 %v9691_v45  ;;  %v9725_v43 = vld [vmem:[#allocation11 + $0xc40] ss:$16 sps:$4 sm:$0xff]  }
 0x3af   :  { %7452 = vmatprep.subr.bf16.mxu1 %v9694_v51  ;;  %v9728_v45 = vld [vmem:[#allocation11 + $0xe40] ss:$16 sps:$4 sm:$0xff]   ;;  %v9733_v51 = vld [vmem:[#allocation11 + $0xc24] ss:$16 sps:$4 sm:$0xff]  }
 0x3b1   :  { %7412 = vmatpush2.bf16.msra.mxu0 %v9689_v52  ;;  %v9731_v52 = vld [vmem:[#allocation11 + $0xc20] ss:$16 sps:$4 sm:$0xff]  }
 0x3b2   :  { %7453 = vmatpush2.bf16.msra.mxu1 %v9692_v47  ;;  %7463 = vmatprep.subr.bf16.mxu0 %v9697_v55  ;;  %v9739_v47 = vld [vmem:[#allocation11 + $0xc04] ss:$16 sps:$4 sm:$0xff]  }
 0x3b3   :  { %7504 = vmatprep.subr.bf16.mxu1 %v9700_v56  ;;  %v9742_v55 = vld [vmem:[#allocation11 + $0xe04] ss:$16 sps:$4 sm:$0xff]   ;;  %v9740_v56 = vld [vmem:[#allocation11 + $0xe00] ss:$16 sps:$4 sm:$0xff]  }
 0x3b4   :  { %v10739_v61 = vpop.f32.mrf.mxu0  ;;  %7414 = vmatmul.mubr.bf16.vlgmr.msra.gmra.mxu0 %v10730_v48 }
 0x3b5   :  { %v10742_v35 = vpop.f32.mrf.mxu1  ;;  %7455 = vmatmul.mubr.bf16.vlgmr.msra.gmra.mxu1 %v10732_v58  ;;  %7464 = vmatpush1.bf16.msra.mxu0 %v9695_v22  ;;  %v9748_v22 = vld [vmem:[#allocation11 + $0xfe4] ss:$16 sps:$4 sm:$0xff]  }
 0x3b6   :  { %7495 = vmatprep.mubr.bf16.mxu0 %v10737_v25  ;;  %7505 = vmatpush1.bf16.msra.mxu1 %v9698_v17  ;;  %v4045_v1 = vpop.f32.mrf.mxu0  ;;  %v9743_v17 = vld [vmem:[#allocation11 + $0xde0] ss:$16 sps:$4 sm:$0xff]  }
 0x3b7   :  { %v4046_v10 = vadd.f32 %v4045_v1, %v858_v38  ;;  %v4086_v2 = vpop.f32.mrf.mxu1  ;;  %7465 = vmatprep.subr.bf16.mxu0 %v9703_v60  ;;  %7506 = vmatprep.subr.bf16.mxu1 %v9706_v27  ;;  %v9746_v38 = vld [vmem:[#allocation11 + $0xfe0] ss:$16 sps:$4 sm:$0xff]   ;;  %v9751_v60 = vld [vmem:[#allocation11 + $0xdc4] ss:$16 sps:$4 sm:$0xff]  }
 0x3b8   :  { %v4047_v50 = vpop.f32.mrf.mxu0  ;;  %v9754_v27 = vld [vmem:[#allocation11 + $0xfc4] ss:$16 sps:$4 sm:$0xff]   ;;  %v9752_v1 = vld [vmem:[#allocation11 + $0xfc0] ss:$16 sps:$4 sm:$0xff]  }
 0x3b9   :  { %v4087_v46 = vadd.f32 %v4086_v2, %v4046_v10  ;;  %v4088_v14 = vpop.f32.mrf.mxu1  ;;  %7466 = vmatpush1.bf16.msra.mxu0 %v9701_v39  ;;  %v9749_v39 = vld [vmem:[#allocation11 + $0xdc0] ss:$16 sps:$4 sm:$0xff]   ;;  %v9766_v50 = vld [vmem:[#allocation11 + $0xf84] ss:$16 sps:$4 sm:$0xff]  }
 0x3ba   :  { %7507 = vmatpush1.bf16.msra.mxu1 %v9704_v40  ;;  %v4048_v24 = vpop.f32.mrf.mxu0  ;;  %7467 = vmatprep.subr.bf16.mxu0 %v9709_v9  ;;  %v9757_v40 = vld [vmem:[#allocation11 + $0xda4] ss:$16 sps:$4 sm:$0xff]   ;;  %v9755_v10 = vld [vmem:[#allocation11 + $0xda0] ss:$16 sps:$4 sm:$0xff]  }
 0x3bb   :  { %v4106_v29 = vmax.f32 %v4087_v46, 0.0  ;;  %v4089_v30 = vpop.f32.mrf.mxu1  ;;  %7508 = vmatprep.subr.bf16.mxu1 %v9712_v4  ;;  %v9760_v9 = vld [vmem:[#allocation11 + $0xfa4] ss:$16 sps:$4 sm:$0xff]   ;;  %v9758_v2 = vld [vmem:[#allocation11 + $0xfa0] ss:$16 sps:$4 sm:$0xff]  }
 0x3bc   :  { %v9763_v4 = vld [vmem:[#allocation11 + $0xd84] ss:$16 sps:$4 sm:$0xff]   ;;  %v9761_v46 = vld [vmem:[#allocation11 + $0xd80] ss:$16 sps:$4 sm:$0xff]   ;;  %v10210_v30 = vld [vmem:[#allocation10 + $0x8] sm:$0xff] }
 0x3bd   :  { %v10746_v32 = vpack.c.bf16 %v4106_v29, %v4106_v29  ;;  %7468 = vmatpush1.bf16.msra.mxu0 %v9707_v23  ;;  %v9764_v14 = vld [vmem:[#allocation11 + $0xf80] ss:$16 sps:$4 sm:$0xff]   ;;  %v9769_v23 = vld [vmem:[#allocation11 + $0xd64] ss:$16 sps:$4 sm:$0xff]  }
 0x3be   :  { %7509 = vmatpush1.bf16.msra.mxu1 %v9710_v11  ;;  %7469 = vmatprep.subr.bf16.mxu0 %v9715_v28  ;;  %v9772_v24 = vld [vmem:[#allocation11 + $0xf64] ss:$16 sps:$4 sm:$0xff]   ;;  %v9767_v11 = vld [vmem:[#allocation11 + $0xd60] ss:$16 sps:$4 sm:$0xff]  }
 0x3bf   :  { %7536 = vmatprep.mubr.bf16.mxu1 %v10746_v32  ;;  %7510 = vmatprep.subr.bf16.mxu1 %v9718_v31  ;;  %v9770_v28 = vld [vmem:[#allocation11 + $0xf60] ss:$16 sps:$4 sm:$0xff]   ;;  %v9775_v29 = vld [vmem:[#allocation11 + $0xd44] ss:$16 sps:$4 sm:$0xff]   ;;  %v854_v31 = vrot.slane %v10210_v30, %v821_v3  ;;  %v9817_v30 = vld [vmem:[#allocation11 + $0x6c] ss:$16 sps:$4 sm:$0xff]  }
 0x3c0   :  { %v9790_v3 = vld [vmem:[#allocation11 + $0xf04] ss:$16 sps:$4 sm:$0xff]  }
 0x3c1   :  { %7470 = vmatpush1.bf16.msra.mxu0 %v9713_v33  ;;  %v9778_v33 = vld [vmem:[#allocation11 + $0xf44] ss:$16 sps:$4 sm:$0xff]  }
 0x3c2   :  { %7511 = vmatpush1.bf16.msra.mxu1 %v9716_v49  ;;  %7471 = vmatprep.subr.bf16.mxu0 %v9721_v34  ;;  %v9773_v49 = vld [vmem:[#allocation11 + $0xd40] ss:$16 sps:$4 sm:$0xff]  }
 0x3c3   :  { %7512 = vmatprep.subr.bf16.mxu1 %v9724_v36  ;;  %v9776_v34 = vld [vmem:[#allocation11 + $0xf40] ss:$16 sps:$4 sm:$0xff]   ;;  %v9781_v36 = vld [vmem:[#allocation11 + $0xd24] ss:$16 sps:$4 sm:$0xff]  }
 0x3c5   :  { %7472 = vmatpush1.bf16.msra.mxu0 %v9719_v37  ;;  %v4044_v37 = vadd.f32 %v10739_v61, %v854_v31  ;;  %v4635_v61 = vld [vmem:[#allocation13] sm:$0xf]  ;;  %v9820_v31 = vld [vmem:[#allocation11 + $0x26c] ss:$16 sps:$4 sm:$0xff]  }
 0x3c6   :  { %7513 = vmatpush1.bf16.msra.mxu1 %v9722_v44  ;;  %7473 = vmatprep.subr.bf16.mxu0 %v9727_v41  ;;  %v9784_v44 = vld [vmem:[#allocation11 + $0xf24] ss:$16 sps:$4 sm:$0xff]   ;;  %v9779_v41 = vld [vmem:[#allocation11 + $0xd20] ss:$16 sps:$4 sm:$0xff]  }
 0x3c7   :  { %7514 = vmatprep.subr.bf16.mxu1 %v9730_v42  ;;  %v9782_v42 = vld [vmem:[#allocation11 + $0xf20] ss:$16 sps:$4 sm:$0xff]   ;;  %v4085_v16 = vadd.f32 %v10742_v35, %v4044_v37  ;;  %v9794_v35 = vld [vmem:[#allocation11 + $0x2e8] ss:$16 sps:$4 sm:$0xff]  }
 0x3c8   :  { %v9821_v37 = vld [vmem:[#allocation11 + $0x48] ss:$16 sps:$4 sm:$0xff]  }
 0x3c9   :  { %7474 = vmatpush1.bf16.msra.mxu0 %v9725_v43  ;;  %v9787_v43 = vld [vmem:[#allocation11 + $0xd04] ss:$16 sps:$4 sm:$0xff]  }
 0x3ca   :  { %7515 = vmatpush1.bf16.msra.mxu1 %v9728_v45  ;;  %7475 = vmatprep.subr.bf16.mxu0 %v9733_v51  ;;  %v9785_v45 = vld [vmem:[#allocation11 + $0xd00] ss:$16 sps:$4 sm:$0xff]  }
 0x3cb   :  { %7516 = vmatprep.subr.bf16.mxu1 %v9736_v8  ;;  %v9788_v51 = vld [vmem:[#allocation11 + $0xf00] ss:$16 sps:$4 sm:$0xff]   ;;  %v4103_v8 = vmax.f32 %v10718_v15, 0.0  ;;  %v4644_v15 = vrot.slane %v4635_v61, %v10564_v20 }
 0x3cd   :  { %7476 = vmatpush1.bf16.msra.mxu0 %v9731_v52  ;;  %v9793_v52 = vld [vmem:[#allocation11 + $0xec] ss:$16 sps:$4 sm:$0xff]  }
 0x3ce   :  { %7517 = vmatpush1.bf16.msra.mxu1 %v9734_v53  ;;  %7477 = vmatprep.subr.bf16.mxu0 %v9739_v47  ;;  %v4105_v53 = vmax.f32 %v4085_v16, 0.0  ;;  %v9796_v47 = vld [vmem:[#allocation11 + $0x2ec] ss:$16 sps:$4 sm:$0xff]   ;;  %v9830_v16 = vld [vmem:[#allocation11 + $0x228] ss:$16 sps:$4 sm:$0xff]  }
 0x3cf   :  { %7518 = vmatprep.subr.bf16.mxu1 %v9742_v55  ;;  %v4640_v55 = vrot.slane %v4635_v61, %v10558_v18  ;;  %v9797_v18 = vld [vmem:[#allocation11 + $0xc8] ss:$16 sps:$4 sm:$0xff]   ;;  %v9841_v61 = vld [vmem:[#allocation11 + $0x1ec] ss:$16 sps:$4 sm:$0xff]  }
 0x3d1   :  { %7478 = vmatpush1.bf16.msra.mxu0 %v9737_v13  ;;  %v9791_v13 = vld [vmem:[#allocation11 + $0xe8] ss:$16 sps:$4 sm:$0xff]  }
 0x3d2   :  { %7519 = vmatpush1.bf16.msra.mxu1 %v9740_v56  ;;  %7479 = vmatprep.subr.bf16.mxu0 %v9745_v57  ;;  %v10755_v56 = vpack.c.bf16 %v4103_v8, %v4103_v8  ;;  %v10757_v57 = vpack.c.bf16 %v4105_v53, %v4105_v53  ;;  %v9836_v8 = vld [vmem:[#allocation11 + $0x208] ss:$16 sps:$4 sm:$0xff]  }
 0x3d3   :  { %7520 = vmatprep.subr.bf16.mxu1 %v9748_v22  ;;  %v9799_v22 = vld [vmem:[#allocation11 + $0xcc] ss:$16 sps:$4 sm:$0xff]   ;;  %v9839_v53 = vld [vmem:[#allocation11 + $0x1e8] ss:$16 sps:$4 sm:$0xff]  }
 0x3d5   :  { %7480 = vmatpush2.bf16.msra.mxu0 %v9743_v17 }
 0x3d6   :  { %7521 = vmatpush2.bf16.msra.mxu1 %v9746_v38  ;;  %7481 = vmatprep.subr.bf16.mxu0 %v9751_v60  ;;  %v9802_v38 = vld [vmem:[#allocation11 + $0x2cc] ss:$16 sps:$4 sm:$0xff]  }
 0x3d7   :  { %7522 = vmatprep.subr.bf16.mxu1 %v9754_v27 }
 0x3d9   :  { %7482 = vmatpush2.bf16.msra.mxu0 %v9749_v39 }
 0x3da   :  { %7523 = vmatpush2.bf16.msra.mxu1 %v9752_v1  ;;  %7483 = vmatprep.subr.bf16.mxu0 %v9757_v40  ;;  %v9800_v1 = vld [vmem:[#allocation11 + $0x2c8] ss:$16 sps:$4 sm:$0xff]   ;;  %v9805_v40 = vld [vmem:[#allocation11 + $0xac] ss:$16 sps:$4 sm:$0xff]  }
 0x3db   :  { %7524 = vmatprep.subr.bf16.mxu1 %v9760_v9 }
 0x3dd   :  { %7484 = vmatpush2.bf16.msra.mxu0 %v9755_v10 }
 0x3de   :  { %7525 = vmatpush2.bf16.msra.mxu1 %v9758_v2  ;;  %7485 = vmatprep.subr.bf16.mxu0 %v9763_v4  ;;  %v9808_v2 = vld [vmem:[#allocation11 + $0x2ac] ss:$16 sps:$4 sm:$0xff]  }
 0x3df   :  { %7526 = vmatprep.subr.bf16.mxu1 %v9766_v50 }
 0x3e1   :  { %7486 = vmatpush2.bf16.msra.mxu0 %v9761_v46 }
 0x3e2   :  { %7527 = vmatpush2.bf16.msra.mxu1 %v9764_v14  ;;  %7487 = vmatprep.subr.bf16.mxu0 %v9769_v23  ;;  %v9803_v14 = vld [vmem:[#allocation11 + $0xa8] ss:$16 sps:$4 sm:$0xff]  }
 0x3e3   :  { %7528 = vmatprep.subr.bf16.mxu1 %v9772_v24  ;;  %v9806_v23 = vld [vmem:[#allocation11 + $0x2a8] ss:$16 sps:$4 sm:$0xff]   ;;  %v9811_v24 = vld [vmem:[#allocation11 + $0x8c] ss:$16 sps:$4 sm:$0xff]  }
 0x3e5   :  { %7488 = vmatpush2.bf16.msra.mxu0 %v9767_v11 }
 0x3e6   :  { %7529 = vmatpush2.bf16.msra.mxu1 %v9770_v28  ;;  %7489 = vmatprep.subr.bf16.mxu0 %v9775_v29  ;;  %v9814_v28 = vld [vmem:[#allocation11 + $0x28c] ss:$16 sps:$4 sm:$0xff]   ;;  %v9812_v29 = vld [vmem:[#allocation11 + $0x288] ss:$16 sps:$4 sm:$0xff]  }
 0x3e7   :  { %7530 = vmatprep.subr.bf16.mxu1 %v9778_v33  ;;  %v9815_v33 = vld [vmem:[#allocation11 + $0x68] ss:$16 sps:$4 sm:$0xff]  }
 0x3e9   :  { %7490 = vmatpush2.bf16.msra.mxu0 %v9773_v49  ;;  %v9818_v49 = vld [vmem:[#allocation11 + $0x268] ss:$16 sps:$4 sm:$0xff]  }
 0x3ea   :  { %7531 = vmatpush2.bf16.msra.mxu1 %v9776_v34  ;;  %7491 = vmatprep.subr.bf16.mxu0 %v9781_v36  ;;  %v9823_v34 = vld [vmem:[#allocation11 + $0x4c] ss:$16 sps:$4 sm:$0xff]  }
 0x3eb   :  { %7532 = vmatprep.subr.bf16.mxu1 %v9784_v44  ;;  %v9826_v36 = vld [vmem:[#allocation11 + $0x24c] ss:$16 sps:$4 sm:$0xff]   ;;  %v9824_v44 = vld [vmem:[#allocation11 + $0x248] ss:$16 sps:$4 sm:$0xff]  }
 0x3ed   :  { %7492 = vmatpush2.bf16.msra.mxu0 %v9779_v41  ;;  %v9829_v41 = vld [vmem:[#allocation11 + $0x2c] ss:$16 sps:$4 sm:$0xff]  }
 0x3ee   :  { %7533 = vmatpush2.bf16.msra.mxu1 %v9782_v42  ;;  %7493 = vmatprep.subr.bf16.mxu0 %v9787_v43  ;;  %v9832_v42 = vld [vmem:[#allocation11 + $0x22c] ss:$16 sps:$4 sm:$0xff]   ;;  %v9827_v43 = vld [vmem:[#allocation11 + $0x28] ss:$16 sps:$4 sm:$0xff]  }
 0x3ef   :  { %7534 = vmatprep.subr.bf16.mxu1 %v9790_v3  ;;  %v9835_v3 = vld [vmem:[#allocation11 + $0xc] ss:$16 sps:$4 sm:$0xff]  }
 0x3f1   :  { %7494 = vmatpush2.bf16.msra.mxu0 %v9785_v45  ;;  %v9838_v45 = vld [vmem:[#allocation11 + $0x20c] ss:$16 sps:$4 sm:$0xff]  }
 0x3f2   :  { %7535 = vmatpush2.bf16.msra.mxu1 %v9788_v51  ;;  %7545 = vmatprep.subr.bf16.mxu0 %v9793_v52  ;;  %v9833_v51 = vld [vmem:[#allocation11 + $0x8] ss:$16 sps:$4 sm:$0xff]   ;;  %v9844_v52 = vld [vmem:[#allocation11 + $0x3ec] ss:$16 sps:$4 sm:$0xff]  }
 0x3f3   :  { %7586 = vmatprep.subr.bf16.mxu1 %v9796_v47  ;;  %v9842_v47 = vld [vmem:[#allocation11 + $0x3e8] ss:$16 sps:$4 sm:$0xff]  }
 0x3f4   :  { %v7251_v17 = vpop.f32.mrf.mxu0  ;;  %7496 = vmatmul.mubr.bf16.vlgmr.msra.gmra.mxu0 %v10755_v56 }
 0x3f5   :  { %v7252_v60 = vadd.f32 %v7251_v17, %v4640_v55  ;;  %v7292_v27 = vpop.f32.mrf.mxu1  ;;  %7537 = vmatmul.mubr.bf16.vlgmr.msra.gmra.mxu1 %v10757_v57  ;;  %7546 = vmatpush1.bf16.msra.mxu0 %v9791_v13  ;;  %v9847_v55 = vld [vmem:[#allocation11 + $0x1cc] ss:$16 sps:$4 sm:$0xff]  }
 0x3f6   :  { %7577 = vmatprep.mubr.bf16.mxu0 %v10659_v26  ;;  %7587 = vmatpush1.bf16.msra.mxu1 %v9794_v35  ;;  %v7253_v39 = vpop.f32.mrf.mxu0  ;;  %v9850_v13 = vld [vmem:[#allocation11 + $0x3cc] ss:$16 sps:$4 sm:$0xff]   ;;  %v9845_v35 = vld [vmem:[#allocation11 + $0x1c8] ss:$16 sps:$4 sm:$0xff]  }
 0x3f7   :  { %v10763_v9 = vadd.f32 %v7292_v27, %v7252_v60  ;;  %7618 = vmatprep.mubr.bf16.mxu1 %v10662_v59  ;;  %v7254_v20 = vadd.f32 %v7253_v39, %v4644_v15  ;;  %v7294_v10 = vpop.f32.mrf.mxu1  ;;  %7547 = vmatprep.subr.bf16.mxu0 %v9799_v22  ;;  %v9809_v59 = vld [vmem:[#allocation11 + $0x88] ss:$16 sps:$4 sm:$0xff]   ;;  %v9853_v22 = vld [vmem:[#allocation11 + $0x1ac] ss:$16 sps:$4 sm:$0xff]  }
 0x3f8   :  { %v7255_v4 = vpop.f32.mrf.mxu0  ;;  %7588 = vmatprep.subr.bf16.mxu1 %v9802_v38  ;;  %v9848_v15 = vld [vmem:[#allocation11 + $0x3c8] ss:$16 sps:$4 sm:$0xff]   ;;  %v9856_v17 = vld [vmem:[#allocation11 + $0x3ac] ss:$16 sps:$4 sm:$0xff]  }
 0x3f9   :  { %v10766_v50 = vadd.f32 %v7294_v10, %v7254_v20  ;;  %v7296_v46 = vpop.f32.mrf.mxu1  ;;  %7548 = vmatpush1.bf16.msra.mxu0 %v9797_v18  ;;  %v9851_v38 = vld [vmem:[#allocation11 + $0x1a8] ss:$16 sps:$4 sm:$0xff]   ;;  %v9859_v27 = vld [vmem:[#allocation11 + $0x18c] ss:$16 sps:$4 sm:$0xff]  }
 0x3fa   :  { %7589 = vmatpush1.bf16.msra.mxu1 %v9800_v1  ;;  %v7256_v26 = vpop.f32.mrf.mxu0  ;;  %7549 = vmatprep.subr.bf16.mxu0 %v9805_v40  ;;  %v9854_v60 = vld [vmem:[#allocation11 + $0x3a8] ss:$16 sps:$4 sm:$0xff]   ;;  %v9862_v18 = vld [vmem:[#allocation11 + $0x38c] ss:$16 sps:$4 sm:$0xff]  }
 0x3fb   :  { %v7297_v11 = vpop.f32.mrf.mxu1  ;;  %7590 = vmatprep.subr.bf16.mxu1 %v9808_v2  ;;  %v9857_v39 = vld [vmem:[#allocation11 + $0x188] ss:$16 sps:$4 sm:$0xff]   ;;  %v9865_v40 = vld [vmem:[#allocation11 + $0x16c] ss:$16 sps:$4 sm:$0xff]  }
 0x3fc   :  { %v9860_v1 = vld [vmem:[#allocation11 + $0x388] ss:$16 sps:$4 sm:$0xff]   ;;  %v9868_v20 = vld [vmem:[#allocation11 + $0x36c] ss:$16 sps:$4 sm:$0xff]  }
 0x3fd   :  { %7550 = vmatpush1.bf16.msra.mxu0 %v9803_v14  ;;  %v9863_v10 = vld [vmem:[#allocation11 + $0x168] ss:$16 sps:$4 sm:$0xff]   ;;  %v9871_v4 = vld [vmem:[#allocation11 + $0x14c] ss:$16 sps:$4 sm:$0xff]  }
 0x3fe   :  { %7591 = vmatpush1.bf16.msra.mxu1 %v9806_v23  ;;  %7551 = vmatprep.subr.bf16.mxu0 %v9811_v24  ;;  %v9866_v2 = vld [vmem:[#allocation11 + $0x368] ss:$16 sps:$4 sm:$0xff]   ;;  %v9874_v46 = vld [vmem:[#allocation11 + $0x34c] ss:$16 sps:$4 sm:$0xff]  }
 0x3ff   :  { %7592 = vmatprep.subr.bf16.mxu1 %v9814_v28  ;;  %v9869_v14 = vld [vmem:[#allocation11 + $0x148] ss:$16 sps:$4 sm:$0xff]   ;;  %v9877_v23 = vld [vmem:[#allocation11 + $0x12c] ss:$16 sps:$4 sm:$0xff]  }
 0x400   :  { %v9872_v26 = vld [vmem:[#allocation11 + $0x348] ss:$16 sps:$4 sm:$0xff]   ;;  %v9880_v24 = vld [vmem:[#allocation11 + $0x32c] ss:$16 sps:$4 sm:$0xff]  }
 0x401   :  { %7552 = vmatpush1.bf16.msra.mxu0 %v9809_v59  ;;  %v9875_v11 = vld [vmem:[#allocation11 + $0x128] ss:$16 sps:$4 sm:$0xff]   ;;  %v9883_v59 = vld [vmem:[#allocation11 + $0x10c] ss:$16 sps:$4 sm:$0xff]  }
 0x402   :  { %7593 = vmatpush1.bf16.msra.mxu1 %v9812_v29  ;;  %7553 = vmatprep.subr.bf16.mxu0 %v9817_v30  ;;  %v9878_v28 = vld [vmem:[#allocation11 + $0x328] ss:$16 sps:$4 sm:$0xff]   ;;  %v9886_v29 = vld [vmem:[#allocation11 + $0x30c] ss:$16 sps:$4 sm:$0xff]  }
 0x403   :  { %7594 = vmatprep.subr.bf16.mxu1 %v9820_v31  ;;  %v9881_v30 = vld [vmem:[#allocation11 + $0x108] ss:$16 sps:$4 sm:$0xff]  }
 0x404   :  { %v9884_v31 = vld [vmem:[#allocation11 + $0x308] ss:$16 sps:$4 sm:$0xff]  }
 0x405   :  { %7554 = vmatpush1.bf16.msra.mxu0 %v9815_v33  ;;  %v9889_v33 = vld [vmem:[#allocation11 + $0x4ec] ss:$16 sps:$4 sm:$0xff]  }
 0x406   :  { %7595 = vmatpush1.bf16.msra.mxu1 %v9818_v49  ;;  %7555 = vmatprep.subr.bf16.mxu0 %v9823_v34  ;;  %v9892_v49 = vld [vmem:[#allocation11 + $0x6ec] ss:$16 sps:$4 sm:$0xff]   ;;  %v9887_v34 = vld [vmem:[#allocation11 + $0x4e8] ss:$16 sps:$4 sm:$0xff]  }
 0x407   :  { %7596 = vmatprep.subr.bf16.mxu1 %v9826_v36  ;;  %v9890_v36 = vld [vmem:[#allocation11 + $0x6e8] ss:$16 sps:$4 sm:$0xff]  }
 0x409   :  { %7556 = vmatpush1.bf16.msra.mxu0 %v9821_v37  ;;  %v9895_v37 = vld [vmem:[#allocation11 + $0x4cc] ss:$16 sps:$4 sm:$0xff]  }
 0x40a   :  { %7597 = vmatpush1.bf16.msra.mxu1 %v9824_v44  ;;  %7557 = vmatprep.subr.bf16.mxu0 %v9829_v41  ;;  %v9898_v41 = vld [vmem:[#allocation11 + $0x6cc] ss:$16 sps:$4 sm:$0xff]  }
 0x40b   :  { %7598 = vmatprep.subr.bf16.mxu1 %v9832_v42 }
 0x40d   :  { %7558 = vmatpush1.bf16.msra.mxu0 %v9827_v43 }
 0x40e   :  { %7599 = vmatpush1.bf16.msra.mxu1 %v9830_v16  ;;  %7559 = vmatprep.subr.bf16.mxu0 %v9835_v3  ;;  %v9893_v16 = vld [vmem:[#allocation11 + $0x4c8] ss:$16 sps:$4 sm:$0xff]  }
 0x40f   :  { %7600 = vmatprep.subr.bf16.mxu1 %v9838_v45  ;;  %v9896_v45 = vld [vmem:[#allocation11 + $0x6c8] ss:$16 sps:$4 sm:$0xff]  }
 0x411   :  { %7560 = vmatpush1.bf16.msra.mxu0 %v9833_v51  ;;  %v9901_v51 = vld [vmem:[#allocation11 + $0x4ac] ss:$16 sps:$4 sm:$0xff]  }
 0x412   :  { %7601 = vmatpush1.bf16.msra.mxu1 %v9836_v8  ;;  %7561 = vmatprep.subr.bf16.mxu0 %v9841_v61 }
 0x413   :  { %7602 = vmatprep.subr.bf16.mxu1 %v9844_v52 }
 0x415   :  { %7562 = vmatpush2.bf16.msra.mxu0 %v9839_v53 }
 0x416   :  { %7603 = vmatpush2.bf16.msra.mxu1 %v9842_v47  ;;  %7563 = vmatprep.subr.bf16.mxu0 %v9847_v55  ;;  %v9902_v55 = vld [vmem:[#allocation11 + $0x6a8] ss:$16 sps:$4 sm:$0xff]  }
 0x417   :  { %7604 = vmatprep.subr.bf16.mxu1 %v9850_v13  ;;  %v9907_v13 = vld [vmem:[#allocation11 + $0x48c] ss:$16 sps:$4 sm:$0xff]  }
 0x419   :  { %7564 = vmatpush2.bf16.msra.mxu0 %v9845_v35 }
 0x41a   :  { %7605 = vmatpush2.bf16.msra.mxu1 %v9848_v15  ;;  %7565 = vmatprep.subr.bf16.mxu0 %v9853_v22  ;;  %v9908_v15 = vld [vmem:[#allocation11 + $0x688] ss:$16 sps:$4 sm:$0xff]   ;;  %v9913_v22 = vld [vmem:[#allocation11 + $0x46c] ss:$16 sps:$4 sm:$0xff]  }
 0x41b   :  { %7606 = vmatprep.subr.bf16.mxu1 %v9856_v17  ;;  %v9916_v17 = vld [vmem:[#allocation11 + $0x66c] ss:$16 sps:$4 sm:$0xff]  }
 0x41d   :  { %7566 = vmatpush2.bf16.msra.mxu0 %v9851_v38  ;;  %v9911_v38 = vld [vmem:[#allocation11 + $0x468] ss:$16 sps:$4 sm:$0xff]  }
 0x41e   :  { %7607 = vmatpush2.bf16.msra.mxu1 %v9854_v60  ;;  %7567 = vmatprep.subr.bf16.mxu0 %v9859_v27  ;;  %v9914_v60 = vld [vmem:[#allocation11 + $0x668] ss:$16 sps:$4 sm:$0xff]   ;;  %v9919_v27 = vld [vmem:[#allocation11 + $0x44c] ss:$16 sps:$4 sm:$0xff]  }
 0x41f   :  { %7608 = vmatprep.subr.bf16.mxu1 %v9862_v18  ;;  %v9922_v18 = vld [vmem:[#allocation11 + $0x64c] ss:$16 sps:$4 sm:$0xff]  }
 0x421   :  { %7568 = vmatpush2.bf16.msra.mxu0 %v9857_v39  ;;  %v9917_v39 = vld [vmem:[#allocation11 + $0x448] ss:$16 sps:$4 sm:$0xff]  }
 0x422   :  { %7609 = vmatpush2.bf16.msra.mxu1 %v9860_v1  ;;  %7569 = vmatprep.subr.bf16.mxu0 %v9865_v40  ;;  %v9920_v1 = vld [vmem:[#allocation11 + $0x648] ss:$16 sps:$4 sm:$0xff]   ;;  %v9925_v40 = vld [vmem:[#allocation11 + $0x42c] ss:$16 sps:$4 sm:$0xff]  }
 0x423   :  { %7610 = vmatprep.subr.bf16.mxu1 %v9868_v20  ;;  %v9928_v20 = vld [vmem:[#allocation11 + $0x62c] ss:$16 sps:$4 sm:$0xff]  }
 0x425   :  { %7570 = vmatpush2.bf16.msra.mxu0 %v9863_v10  ;;  %v9923_v10 = vld [vmem:[#allocation11 + $0x428] ss:$16 sps:$4 sm:$0xff]  }
 0x426   :  { %7611 = vmatpush2.bf16.msra.mxu1 %v9866_v2  ;;  %7571 = vmatprep.subr.bf16.mxu0 %v9871_v4  ;;  %v9926_v2 = vld [vmem:[#allocation11 + $0x628] ss:$16 sps:$4 sm:$0xff]   ;;  %v9931_v4 = vld [vmem:[#allocation11 + $0x40c] ss:$16 sps:$4 sm:$0xff]  }
 0x427   :  { %7612 = vmatprep.subr.bf16.mxu1 %v9874_v46  ;;  %v9934_v46 = vld [vmem:[#allocation11 + $0x60c] ss:$16 sps:$4 sm:$0xff]  }
 0x429   :  { %7572 = vmatpush2.bf16.msra.mxu0 %v9869_v14  ;;  %v9929_v14 = vld [vmem:[#allocation11 + $0x408] ss:$16 sps:$4 sm:$0xff]  }
 0x42a   :  { %7613 = vmatpush2.bf16.msra.mxu1 %v9872_v26  ;;  %7573 = vmatprep.subr.bf16.mxu0 %v9877_v23  ;;  %v9932_v26 = vld [vmem:[#allocation11 + $0x608] ss:$16 sps:$4 sm:$0xff]   ;;  %v9937_v23 = vld [vmem:[#allocation11 + $0x5ec] ss:$16 sps:$4 sm:$0xff]  }
 0x42b   :  { %7614 = vmatprep.subr.bf16.mxu1 %v9880_v24  ;;  %v9940_v24 = vld [vmem:[#allocation11 + $0x7ec] ss:$16 sps:$4 sm:$0xff]  }
 0x42d   :  { %7574 = vmatpush2.bf16.msra.mxu0 %v9875_v11  ;;  %v9935_v11 = vld [vmem:[#allocation11 + $0x5e8] ss:$16 sps:$4 sm:$0xff]  }
 0x42e   :  { %7615 = vmatpush2.bf16.msra.mxu1 %v9878_v28  ;;  %7575 = vmatprep.subr.bf16.mxu0 %v9883_v59  ;;  %v9938_v28 = vld [vmem:[#allocation11 + $0x7e8] ss:$16 sps:$4 sm:$0xff]   ;;  %v9943_v59 = vld [vmem:[#allocation11 + $0x5cc] ss:$16 sps:$4 sm:$0xff]  }
 0x42f   :  { %7616 = vmatprep.subr.bf16.mxu1 %v9886_v29  ;;  %v9946_v29 = vld [vmem:[#allocation11 + $0x7cc] ss:$16 sps:$4 sm:$0xff]  }
 0x431   :  { %7576 = vmatpush2.bf16.msra.mxu0 %v9881_v30  ;;  %v9941_v30 = vld [vmem:[#allocation11 + $0x5c8] ss:$16 sps:$4 sm:$0xff]  }
 0x432   :  { %7617 = vmatpush2.bf16.msra.mxu1 %v9884_v31  ;;  %7627 = vmatprep.subr.bf16.mxu0 %v9889_v33  ;;  %v9944_v31 = vld [vmem:[#allocation11 + $0x7c8] ss:$16 sps:$4 sm:$0xff]   ;;  %v9949_v33 = vld [vmem:[#allocation11 + $0x5ac] ss:$16 sps:$4 sm:$0xff]  }
 0x433   :  { %7668 = vmatprep.subr.bf16.mxu1 %v9892_v49  ;;  %v9952_v49 = vld [vmem:[#allocation11 + $0x7ac] ss:$16 sps:$4 sm:$0xff]  }
 0x434   :  { %v7333_v44 = vpop.f32.mrf.mxu0  ;;  %7578 = vmatmul.mubr.bf16.vlgmr.msra.gmra.mxu0 %v10677_v6 }
 0x435   :  { %v7334_v42 = vadd.f32 %v7333_v44, %v10763_v9  ;;  %v7374_v43 = vpop.f32.mrf.mxu1  ;;  %7619 = vmatmul.mubr.bf16.vlgmr.msra.gmra.mxu1 %v10679_v7  ;;  %7628 = vmatpush1.bf16.msra.mxu0 %v9887_v34  ;;  %v9904_v9 = vld [vmem:[#allocation11 + $0x6ac] ss:$16 sps:$4 sm:$0xff]   ;;  %v9947_v34 = vld [vmem:[#allocation11 + $0x5a8] ss:$16 sps:$4 sm:$0xff]  }
 0x436   :  { %7659 = vmatprep.mubr.bf16.mxu0 %v10681_v12  ;;  %7669 = vmatpush1.bf16.msra.mxu1 %v9890_v36  ;;  %v7335_v3 = vpop.f32.mrf.mxu0  ;;  %v9899_v12 = vld [vmem:[#allocation11 + $0x4a8] ss:$16 sps:$4 sm:$0xff]   ;;  %v9958_v44 = vld [vmem:[#allocation11 + $0x78c] ss:$16 sps:$4 sm:$0xff]  }
 0x437   :  { %v10772_v8 = vadd.f32 %v7374_v43, %v7334_v42  ;;  %7700 = vmatprep.mubr.bf16.mxu1 %v10684_v54  ;;  %v7336_v6 = vadd.f32 %v7335_v3, %v10766_v50  ;;  %v7376_v61 = vpop.f32.mrf.mxu1  ;;  %7629 = vmatprep.subr.bf16.mxu0 %v9895_v37  ;;  %v9910_v54 = vld [vmem:[#allocation11 + $0x68c] ss:$16 sps:$4 sm:$0xff]   ;;  %v9905_v50 = vld [vmem:[#allocation11 + $0x488] ss:$16 sps:$4 sm:$0xff]  }
 0x438   :  { %v7337_v52 = vpop.f32.mrf.mxu0  ;;  %7670 = vmatprep.subr.bf16.mxu1 %v9898_v41  ;;  %v9950_v36 = vld [vmem:[#allocation11 + $0x7a8] ss:$16 sps:$4 sm:$0xff]   ;;  %v9955_v37 = vld [vmem:[#allocation11 + $0x58c] ss:$16 sps:$4 sm:$0xff]  }
 0x439   :  { %v10776_v7 = vadd.f32 %v7376_v61, %v7336_v6  ;;  %v7378_v53 = vpop.f32.mrf.mxu1  ;;  %7630 = vmatpush1.bf16.msra.mxu0 %v9893_v16  ;;  %v9953_v41 = vld [vmem:[#allocation11 + $0x588] ss:$16 sps:$4 sm:$0xff]   ;;  %v9961_v43 = vld [vmem:[#allocation11 + $0x56c] ss:$16 sps:$4 sm:$0xff]  }
 0x43a   :  { %7671 = vmatpush1.bf16.msra.mxu1 %v9896_v45  ;;  %v7338_v47 = vpop.f32.mrf.mxu0  ;;  %7631 = vmatprep.subr.bf16.mxu0 %v9901_v51  ;;  %v9956_v42 = vld [vmem:[#allocation11 + $0x788] ss:$16 sps:$4 sm:$0xff]   ;;  %v9964_v16 = vld [vmem:[#allocation11 + $0x76c] ss:$16 sps:$4 sm:$0xff]  }
 0x43b   :  { %v7379_v35 = vpop.f32.mrf.mxu1  ;;  %7672 = vmatprep.subr.bf16.mxu1 %v9904_v9  ;;  %v9959_v3 = vld [vmem:[#allocation11 + $0x568] ss:$16 sps:$4 sm:$0xff]   ;;  %v9967_v51 = vld [vmem:[#allocation11 + $0x54c] ss:$16 sps:$4 sm:$0xff]  }
 0x43c   :  { %v9962_v45 = vld [vmem:[#allocation11 + $0x768] ss:$16 sps:$4 sm:$0xff]   ;;  %v9970_v6 = vld [vmem:[#allocation11 + $0x74c] ss:$16 sps:$4 sm:$0xff]  }
 0x43d   :  { %7632 = vmatpush1.bf16.msra.mxu0 %v9899_v12  ;;  %v9965_v61 = vld [vmem:[#allocation11 + $0x548] ss:$16 sps:$4 sm:$0xff]   ;;  %v9973_v52 = vld [vmem:[#allocation11 + $0x52c] ss:$16 sps:$4 sm:$0xff]  }
 0x43e   :  { %7673 = vmatpush1.bf16.msra.mxu1 %v9902_v55  ;;  %7633 = vmatprep.subr.bf16.mxu0 %v9907_v13  ;;  %v9968_v9 = vld [vmem:[#allocation11 + $0x748] ss:$16 sps:$4 sm:$0xff]   ;;  %v9976_v53 = vld [vmem:[#allocation11 + $0x72c] ss:$16 sps:$4 sm:$0xff]  }
 0x43f   :  { %7674 = vmatprep.subr.bf16.mxu1 %v9910_v54  ;;  %v9971_v12 = vld [vmem:[#allocation11 + $0x528] ss:$16 sps:$4 sm:$0xff]   ;;  %v9979_v55 = vld [vmem:[#allocation11 + $0x50c] ss:$16 sps:$4 sm:$0xff]  }
 0x440   :  { %v9974_v47 = vld [vmem:[#allocation11 + $0x728] ss:$16 sps:$4 sm:$0xff]   ;;  %v9982_v13 = vld [vmem:[#allocation11 + $0x70c] ss:$16 sps:$4 sm:$0xff]  }
 0x441   :  { %7634 = vmatpush1.bf16.msra.mxu0 %v9905_v50  ;;  %v9977_v35 = vld [vmem:[#allocation11 + $0x508] ss:$16 sps:$4 sm:$0xff]   ;;  %v9985_v50 = vld [vmem:[#allocation11 + $0x8ec] ss:$16 sps:$4 sm:$0xff]  }
 0x442   :  { %7675 = vmatpush1.bf16.msra.mxu1 %v9908_v15  ;;  %7635 = vmatprep.subr.bf16.mxu0 %v9913_v22  ;;  %v9980_v54 = vld [vmem:[#allocation11 + $0x708] ss:$16 sps:$4 sm:$0xff]   ;;  %v9988_v15 = vld [vmem:[#allocation11 + $0xaec] ss:$16 sps:$4 sm:$0xff]  }
 0x443   :  { %7676 = vmatprep.subr.bf16.mxu1 %v9916_v17  ;;  %v9983_v22 = vld [vmem:[#allocation11 + $0x8e8] ss:$16 sps:$4 sm:$0xff]  }
 0x444   :  { %v9986_v17 = vld [vmem:[#allocation11 + $0xae8] ss:$16 sps:$4 sm:$0xff]  }
 0x445   :  { %7636 = vmatpush1.bf16.msra.mxu0 %v9911_v38  ;;  %v9991_v38 = vld [vmem:[#allocation11 + $0x8cc] ss:$16 sps:$4 sm:$0xff]  }
 0x446   :  { %7677 = vmatpush1.bf16.msra.mxu1 %v9914_v60  ;;  %7637 = vmatprep.subr.bf16.mxu0 %v9919_v27  ;;  %v9994_v27 = vld [vmem:[#allocation11 + $0xacc] ss:$16 sps:$4 sm:$0xff]  }
 0x447   :  { %7678 = vmatprep.subr.bf16.mxu1 %v9922_v18 }
 0x449   :  { %7638 = vmatpush1.bf16.msra.mxu0 %v9917_v39 }
 0x44a   :  { %7679 = vmatpush1.bf16.msra.mxu1 %v9920_v1  ;;  %7639 = vmatprep.subr.bf16.mxu0 %v9925_v40  ;;  %v9989_v1 = vld [vmem:[#allocation11 + $0x8c8] ss:$16 sps:$4 sm:$0xff]  }
 0x44b   :  { %7680 = vmatprep.subr.bf16.mxu1 %v9928_v20  ;;  %v9992_v20 = vld [vmem:[#allocation11 + $0xac8] ss:$16 sps:$4 sm:$0xff]  }
 0x44d   :  { %7640 = vmatpush1.bf16.msra.mxu0 %v9923_v10  ;;  %v9997_v10 = vld [vmem:[#allocation11 + $0x8ac] ss:$16 sps:$4 sm:$0xff]  }
 0x44e   :  { %7681 = vmatpush1.bf16.msra.mxu1 %v9926_v2  ;;  %7641 = vmatprep.subr.bf16.mxu0 %v9931_v4 }
 0x44f   :  { %7682 = vmatprep.subr.bf16.mxu1 %v9934_v46 }
 0x451   :  { %7642 = vmatpush1.bf16.msra.mxu0 %v9929_v14 }
 0x452   :  { %7683 = vmatpush1.bf16.msra.mxu1 %v9932_v26  ;;  %7643 = vmatprep.subr.bf16.mxu0 %v9937_v23  ;;  %v9998_v23 = vld [vmem:[#allocation11 + $0xaa8] ss:$16 sps:$4 sm:$0xff]  }
 0x453   :  { %7684 = vmatprep.subr.bf16.mxu1 %v9940_v24  ;;  %v10003_v24 = vld [vmem:[#allocation11 + $0x88c] ss:$16 sps:$4 sm:$0xff]  }
 0x455   :  { %7644 = vmatpush2.bf16.msra.mxu0 %v9935_v11 }
 0x456   :  { %7685 = vmatpush2.bf16.msra.mxu1 %v9938_v28  ;;  %7645 = vmatprep.subr.bf16.mxu0 %v9943_v59  ;;  %v10004_v28 = vld [vmem:[#allocation11 + $0xa88] ss:$16 sps:$4 sm:$0xff]   ;;  %v10009_v59 = vld [vmem:[#allocation11 + $0x86c] ss:$16 sps:$4 sm:$0xff]  }
 0x457   :  { %7686 = vmatprep.subr.bf16.mxu1 %v9946_v29  ;;  %v10012_v29 = vld [vmem:[#allocation11 + $0xa6c] ss:$16 sps:$4 sm:$0xff]  }
 0x459   :  { %7646 = vmatpush2.bf16.msra.mxu0 %v9941_v30  ;;  %v10007_v30 = vld [vmem:[#allocation11 + $0x868] ss:$16 sps:$4 sm:$0xff]  }
 0x45a   :  { %7687 = vmatpush2.bf16.msra.mxu1 %v9944_v31  ;;  %7647 = vmatprep.subr.bf16.mxu0 %v9949_v33  ;;  %v10010_v31 = vld [vmem:[#allocation11 + $0xa68] ss:$16 sps:$4 sm:$0xff]   ;;  %v10015_v33 = vld [vmem:[#allocation11 + $0x84c] ss:$16 sps:$4 sm:$0xff]  }
 0x45b   :  { %7688 = vmatprep.subr.bf16.mxu1 %v9952_v49  ;;  %v10018_v49 = vld [vmem:[#allocation11 + $0xa4c] ss:$16 sps:$4 sm:$0xff]  }
 0x45d   :  { %7648 = vmatpush2.bf16.msra.mxu0 %v9947_v34  ;;  %v10013_v34 = vld [vmem:[#allocation11 + $0x848] ss:$16 sps:$4 sm:$0xff]  }
 0x45e   :  { %7689 = vmatpush2.bf16.msra.mxu1 %v9950_v36  ;;  %7649 = vmatprep.subr.bf16.mxu0 %v9955_v37  ;;  %v10016_v36 = vld [vmem:[#allocation11 + $0xa48] ss:$16 sps:$4 sm:$0xff]   ;;  %v10021_v37 = vld [vmem:[#allocation11 + $0x82c] ss:$16 sps:$4 sm:$0xff]  }
 0x45f   :  { %7690 = vmatprep.subr.bf16.mxu1 %v9958_v44  ;;  %v10024_v44 = vld [vmem:[#allocation11 + $0xa2c] ss:$16 sps:$4 sm:$0xff]  }
 0x461   :  { %7650 = vmatpush2.bf16.msra.mxu0 %v9953_v41  ;;  %v10019_v41 = vld [vmem:[#allocation11 + $0x828] ss:$16 sps:$4 sm:$0xff]  }
 0x462   :  { %7691 = vmatpush2.bf16.msra.mxu1 %v9956_v42  ;;  %7651 = vmatprep.subr.bf16.mxu0 %v9961_v43  ;;  %v10022_v42 = vld [vmem:[#allocation11 + $0xa28] ss:$16 sps:$4 sm:$0xff]   ;;  %v10027_v43 = vld [vmem:[#allocation11 + $0x80c] ss:$16 sps:$4 sm:$0xff]  }
 0x463   :  { %7692 = vmatprep.subr.bf16.mxu1 %v9964_v16  ;;  %v10030_v16 = vld [vmem:[#allocation11 + $0xa0c] ss:$16 sps:$4 sm:$0xff]  }
 0x465   :  { %7652 = vmatpush2.bf16.msra.mxu0 %v9959_v3  ;;  %v10025_v3 = vld [vmem:[#allocation11 + $0x808] ss:$16 sps:$4 sm:$0xff]  }
 0x466   :  { %7693 = vmatpush2.bf16.msra.mxu1 %v9962_v45  ;;  %7653 = vmatprep.subr.bf16.mxu0 %v9967_v51  ;;  %v10028_v45 = vld [vmem:[#allocation11 + $0xa08] ss:$16 sps:$4 sm:$0xff]   ;;  %v10033_v51 = vld [vmem:[#allocation11 + $0x9ec] ss:$16 sps:$4 sm:$0xff]  }
 0x467   :  { %7694 = vmatprep.subr.bf16.mxu1 %v9970_v6  ;;  %v10036_v6 = vld [vmem:[#allocation11 + $0xbec] ss:$16 sps:$4 sm:$0xff]  }
 0x469   :  { %7654 = vmatpush2.bf16.msra.mxu0 %v9965_v61  ;;  %v10031_v61 = vld [vmem:[#allocation11 + $0x9e8] ss:$16 sps:$4 sm:$0xff]  }
 0x46a   :  { %7695 = vmatpush2.bf16.msra.mxu1 %v9968_v9  ;;  %7655 = vmatprep.subr.bf16.mxu0 %v9973_v52  ;;  %v10034_v9 = vld [vmem:[#allocation11 + $0xbe8] ss:$16 sps:$4 sm:$0xff]   ;;  %v10039_v52 = vld [vmem:[#allocation11 + $0x9cc] ss:$16 sps:$4 sm:$0xff]  }
 0x46b   :  { %7696 = vmatprep.subr.bf16.mxu1 %v9976_v53  ;;  %v10042_v53 = vld [vmem:[#allocation11 + $0xbcc] ss:$16 sps:$4 sm:$0xff]  }
 0x46d   :  { %7656 = vmatpush2.bf16.msra.mxu0 %v9971_v12  ;;  %v10037_v12 = vld [vmem:[#allocation11 + $0x9c8] ss:$16 sps:$4 sm:$0xff]  }
 0x46e   :  { %7697 = vmatpush2.bf16.msra.mxu1 %v9974_v47  ;;  %7657 = vmatprep.subr.bf16.mxu0 %v9979_v55  ;;  %v10040_v47 = vld [vmem:[#allocation11 + $0xbc8] ss:$16 sps:$4 sm:$0xff]   ;;  %v10045_v55 = vld [vmem:[#allocation11 + $0x9ac] ss:$16 sps:$4 sm:$0xff]  }
 0x46f   :  { %7698 = vmatprep.subr.bf16.mxu1 %v9982_v13  ;;  %v10048_v13 = vld [vmem:[#allocation11 + $0xbac] ss:$16 sps:$4 sm:$0xff]  }
 0x471   :  { %7658 = vmatpush2.bf16.msra.mxu0 %v9977_v35  ;;  %v10043_v35 = vld [vmem:[#allocation11 + $0x9a8] ss:$16 sps:$4 sm:$0xff]  }
 0x472   :  { %7699 = vmatpush2.bf16.msra.mxu1 %v9980_v54  ;;  %7709 = vmatprep.subr.bf16.mxu0 %v9985_v50  ;;  %v10046_v54 = vld [vmem:[#allocation11 + $0xba8] ss:$16 sps:$4 sm:$0xff]   ;;  %v10051_v50 = vld [vmem:[#allocation11 + $0x98c] ss:$16 sps:$4 sm:$0xff]  }
 0x473   :  { %7750 = vmatprep.subr.bf16.mxu1 %v9988_v15  ;;  %v10054_v15 = vld [vmem:[#allocation11 + $0xb8c] ss:$16 sps:$4 sm:$0xff]  }
 0x474   :  { %v7415_v60 = vpop.f32.mrf.mxu0  ;;  %7660 = vmatmul.mubr.bf16.vlgmr.msra.gmra.mxu0 %v10705_v62 }
 0x475   :  { %v7416_v18 = vadd.f32 %v7415_v60, %v10772_v8  ;;  %v7456_v39 = vpop.f32.mrf.mxu1  ;;  %7701 = vmatmul.mubr.bf16.vlgmr.msra.gmra.mxu1 %v10707_v63  ;;  %7710 = vmatpush1.bf16.msra.mxu0 %v9983_v22  ;;  %v10000_v8 = vld [vmem:[#allocation11 + $0xaac] ss:$16 sps:$4 sm:$0xff]   ;;  %v10049_v22 = vld [vmem:[#allocation11 + $0x988] ss:$16 sps:$4 sm:$0xff]  }
 0x476   :  { %7741 = vmatprep.mubr.bf16.mxu0 %v10709_v0  ;;  %7751 = vmatpush1.bf16.msra.mxu1 %v9986_v17  ;;  %v7417_v40 = vpop.f32.mrf.mxu0  ;;  %v9995_v0 = vld [vmem:[#allocation11 + $0x8a8] ss:$16 sps:$4 sm:$0xff]   ;;  %v10060_v60 = vld [vmem:[#allocation11 + $0xb6c] ss:$16 sps:$4 sm:$0xff]  }
 0x477   :  { %v10782_v2 = vadd.f32 %v7456_v39, %v7416_v18  ;;  %7782 = vmatprep.mubr.bf16.mxu1 %v10712_v5  ;;  %v7418_v62 = vadd.f32 %v7417_v40, %v10776_v7  ;;  %v7458_v4 = vpop.f32.mrf.mxu1  ;;  %7711 = vmatprep.subr.bf16.mxu0 %v9991_v38  ;;  %v10006_v5 = vld [vmem:[#allocation11 + $0xa8c] ss:$16 sps:$4 sm:$0xff]   ;;  %v10001_v7 = vld [vmem:[#allocation11 + $0x888] ss:$16 sps:$4 sm:$0xff]  }
 0x478   :  { %v7419_v46 = vpop.f32.mrf.mxu0  ;;  %7752 = vmatprep.subr.bf16.mxu1 %v9994_v27  ;;  %v10052_v17 = vld [vmem:[#allocation11 + $0xb88] ss:$16 sps:$4 sm:$0xff]   ;;  %v10057_v38 = vld [vmem:[#allocation11 + $0x96c] ss:$16 sps:$4 sm:$0xff]  }
 0x479   :  { %v10786_v63 = vadd.f32 %v7458_v4, %v7418_v62  ;;  %v7460_v14 = vpop.f32.mrf.mxu1  ;;  %7712 = vmatpush1.bf16.msra.mxu0 %v9989_v1  ;;  %v10055_v27 = vld [vmem:[#allocation11 + $0x968] ss:$16 sps:$4 sm:$0xff]   ;;  %v10063_v39 = vld [vmem:[#allocation11 + $0x94c] ss:$16 sps:$4 sm:$0xff]  }
 0x47a   :  { %7753 = vmatpush1.bf16.msra.mxu1 %v9992_v20  ;;  %v7420_v26 = vpop.f32.mrf.mxu0  ;;  %7713 = vmatprep.subr.bf16.mxu0 %v9997_v10  ;;  %v10058_v18 = vld [vmem:[#allocation11 + $0xb68] ss:$16 sps:$4 sm:$0xff]   ;;  %v10066_v1 = vld [vmem:[#allocation11 + $0xb4c] ss:$16 sps:$4 sm:$0xff]  }
 0x47b   :  { %v7461_v11 = vpop.f32.mrf.mxu1  ;;  %7754 = vmatprep.subr.bf16.mxu1 %v10000_v8  ;;  %v10061_v40 = vld [vmem:[#allocation11 + $0x948] ss:$16 sps:$4 sm:$0xff]   ;;  %v10069_v10 = vld [vmem:[#allocation11 + $0x92c] ss:$16 sps:$4 sm:$0xff]  }
 0x47c   :  { %v10064_v20 = vld [vmem:[#allocation11 + $0xb48] ss:$16 sps:$4 sm:$0xff]   ;;  %v10072_v62 = vld [vmem:[#allocation11 + $0xb2c] ss:$16 sps:$4 sm:$0xff]  }
 0x47d   :  { %7714 = vmatpush1.bf16.msra.mxu0 %v9995_v0  ;;  %v10067_v4 = vld [vmem:[#allocation11 + $0x928] ss:$16 sps:$4 sm:$0xff]   ;;  %v10075_v46 = vld [vmem:[#allocation11 + $0x90c] ss:$16 sps:$4 sm:$0xff]  }
 0x47e   :  { %7755 = vmatpush1.bf16.msra.mxu1 %v9998_v23  ;;  %7715 = vmatprep.subr.bf16.mxu0 %v10003_v24  ;;  %v10070_v8 = vld [vmem:[#allocation11 + $0xb28] ss:$16 sps:$4 sm:$0xff]   ;;  %v10078_v14 = vld [vmem:[#allocation11 + $0xb0c] ss:$16 sps:$4 sm:$0xff]  }
 0x47f   :  { %7756 = vmatprep.subr.bf16.mxu1 %v10006_v5  ;;  %v10073_v0 = vld [vmem:[#allocation11 + $0x908] ss:$16 sps:$4 sm:$0xff]   ;;  %v10081_v23 = vld [vmem:[#allocation11 + $0xcec] ss:$16 sps:$4 sm:$0xff]  }
 0x480   :  { %v10076_v26 = vld [vmem:[#allocation11 + $0xb08] ss:$16 sps:$4 sm:$0xff]   ;;  %v10084_v24 = vld [vmem:[#allocation11 + $0xeec] ss:$16 sps:$4 sm:$0xff]  }
 0x481   :  { %7716 = vmatpush1.bf16.msra.mxu0 %v10001_v7  ;;  %v10079_v11 = vld [vmem:[#allocation11 + $0xce8] ss:$16 sps:$4 sm:$0xff]   ;;  %v10087_v7 = vld [vmem:[#allocation11 + $0xccc] ss:$16 sps:$4 sm:$0xff]  }
 0x482   :  { %7757 = vmatpush1.bf16.msra.mxu1 %v10004_v28  ;;  %7717 = vmatprep.subr.bf16.mxu0 %v10009_v59  ;;  %v10082_v5 = vld [vmem:[#allocation11 + $0xee8] ss:$16 sps:$4 sm:$0xff]   ;;  %v10090_v59 = vld [vmem:[#allocation11 + $0xecc] ss:$16 sps:$4 sm:$0xff]  }
 0x483   :  { %7758 = vmatprep.subr.bf16.mxu1 %v10012_v29 }
 0x485   :  { %7718 = vmatpush1.bf16.msra.mxu0 %v10007_v30 }
 0x486   :  { %7759 = vmatpush1.bf16.msra.mxu1 %v10010_v31  ;;  %7719 = vmatprep.subr.bf16.mxu0 %v10015_v33  ;;  %v10085_v31 = vld [vmem:[#allocation11 + $0xcc8] ss:$16 sps:$4 sm:$0xff]  }
 0x487   :  { %7760 = vmatprep.subr.bf16.mxu1 %v10018_v49  ;;  %v10088_v49 = vld [vmem:[#allocation11 + $0xec8] ss:$16 sps:$4 sm:$0xff]  }
 0x489   :  { %7720 = vmatpush1.bf16.msra.mxu0 %v10013_v34  ;;  %v10093_v34 = vld [vmem:[#allocation11 + $0xcac] ss:$16 sps:$4 sm:$0xff]  }
 0x48a   :  { %7761 = vmatpush1.bf16.msra.mxu1 %v10016_v36  ;;  %7721 = vmatprep.subr.bf16.mxu0 %v10021_v37 }
 0x48b   :  { %7762 = vmatprep.subr.bf16.mxu1 %v10024_v44  ;;  %v10091_v44 = vld [vmem:[#allocation11 + $0xca8] ss:$16 sps:$4 sm:$0xff]  }
 0x48d   :  { %7722 = vmatpush1.bf16.msra.mxu0 %v10019_v41  ;;  %v10094_v41 = vld [vmem:[#allocation11 + $0xea8] ss:$16 sps:$4 sm:$0xff]  }
 0x48e   :  { %7763 = vmatpush1.bf16.msra.mxu1 %v10022_v42  ;;  %7723 = vmatprep.subr.bf16.mxu0 %v10027_v43  ;;  %v10099_v42 = vld [vmem:[#allocation11 + $0xc8c] ss:$16 sps:$4 sm:$0xff]  }
 0x48f   :  { %7764 = vmatprep.subr.bf16.mxu1 %v10030_v16  ;;  %v10102_v16 = vld [vmem:[#allocation11 + $0xe8c] ss:$16 sps:$4 sm:$0xff]  }
 0x491   :  { %7724 = vmatpush1.bf16.msra.mxu0 %v10025_v3  ;;  %v10097_v3 = vld [vmem:[#allocation11 + $0xc88] ss:$16 sps:$4 sm:$0xff]  }
 0x492   :  { %7765 = vmatpush1.bf16.msra.mxu1 %v10028_v45  ;;  %7725 = vmatprep.subr.bf16.mxu0 %v10033_v51  ;;  %v10105_v45 = vld [vmem:[#allocation11 + $0xc6c] ss:$16 sps:$4 sm:$0xff]  }
 0x493   :  { %7766 = vmatprep.subr.bf16.mxu1 %v10036_v6  ;;  %v10108_v51 = vld [vmem:[#allocation11 + $0xe6c] ss:$16 sps:$4 sm:$0xff]   ;;  %v10103_v6 = vld [vmem:[#allocation11 + $0xc68] ss:$16 sps:$4 sm:$0xff]  }
 0x495   :  { %7726 = vmatpush2.bf16.msra.mxu0 %v10031_v61  ;;  %v10106_v61 = vld [vmem:[#allocation11 + $0xe68] ss:$16 sps:$4 sm:$0xff]  }
 0x496   :  { %7767 = vmatpush2.bf16.msra.mxu1 %v10034_v9  ;;  %7727 = vmatprep.subr.bf16.mxu0 %v10039_v52  ;;  %v10111_v9 = vld [vmem:[#allocation11 + $0xc4c] ss:$16 sps:$4 sm:$0xff]  }
 0x497   :  { %7768 = vmatprep.subr.bf16.mxu1 %v10042_v53  ;;  %v10114_v52 = vld [vmem:[#allocation11 + $0xe4c] ss:$16 sps:$4 sm:$0xff]   ;;  %v10109_v53 = vld [vmem:[#allocation11 + $0xc48] ss:$16 sps:$4 sm:$0xff]  }
 0x499   :  { %7728 = vmatpush2.bf16.msra.mxu0 %v10037_v12  ;;  %v10112_v12 = vld [vmem:[#allocation11 + $0xe48] ss:$16 sps:$4 sm:$0xff]  }
 0x49a   :  { %7769 = vmatpush2.bf16.msra.mxu1 %v10040_v47  ;;  %7729 = vmatprep.subr.bf16.mxu0 %v10045_v55  ;;  %v10117_v47 = vld [vmem:[#allocation11 + $0xc2c] ss:$16 sps:$4 sm:$0xff]  }
 0x49b   :  { %7770 = vmatprep.subr.bf16.mxu1 %v10048_v13  ;;  %v10120_v55 = vld [vmem:[#allocation11 + $0xe2c] ss:$16 sps:$4 sm:$0xff]   ;;  %v10115_v13 = vld [vmem:[#allocation11 + $0xc28] ss:$16 sps:$4 sm:$0xff]  }
 0x49d   :  { %7730 = vmatpush2.bf16.msra.mxu0 %v10043_v35  ;;  %v10118_v35 = vld [vmem:[#allocation11 + $0xe28] ss:$16 sps:$4 sm:$0xff]  }
 0x49e   :  { %7771 = vmatpush2.bf16.msra.mxu1 %v10046_v54  ;;  %7731 = vmatprep.subr.bf16.mxu0 %v10051_v50  ;;  %v10123_v54 = vld [vmem:[#allocation11 + $0xc0c] ss:$16 sps:$4 sm:$0xff]  }
 0x49f   :  { %7772 = vmatprep.subr.bf16.mxu1 %v10054_v15  ;;  %v10126_v50 = vld [vmem:[#allocation11 + $0xe0c] ss:$16 sps:$4 sm:$0xff]   ;;  %v10121_v15 = vld [vmem:[#allocation11 + $0xc08] ss:$16 sps:$4 sm:$0xff]  }
 0x4a1   :  { %7732 = vmatpush2.bf16.msra.mxu0 %v10049_v22  ;;  %v10124_v22 = vld [vmem:[#allocation11 + $0xe08] ss:$16 sps:$4 sm:$0xff]  }
 0x4a2   :  { %7773 = vmatpush2.bf16.msra.mxu1 %v10052_v17  ;;  %7733 = vmatprep.subr.bf16.mxu0 %v10057_v38  ;;  %v10129_v17 = vld [vmem:[#allocation11 + $0xdec] ss:$16 sps:$4 sm:$0xff]  }
 0x4a3   :  { %7774 = vmatprep.subr.bf16.mxu1 %v10060_v60  ;;  %v10132_v38 = vld [vmem:[#allocation11 + $0xfec] ss:$16 sps:$4 sm:$0xff]   ;;  %v10127_v60 = vld [vmem:[#allocation11 + $0xde8] ss:$16 sps:$4 sm:$0xff]  }
 0x4a5   :  { %7734 = vmatpush2.bf16.msra.mxu0 %v10055_v27  ;;  %v10130_v27 = vld [vmem:[#allocation11 + $0xfe8] ss:$16 sps:$4 sm:$0xff]  }
 0x4a6   :  { %7775 = vmatpush2.bf16.msra.mxu1 %v10058_v18  ;;  %7735 = vmatprep.subr.bf16.mxu0 %v10063_v39  ;;  %v10135_v18 = vld [vmem:[#allocation11 + $0xdcc] ss:$16 sps:$4 sm:$0xff]  }
 0x4a7   :  { %7776 = vmatprep.subr.bf16.mxu1 %v10066_v1  ;;  %v10138_v39 = vld [vmem:[#allocation11 + $0xfcc] ss:$16 sps:$4 sm:$0xff]   ;;  %v10133_v1 = vld [vmem:[#allocation11 + $0xdc8] ss:$16 sps:$4 sm:$0xff]  }
 0x4a9   :  { %7736 = vmatpush2.bf16.msra.mxu0 %v10061_v40  ;;  %v10136_v40 = vld [vmem:[#allocation11 + $0xfc8] ss:$16 sps:$4 sm:$0xff]  }
 0x4aa   :  { %7777 = vmatpush2.bf16.msra.mxu1 %v10064_v20  ;;  %7737 = vmatprep.subr.bf16.mxu0 %v10069_v10  ;;  %v10141_v20 = vld [vmem:[#allocation11 + $0xdac] ss:$16 sps:$4 sm:$0xff]  }
 0x4ab   :  { %7778 = vmatprep.subr.bf16.mxu1 %v10072_v62  ;;  %v10144_v10 = vld [vmem:[#allocation11 + $0xfac] ss:$16 sps:$4 sm:$0xff]   ;;  %v10139_v62 = vld [vmem:[#allocation11 + $0xda8] ss:$16 sps:$4 sm:$0xff]  }
 0x4ad   :  { %7738 = vmatpush2.bf16.msra.mxu0 %v10067_v4  ;;  %v10142_v4 = vld [vmem:[#allocation11 + $0xfa8] ss:$16 sps:$4 sm:$0xff]  }
 0x4ae   :  { %7779 = vmatpush2.bf16.msra.mxu1 %v10070_v8  ;;  %7739 = vmatprep.subr.bf16.mxu0 %v10075_v46  ;;  %v10147_v8 = vld [vmem:[#allocation11 + $0xd8c] ss:$16 sps:$4 sm:$0xff]  }
 0x4af   :  { %7780 = vmatprep.subr.bf16.mxu1 %v10078_v14  ;;  %v10150_v46 = vld [vmem:[#allocation11 + $0xf8c] ss:$16 sps:$4 sm:$0xff]   ;;  %v10145_v14 = vld [vmem:[#allocation11 + $0xd88] ss:$16 sps:$4 sm:$0xff]  }
 0x4b1   :  { %7740 = vmatpush2.bf16.msra.mxu0 %v10073_v0  ;;  %v10148_v0 = vld [vmem:[#allocation11 + $0xf88] ss:$16 sps:$4 sm:$0xff]  }
 0x4b2   :  { %7781 = vmatpush2.bf16.msra.mxu1 %v10076_v26  ;;  %7791 = vmatprep.subr.bf16.mxu0 %v10081_v23  ;;  %v10153_v26 = vld [vmem:[#allocation11 + $0xd6c] ss:$16 sps:$4 sm:$0xff]  }
 0x4b3   :  { %7832 = vmatprep.subr.bf16.mxu1 %v10084_v24  ;;  %v10156_v23 = vld [vmem:[#allocation11 + $0xf6c] ss:$16 sps:$4 sm:$0xff]   ;;  %v10151_v24 = vld [vmem:[#allocation11 + $0xd68] ss:$16 sps:$4 sm:$0xff]  }
 0x4b4   :  { %v7497_v28 = vpop.f32.mrf.mxu0  ;;  %7742 = vmatmul.mubr.bf16.vlgmr.msra.gmra.mxu0 %v10730_v48 }
 0x4b5   :  { %v7498_v29 = vadd.f32 %v7497_v28, %v10782_v2  ;;  %v7538_v30 = vpop.f32.mrf.mxu1  ;;  %7783 = vmatmul.mubr.bf16.vlgmr.msra.gmra.mxu1 %v10732_v58  ;;  %7792 = vmatpush1.bf16.msra.mxu0 %v10079_v11  ;;  %v10096_v2 = vld [vmem:[#allocation11 + $0xeac] ss:$16 sps:$4 sm:$0xff]   ;;  %v10154_v11 = vld [vmem:[#allocation11 + $0xf68] ss:$16 sps:$4 sm:$0xff]  }
 0x4b6   :  { %7823 = vmatprep.mubr.bf16.mxu0 %v10737_v25  ;;  %7833 = vmatpush1.bf16.msra.mxu1 %v10082_v5  ;;  %v10792_v33 = vpop.f32.mrf.mxu0  ;;  %v10159_v5 = vld [vmem:[#allocation11 + $0xd4c] ss:$16 sps:$4 sm:$0xff]   ;;  %v10157_v28 = vld [vmem:[#allocation11 + $0xd48] ss:$16 sps:$4 sm:$0xff]  }
 0x4b7   :  { %v10794_v36 = vadd.f32 %v7538_v30, %v7498_v29  ;;  %7864 = vmatprep.mubr.bf16.mxu1 %v10746_v32  ;;  %v10797_v48 = vpop.f32.mrf.mxu1  ;;  %7793 = vmatprep.subr.bf16.mxu0 %v10087_v7  ;;  %v10100_v32 = vld [vmem:[#allocation11 + $0xe88] ss:$16 sps:$4 sm:$0xff]   ;;  %v10162_v7 = vld [vmem:[#allocation11 + $0xf4c] ss:$16 sps:$4 sm:$0xff]  }
 0x4b8   :  { %v7501_v37 = vpop.f32.mrf.mxu0  ;;  %7834 = vmatprep.subr.bf16.mxu1 %v10090_v59  ;;  %v10160_v59 = vld [vmem:[#allocation11 + $0xf48] ss:$16 sps:$4 sm:$0xff]   ;;  %v10165_v29 = vld [vmem:[#allocation11 + $0xd2c] ss:$16 sps:$4 sm:$0xff]  }
 0x4b9   :  { %v7542_v58 = vpop.f32.mrf.mxu1  ;;  %7794 = vmatpush1.bf16.msra.mxu0 %v10085_v31  ;;  %v10168_v30 = vld [vmem:[#allocation11 + $0xf2c] ss:$16 sps:$4 sm:$0xff]   ;;  %v7500_v31 = vadd.f32 %v10792_v33, %v10786_v63  ;;  %v10211_v33 = vld [vmem:[#allocation13] sm:$0xf] }
 0x4ba   :  { %7835 = vmatpush1.bf16.msra.mxu1 %v10088_v49  ;;  %v7502_v25 = vpop.f32.mrf.mxu0  ;;  %7795 = vmatprep.subr.bf16.mxu0 %v10093_v34  ;;  %v10163_v49 = vld [vmem:[#allocation11 + $0xd28] ss:$16 sps:$4 sm:$0xff]   ;;  %v10174_v37 = vld [vmem:[#allocation11 + $0xf0c] ss:$16 sps:$4 sm:$0xff]  }
 0x4bb   :  { %v7543_v43 = vpop.f32.mrf.mxu1  ;;  %7836 = vmatprep.subr.bf16.mxu1 %v10096_v2  ;;  %v10166_v34 = vld [vmem:[#allocation11 + $0xf28] ss:$16 sps:$4 sm:$0xff]   ;;  %v10171_v2 = vld [vmem:[#allocation11 + $0xd0c] ss:$16 sps:$4 sm:$0xff]   ;;  %v7541_v58 = vadd.f32 %v10797_v48, %v7500_v31 }
 0x4bc   :  { %v10172_v25 = vld [vmem:[#allocation11 + $0xf08] ss:$16 sps:$4 sm:$0xff]   ;;  %v10176_v43 = vld [vmem:[%s10922_s7 + $0x38] sm:$0xff]  }
 0x4bd   :  { %7796 = vmatpush1.bf16.msra.mxu0 %v10091_v44  ;;  %v10169_v44 = vld [vmem:[#allocation11 + $0xd08] ss:$16 sps:$4 sm:$0xff]   ;;  %v7874_v63 = vmax.f32 %v7541_v58, 0.0 }
 0x4be   :  { %7837 = vmatpush1.bf16.msra.mxu1 %v10094_v41  ;;  %7797 = vmatprep.subr.bf16.mxu0 %v10099_v42  ;;  %v10175_v41 = vld [vmem:[%s10922_s7 + $0x78] sm:$0xff]   ;;  %v4648_v42 = vrot.slane %v10211_v33, %v10561_v19  ;;  %v10177_v48 = vld [vmem:[%s10922_s7 + $0x70] sm:$0xff]   ;;  %v10205_v58 = vld [vmem:[%s10922_s7 + $0xc0] sm:$0xff]  }
 0x4bf   :  { %7838 = vmatprep.subr.bf16.mxu1 %v10102_v16  ;;  %v4652_v16 = vrot.slane %v10211_v33, %v10567_v21  ;;  %v10178_v19 = vld [vmem:[%s10922_s7 + $0x30] sm:$0xff]   ;;  %v10179_v21 = vld [vmem:[%s10922_s7 + $0x68] sm:$0xff]  }
 0x4c1   :  { %7798 = vmatpush1.bf16.msra.mxu0 %v10097_v3  ;;  %v7878_v3 = vpack.c.bf16 %v7874_v63, %v7874_v63 }
 0x4c2   :  { %7839 = vmatpush1.bf16.msra.mxu1 %v10100_v32  ;;  %7799 = vmatprep.subr.bf16.mxu0 %v10105_v45 }
 0x4c3   :  { %7840 = vmatprep.subr.bf16.mxu1 %v10108_v51 }
 0x4c5   :  { %7800 = vmatpush1.bf16.msra.mxu0 %v10103_v6 }
 0x4c6   :  { %7841 = vmatpush1.bf16.msra.mxu1 %v10106_v61  ;;  %7801 = vmatprep.subr.bf16.mxu0 %v10111_v9 }
 0x4c7   :  { %7842 = vmatprep.subr.bf16.mxu1 %v10114_v52 }
 0x4c9   :  { %7802 = vmatpush1.bf16.msra.mxu0 %v10109_v53 }
 0x4ca   :  { %7843 = vmatpush1.bf16.msra.mxu1 %v10112_v12  ;;  %7803 = vmatprep.subr.bf16.mxu0 %v10117_v47 }
 0x4cb   :  { %7844 = vmatprep.subr.bf16.mxu1 %v10120_v55  ;;  %v10181_v55 = vld [vmem:[%s10922_s7 + $0x60] sm:$0xff]  }
 0x4cd   :  { %7804 = vmatpush1.bf16.msra.mxu0 %v10115_v13 }
 0x4ce   :  { %7845 = vmatpush1.bf16.msra.mxu1 %v10118_v35  ;;  %7805 = vmatprep.subr.bf16.mxu0 %v10123_v54  ;;  %v10191_v35 = vld [vmem:[%s10922_s7 + $0xf8] sm:$0xff]  }
 0x4cf   :  { %7846 = vmatprep.subr.bf16.mxu1 %v10126_v50  ;;  %v10192_v54 = vld [vmem:[%s10922_s7 + $0xb8] sm:$0xff]   ;;  %v10193_v50 = vld [vmem:[%s10922_s7 + $0xf0] sm:$0xff]  }
 0x4d1   :  { %7806 = vmatpush1.bf16.msra.mxu0 %v10121_v15  ;;  %v10182_v15 = vld [vmem:[%s10922_s7 + $0x20] sm:$0xff]  }
 0x4d2   :  { %7847 = vmatpush1.bf16.msra.mxu1 %v10124_v22  ;;  %7807 = vmatprep.subr.bf16.mxu0 %v10129_v17  ;;  %v10183_v22 = vld [vmem:[%s10922_s7 + $0x58] sm:$0xff]   ;;  %v10194_v17 = vld [vmem:[%s10922_s7 + $0xb0] sm:$0xff]  }
 0x4d3   :  { %7848 = vmatprep.subr.bf16.mxu1 %v10132_v38  ;;  %v10195_v38 = vld [vmem:[%s10922_s7 + $0xe8] sm:$0xff]  }
 0x4d5   :  { %7808 = vmatpush2.bf16.msra.mxu0 %v10127_v60  ;;  %v10184_v60 = vld [vmem:[%s10922_s7 + $0x18] sm:$0xff]  }
 0x4d6   :  { %7849 = vmatpush2.bf16.msra.mxu1 %v10130_v27  ;;  %7809 = vmatprep.subr.bf16.mxu0 %v10135_v18  ;;  %v10185_v27 = vld [vmem:[%s10922_s7 + $0x50] sm:$0xff]   ;;  %v10196_v18 = vld [vmem:[%s10922_s7 + $0xa8] sm:$0xff]  }
 0x4d7   :  { %7850 = vmatprep.subr.bf16.mxu1 %v10138_v39  ;;  %v10197_v39 = vld [vmem:[%s10922_s7 + $0xe0] sm:$0xff]  }
 0x4d9   :  { %7810 = vmatpush2.bf16.msra.mxu0 %v10133_v1  ;;  %v10186_v1 = vld [vmem:[%s10922_s7 + $0x10] sm:$0xff]  }
 0x4da   :  { %7851 = vmatpush2.bf16.msra.mxu1 %v10136_v40  ;;  %7811 = vmatprep.subr.bf16.mxu0 %v10141_v20  ;;  %v10187_v40 = vld [vmem:[%s10922_s7 + $0x48] sm:$0xff]   ;;  %v10198_v20 = vld [vmem:[%s10922_s7 + $0xa0] sm:$0xff]  }
 0x4db   :  { %7852 = vmatprep.subr.bf16.mxu1 %v10144_v10  ;;  %v10199_v10 = vld [vmem:[%s10922_s7 + $0xd8] sm:$0xff]  }
 0x4dd   :  { %7812 = vmatpush2.bf16.msra.mxu0 %v10139_v62  ;;  %v10188_v62 = vld [vmem:[%s10922_s7 + $0x8] sm:$0xff]  }
 0x4de   :  { %7853 = vmatpush2.bf16.msra.mxu1 %v10142_v4  ;;  %7813 = vmatprep.subr.bf16.mxu0 %v10147_v8  ;;  %v10189_v4 = vld [vmem:[%s10922_s7 + $0x40] sm:$0xff]   ;;  %v10200_v8 = vld [vmem:[%s10922_s7 + $0x98] sm:$0xff]  }
 0x4df   :  { %7854 = vmatprep.subr.bf16.mxu1 %v10150_v46  ;;  %v10190_v46 = vld [vmem:[%s10922_s7] sm:$0xff]  }
 0x4e1   :  { %7814 = vmatpush2.bf16.msra.mxu0 %v10145_v14  ;;  %v7873_v14 = vmax.f32 %v10794_v36, 0.0 }
 0x4e2   :  { %7855 = vmatpush2.bf16.msra.mxu1 %v10148_v0  ;;  %7815 = vmatprep.subr.bf16.mxu0 %v10153_v26 }
 0x4e3   :  { %7856 = vmatprep.subr.bf16.mxu1 %v10156_v23  ;;  %v7877_v0 = vpack.c.bf16 %v7873_v14, %v7873_v14  ;;  %v10201_v23 = vld [vmem:[%s10922_s7 + $0xd0] sm:$0xff]  }
 0x4e5   :  { %7816 = vmatpush2.bf16.msra.mxu0 %v10151_v24 }
 0x4e6   :  { %7857 = vmatpush2.bf16.msra.mxu1 %v10154_v11  ;;  %7817 = vmatprep.subr.bf16.mxu0 %v10159_v5  ;;  %v10202_v5 = vld [vmem:[%s10922_s7 + $0x90] sm:$0xff]  }
 0x4e7   :  { %7858 = vmatprep.subr.bf16.mxu1 %v10162_v7 }
 0x4e9   :  { %7818 = vmatpush2.bf16.msra.mxu0 %v10157_v28 }
 0x4ea   :  { %7859 = vmatpush2.bf16.msra.mxu1 %v10160_v59  ;;  %7819 = vmatprep.subr.bf16.mxu0 %v10165_v29 }
 0x4eb   :  { %7860 = vmatprep.subr.bf16.mxu1 %v10168_v30  ;;  %v10203_v30 = vld [vmem:[%s10922_s7 + $0xc8] sm:$0xff]  }
 0x4ed   :  { %7820 = vmatpush2.bf16.msra.mxu0 %v10163_v49 }
 0x4ee   :  { %7861 = vmatpush2.bf16.msra.mxu1 %v10166_v34  ;;  %7821 = vmatprep.subr.bf16.mxu0 %v10171_v2  ;;  %v10204_v34 = vld [vmem:[%s10922_s7 + $0x88] sm:$0xff]  }
 0x4ef   :  { %7862 = vmatprep.subr.bf16.mxu1 %v10174_v37 }
 0x4f1   :  { %7822 = vmatpush2.bf16.msra.mxu0 %v10169_v44  ;;  %v10206_v44 = vld [vmem:[%s10922_s7 + $0x80] sm:$0xff]  }
 0x4f2   :  { %7863 = vmatpush2.bf16.msra.mxu1 %v10172_v25  ;;  %9341 = vmatprep.subr.bf16.mxu0 %v10175_v41 }
 0x4f3   :  { %9363 = vmatprep.subr.bf16.mxu1 %v10191_v35 }
 0x4f4   :  { %v7579_v32 = vpop.f32.mrf.mxu0  ;;  %7824 = vmatmul.mubr.bf16.vlgmr.msra.gmra.mxu0 %v10755_v56 }
 0x4f5   :  { %v7580_v45 = vadd.f32 %v7579_v32, %v4648_v42  ;;  %v7620_v51 = vpop.f32.mrf.mxu1  ;;  %7865 = vmatmul.mubr.bf16.vlgmr.msra.gmra.mxu1 %v10757_v57  ;;  %9342 = vmatpush3.bf16.msra.mxu0 %v10176_v43  ;;  %v10180_v57 = vld [vmem:[%s10922_s7 + $0x28] sm:$0xff]   ;;  %s10460_s7 = smov [#allocation16]  }
 0x4f6   :  { %8176 = vmatprep.mubr.bf16.mxu0 %v7878_v3  ;;  %v7581_v6 = vpop.f32.mrf.mxu0  ;;  %9343 = vmatprep.subr.bf16.mxu0 %v10177_v48  ;;  %s8238_s26 = sshll.u32 %s10460_s7, 4  ;;  %s8239_s26 = int_to_ptr.vmem [resolvable:$true] %s8238_s26 }
 0x4f7   :  { %v7621_v61 = vadd.f32 %v7620_v51, %v7580_v45  ;;  %v7582_v9 = vadd.f32 %v7581_v6, %v4652_v16  ;;  %v7622_v52 = vpop.f32.mrf.mxu1  ;;  %9364 = vmatpush3.bf16.msra.mxu1 %v10192_v54  ;;  %s10373_s5 = scalar_lea.vmem %s8239_s26, 128  ;;  %p10378_p13 = scmp.lt.s32.totalorder %s8239_s26, %s8239_s26 }
 0x4f8   :  { %v7583_v56 = vpop.f32.mrf.mxu0  ;;  %9365 = vmatprep.subr.bf16.mxu1 %v10193_v50  ;;  %p10374_p12 = scmp.ne.s32.totalorder %s8239_s26, %s10373_s5  ;;  %p10379_p0 = scmp.lt.s32.totalorder %s10373_s5, %s10373_s5 }
 0x4f9   :  { %v7623_v53 = vadd.f32 %v7622_v52, %v7582_v9  ;;  %v7624_v12 = vpop.f32.mrf.mxu1  ;;  %9344 = vmatpush3.bf16.msra.mxu0 %v10178_v19 }
 0x4fa   :  { %v7584_v47 = vpop.f32.mrf.mxu0  ;;  %9345 = vmatprep.subr.bf16.mxu0 %v10179_v21  ;;  %p10380_p1 = por %p10379_p0, %p10378_p13 }
 0x4fb   :  { %v7625_v13 = vpop.f32.mrf.mxu1  ;;  %9366 = vmatpush3.bf16.msra.mxu1 %v10194_v17 }
 0x4fc   :  { %9367 = vmatprep.subr.bf16.mxu1 %v10195_v38  ;;  %p10381_p2 = pnand %p10380_p1, %p10374_p12 }
 0x4fd   :  { %9346 = vmatpush3.bf16.msra.mxu0 %v10180_v57 }
 0x4fe   :  { %9347 = vmatprep.subr.bf16.mxu0 %v10181_v55 }
 0x4ff   :  { %9368 = vmatpush3.bf16.msra.mxu1 %v10196_v18 }
 0x500   :  { %9369 = vmatprep.subr.bf16.mxu1 %v10197_v39 }
 0x501   :  { %9348 = vmatpush3.bf16.msra.mxu0 %v10182_v15 }
 0x502   :  { %9349 = vmatprep.subr.bf16.mxu0 %v10183_v22 }
 0x503   :  { %9370 = vmatpush3.bf16.msra.mxu1 %v10198_v20 }
 0x504   :  { %9371 = vmatprep.subr.bf16.mxu1 %v10199_v10 }
 0x505   :  { %9350 = vmatpush3.bf16.msra.mxu0 %v10184_v60 }
 0x506   :  { %9351 = vmatprep.subr.bf16.mxu0 %v10185_v27  ;;  %v9308_v27 = vld [vmem:[#allocation14] ss:$0 sm:$0xff] }
 0x507   :  { %9372 = vmatpush3.bf16.msra.mxu1 %v10200_v8 }
 0x508   :  { %9373 = vmatprep.subr.bf16.mxu1 %v10201_v23 }
 0x509   :  { %9352 = vmatpush3.bf16.msra.mxu0 %v10186_v1 }
 0x50a   :  { %9353 = vmatprep.subr.bf16.mxu0 %v10187_v40 }
 0x50b   :  { %9374 = vmatpush3.bf16.msra.mxu1 %v10202_v5 }
 0x50c   :  { %9375 = vmatprep.subr.bf16.mxu1 %v10203_v30 }
 0x50d   :  { %9354 = vmatpush3.bf16.msra.mxu0 %v10188_v62 }
 0x50e   :  { %9355 = vmatprep.subr.bf16.mxu0 %v10189_v4 }
 0x50f   :  { %9376 = vmatpush3.bf16.msra.mxu1 %v10204_v34 }
 0x510   :  { %9377 = vmatprep.subr.bf16.mxu1 %v10205_v58 }
 0x511   :  { %9356 = vmatpush3.bf16.msra.mxu0 %v10190_v46 }
 0x513   :  { %9378 = vmatpush3.bf16.msra.mxu1 %v10206_v44 }
 0x514   :  { %8177 = vmatmul.mubr.bf16.vlgmr.msra.gmra.mxu0 %v7877_v0 }
 0x534   :  { %v7661_v26 = vpop.f32.mrf.mxu0 }
 0x535   :  { %v7662_v24 = vadd.f32 %v7661_v26, %v7621_v61  ;;  %v7702_v11 = vpop.f32.mrf.mxu1 }
 0x536   :  { %v7663_v7 = vpop.f32.mrf.mxu0 }
 0x537   :  { %v7703_v28 = vadd.f32 %v7702_v11, %v7662_v24  ;;  %v7664_v36 = vadd.f32 %v7663_v7, %v7623_v53  ;;  %v7704_v59 = vpop.f32.mrf.mxu1 }
 0x538   :  { %v7665_v29 = vpop.f32.mrf.mxu0 }
 0x539   :  { %v7705_v31 = vadd.f32 %v7704_v59, %v7664_v36  ;;  %v7706_v49 = vpop.f32.mrf.mxu1 }
 0x53a   :  { %v7666_v2 = vpop.f32.mrf.mxu0 }
 0x53b   :  { %v7707_v37 = vpop.f32.mrf.mxu1 }
 0x574   :  { %v7743_v25 = vpop.f32.mrf.mxu0 }
 0x575   :  { %v7744_v41 = vadd.f32 %v7743_v25, %v7703_v28  ;;  %v7784_v63 = vpop.f32.mrf.mxu1 }
 0x576   :  { %v7745_v33 = vpop.f32.mrf.mxu0 }
 0x577   :  { %v7785_v42 = vadd.f32 %v7784_v63, %v7744_v41  ;;  %v7786_v43 = vpop.f32.mrf.mxu1  ;;  %v7746_v45 = vadd.f32 %v7745_v33, %v7705_v31 }
 0x578   :  { %v7747_v48 = vpop.f32.mrf.mxu0 }
 0x579   :  { %v7788_v16 = vpop.f32.mrf.mxu1  ;;  %v7787_v19 = vadd.f32 %v7786_v43, %v7746_v45 }
 0x57a   :  { %v7748_v3 = vpop.f32.mrf.mxu0 }
 0x57b   :  { %v7789_v32 = vpop.f32.mrf.mxu1 }
 0x5b4   :  { %v7825_v51 = vpop.f32.mrf.mxu0 }
 0x5b5   :  { %v7826_v6 = vadd.f32 %v7825_v51, %v7785_v42  ;;  %v7866_v21 = vpop.f32.mrf.mxu1 }
 0x5b6   :  { %v7827_v61 = vpop.f32.mrf.mxu0 }
 0x5b7   :  { %v7867_v9 = vadd.f32 %v7866_v21, %v7826_v6  ;;  %v7828_v52 = vadd.f32 %v7827_v61, %v7787_v19  ;;  %v7868_v56 = vpop.f32.mrf.mxu1 }
 0x5b8   :  { %v7829_v53 = vpop.f32.mrf.mxu0 }
 0x5b9   :  { %v7869_v12 = vadd.f32 %v7868_v56, %v7828_v52  ;;  %v7870_v57 = vpop.f32.mrf.mxu1  ;;  %v7875_v47 = vmax.f32 %v7867_v9, 0.0 }
 0x5ba   :  { %v7830_v55 = vpop.f32.mrf.mxu0 }
 0x5bb   :  { %v7876_v13 = vmax.f32 %v7869_v12, 0.0  ;;  %v7871_v35 = vpop.f32.mrf.mxu1  ;;  %v7879_v50 = vpack.c.bf16 %v7875_v47, %v7875_v47 }
 0x5bd   :  { %v7880_v54 = vpack.c.bf16 %v7876_v13, %v7876_v13 }
 0x5bf   :  { %8216 = vmatprep.mubr.bf16.mxu1 %v7880_v54 }
 0x5c0   :  { %8217 = vmatmul.mubr.bf16.vlgmr.msra.gmra.mxu1 %v7879_v50 }
 0x5d4   :  { %v9357_v15 = vpop.f32.mrf.mxu0 }
 0x5d6   :  { %v9358_v22 = vpop.f32.mrf.mxu0 }
 0x5d7   :  { %v9359_v17 = vadd.f32 %v9358_v22, %v9357_v15 }
 0x5d8   :  { %v9360_v38 = vpop.f32.mrf.mxu0 }
 0x5d9   :  { %v8179_v1 = vadd.f32 %v9359_v17, %v9308_v27 }
 0x5da   :  { %v9361_v60 = vpop.f32.mrf.mxu0 }
 0x680   :  { %v9379_v18 = vpop.f32.mrf.mxu1 }
 0x682   :  { %v9380_v39 = vpop.f32.mrf.mxu1 }
 0x683   :  { %v9381_v40 = vadd.f32 %v9380_v39, %v9379_v18 }
 0x684   :  { %v9382_v20 = vpop.f32.mrf.mxu1 }
 0x685   :  { %v8219_v10 = vadd.f32 %v9381_v40, %v8179_v1 }
 0x686   :  { %v9383_v62 = vpop.f32.mrf.mxu1 }
 0x687   :  { %10207 = vtanh.f32 %v8219_v10 }
 0x694   :  { %v10208_v4 = vpop.eup %10207 }
 0x695   :  { %8228 = vst.msk [vmem:[#allocation16] sm:$0xff] %vm185_vm0, %v10208_v4  ;;  %v8225_v8 = vadd.f32 0.5, %v10208_v4 }
 0x696   :  { %10384 = shalt.err (!%p10381_p2)
}
 0x697   :  { %8241 = dma.vmem_to_hbm [thread:$0]  %s8239_s26, 128, %s10924_s9, [#allocation4]   ;;  %v8226_v46 = vmax.f32 %v8225_v8, 0.0  ;;  %v10212_v0 = vld [vmem:[#allocation2] sm:$0xff] }
 0x698   :  { %s10461_s0 = smov [#allocation17]   ;;  %s10462_s28 = smov [#allocation19]  }
 0x699   :  { %s8248_s27 = sshll.u32 %s10461_s0, 4  ;;  %v8227_v14 = vmin.f32 %v8226_v46, 1.0  ;;  %s8258_s29 = sshll.u32 %s10462_s28, 4  ;;  %s8249_s27 = int_to_ptr.vmem [resolvable:$true] %s8248_s27  ;;  %s8259_s29 = int_to_ptr.vmem [resolvable:$true] %s8258_s29 }
 0x69a   :  { %s10393_s30 = scalar_lea.vmem %s8249_s27, 128  ;;  %p10398_p4 = scmp.lt.s32.totalorder %s8249_s27, %s8249_s27 }
 0x69b   :  { %v8229_v26 = vmul.f32 %v10212_v0, %v8227_v14  ;;  %8231 = vst.msk [vmem:[#allocation19] sm:$0xff] %vm185_vm0, %v8227_v14  ;;  %p10394_p3 = scmp.ne.s32.totalorder %s8249_s27, %s10393_s30  ;;  %p10399_p5 = scmp.lt.s32.totalorder %s10393_s30, %s10393_s30 }
 0x69d   :  { %8230 = vst.msk [vmem:[#allocation17] sm:$0xff] %vm185_vm0, %v8229_v26  ;;  %p10400_p6 = por %p10399_p5, %p10398_p4 }
 0x69f   :  { %p10401_p7 = pnand %p10400_p6, %p10394_p3 }
 0x6a1   :  { %10404 = shalt.err (!%p10401_p7)
}
 0x6a2   :  { %8251 = dma.vmem_to_hbm [thread:$0]  %s8249_s27, 128, %s10925_s10, [#allocation18]  }
 0x6a3   :  { %s10413_s13 = scalar_lea.vmem %s8259_s29, 128  ;;  %p10418_p9 = scmp.lt.s32.totalorder %s8259_s29, %s8259_s29 }
 0x6a4   :  { %p10414_p8 = scmp.ne.s32.totalorder %s8259_s29, %s10413_s13  ;;  %p10419_p10 = scmp.lt.s32.totalorder %s10413_s13, %s10413_s13 }
 0x6a6   :  { %p10420_p11 = por %p10419_p10, %p10418_p9 }
 0x6a8   :  { %p10421_p12 = pnand %p10420_p11, %p10414_p8 }
 0x6aa   :  { %10424 = shalt.err (!%p10421_p12)
}
 0x6ab   :  { %8261 = dma.vmem_to_hbm [thread:$0]  %s8259_s29, 128, %s10926_s11, [#allocation18]  }
 0x6ac   :  { %10443 = dma.done.wait [#allocation4], 128  }
 0x6ad   :  { %10444 = vsyncadd [#allocation4], 4294967168 }
 0x6ae   :  { %10445 = dma.done.wait [#allocation18], 256  }
 0x6af   :  { %10446 = vsyncadd [#allocation18], 4294967040 }
 0x6b0   :  { %8271 = vsyncpa [#allocation3], 1 }
 0x6b1   :  { %8272 = vsyncpa [#allocation6], 1 }
 0x6b2   :  { %8273 = vsyncpa [#allocation9], 1 }
 0x6b3   :  { %8274 = vsyncpa [#allocation12], 1 }
 0x6b4   :  { %8275 = vsyncpa [#allocation15], 1 }
 0x6b5   :  { %8276 = vsyncpa [#allocation4], 1 }
 0x6b6   :  { %8277 = vsyncpa [#allocation18], 1 }

</bundles_post_ra>
